<compile_context>
chip_gen: v5e
topology: v5e:2x2
jax: 0.10.0
libtpu: 0.0.40
codegen_flags: <defaults>
</compile_context>

<pallas_src>
import jax
import jax.numpy as jnp
import numpy as np
from jax.experimental import pallas as pl
from jax.experimental.pallas import tpu as pltpu


# ---------------------------------------------------------------------------
# Kernel A: Conv3x3(2C->2C)+BN1+ReLU + Conv1x1(2C->C)+BN2+ReLU on a TH-row tile.
# ---------------------------------------------------------------------------
def _make_conv_bn_kernel(TH, W, C, has_halo):
    C2 = 2 * C
    M = TH * W

    def kernel(*refs):
        if has_halo:
            fc_ref, halo_ref, w3_ref, t1_ref, w1_ref, t2_ref, o_ref = refs
            xw = jnp.concatenate([fc_ref[0], halo_ref[0]], axis=0)
        else:
            fc_ref, w3_ref, t1_ref, w1_ref, t2_ref, o_ref = refs
            xw = fc_ref[0]
        # xw: (TH+2, W+2, 2C) bf16, zero-padded f_c window of this row tile.

        # Hoist the dj column shifts once (3 shifted windows instead of 9/18
        # re-slices).  Slice in f32 so odd sublane offsets never touch packed
        # bf16 layouts, cast each shifted window to bf16 exactly once, and
        # pre-flatten rows into the matmul M dim (row slices below are aligned).
        xw32 = xw.astype(jnp.float32)
        cols = [
            xw32[:, dj:dj + W, :].astype(jnp.bfloat16).reshape((TH + 2) * W, C2)
            for dj in range(3)
        ]

        # 3x3 conv: 9 MXU dots with K=2C (x1/x2 halves merged into one weight),
        # f32 accumulation in registers / the MXU -- no VMEM RMW scratch.
        # TODO(synk): a single K=9*2C im2col dot (minor-dim concat of the taps)
        # would fill the MXU deeper still; kept as 9 register-accumulated dots
        # for lowering robustness.
        acc = jnp.zeros((M, C2), jnp.float32)
        for di in range(3):
            for dj in range(3):
                tap = cols[dj][di * W:di * W + M]
                acc = acc + jnp.dot(tap, w3_ref[di, dj],
                                    preferred_element_type=jnp.float32)

        y = jnp.maximum(acc + t1_ref[...], 0.0)              # BN1 shift + ReLU
        # TODO(synk): for tiny C the 1x1 convs underfill the MXU; a broadcasted
        # VPU-FMA path would be cheaper for C < ~32 but is not implemented.
        z = jnp.dot(y.astype(jnp.bfloat16), w1_ref[...],     # 1x1 conv (BN2-folded)
                    preferred_element_type=jnp.float32)
        z = jnp.maximum(z + t2_ref[...], 0.0)                 # BN2 shift + ReLU
        # TODO(synk): a lane-dense (TH, W*C) store would avoid masked vst when C
        # is small, but needs a sublane->lane relayout reshape; kept (TH, W, C).
        o_ref[0] = z.reshape(TH, W, C)

    return kernel


# ---------------------------------------------------------------------------
# Kernel C: f_d = |x1-x2| in-tile (diff in f32), edge_e(f_d), out = z_d + z_c.
#   edge = f_d - avgpool3x3(f_d); gate = sigmoid(BN(conv1x1(edge)))
#   out  = gate * f_d + f_d + z_c
# ---------------------------------------------------------------------------
def _make_edge_add_kernel(TH, W, C, has_halo):
    def kernel(*refs):
        if has_halo:
            fc_ref, halo_ref, zc_ref, we_ref, te_ref, o_ref = refs
            xw = jnp.concatenate([fc_ref[0], halo_ref[0]], axis=0)
        else:
            fc_ref, zc_ref, we_ref, te_ref, o_ref = refs
            xw = fc_ref[0]

        # bf16 HBM inputs; take the x1-x2 difference in f32 for accuracy.
        xw32 = xw.astype(jnp.float32)                     # (TH+2, W+2, 2C)
        fd = jnp.abs(xw32[..., :C] - xw32[..., C:])       # (TH+2, W+2, C)

        # Separable 3x3 box sum == 9 * AvgPool2d(3, stride=1, pad=1, incl. pad).
        cs = fd[:, 0:W, :] + fd[:, 1:W + 1, :] + fd[:, 2:W + 2, :]   # (TH+2, W, C)
        box = cs[0:TH] + cs[1:TH + 1] + cs[2:TH + 2]                 # (TH,   W, C)

        xc = fd[1:TH + 1, 1:W + 1, :]                     # centre f_d tile
        edge = xc - box * (1.0 / 9.0)

        t = jnp.dot(edge.reshape(TH * W, C).astype(jnp.bfloat16), we_ref[...],
                    preferred_element_type=jnp.float32) + te_ref[...]
        gate = pl.reciprocal(1.0 + jnp.exp(-t), approx=True).reshape(TH, W, C)

        o_ref[0] = gate * xc + xc + zc_ref[0]

    return kernel


# ---------------------------------------------------------------------------
# Generation-dependent VMEM policy (per-row-tile budget, scoped vmem limit).
# ---------------------------------------------------------------------------
def _vmem_config():
    try:
        cap = int(pltpu.get_tpu_info().vmem_capacity_bytes)
    except Exception:
        # Unknown backend: conservative tiles, keep the default scoped limit.
        return 8 * 1024 * 1024, None
    limit = min(int(cap * 3 // 4), 100 * 1024 * 1024)   # 128MiB->96, 64MiB->48
    budget = max(min(limit // 3, 40 * 1024 * 1024), 1 * 1024 * 1024)
    return budget, limit


def _pick_row_tile(H, budget_bytes, bytes_per_row):
    """Largest row tile that fits the budget: whole image if possible, else the
    largest even (preferably multiple-of-8) divisor of H."""
    max_rows = max(1, int(budget_bytes) // max(int(bytes_per_row), 1))
    if H <= max_rows:
        return H                                   # single tile, halo-free path
    even = [d for d in range(2, max_rows + 1, 2) if H % d == 0]
    by8 = [d for d in even if d % 8 == 0]
    if by8:
        return by8[-1]
    if even:
        return even[-1]
    # TODO(synk): no even divisor of H fits the budget (e.g. large prime H);
    # fall back to a single whole-image tile and rely on vmem_limit headroom.
    return H


def _full_spec(arr):
    zeros = (0,) * arr.ndim
    return pl.BlockSpec(tuple(arr.shape), lambda b, i, _z=zeros: _z)


def _window_specs(fcp, TH, has_halo):
    """BlockSpecs (and operands) delivering the padded f_c row window."""
    _, Hp2, Wp2, C2 = fcp.shape
    if has_halo:
        main = pl.BlockSpec((1, TH, Wp2, C2), lambda b, i: (b, i, 0, 0))
        halo = pl.BlockSpec((1, 2, Wp2, C2),
                            lambda b, i: (b, (i + 1) * (TH // 2), 0, 0))
        return [main, halo], [fcp, fcp]
    full = pl.BlockSpec((1, Hp2, Wp2, C2), lambda b, i: (b, 0, 0, 0))
    return [full], [fcp]


# ---------------------------------------------------------------------------
# Parameters (deterministic synthetic init, PyTorch layouts, then re-packed:
# inference-mode BN scales folded into the conv weights, weights stored bf16).
# ---------------------------------------------------------------------------
def init_params(key, C, H, W):
    C2 = 2 * C
    Wf = W // 2 + 1
    eps = 1e-5
    ks = jax.random.split(key, 13)

    # CoDEM2.Conv3 (2C->2C, 3x3) / BN1
    w3 = jax.random.normal(ks[0], (C2, C2, 3, 3), jnp.float32) * 0.05   # OIHW
    b3 = jax.random.normal(ks[1], (C2,), jnp.float32) * 0.05
    g1 = 1.0 + jax.random.normal(ks[2], (C2,), jnp.float32) * 0.05
    be1 = jax.random.normal(ks[3], (C2,), jnp.float32) * 0.05
    m1, v1 = jnp.zeros((C2,), jnp.float32), jnp.ones((C2,), jnp.float32)

    # CoDEM2.Conv1 (2C->C, 1x1) / BN2
    w1 = jax.random.normal(ks[4], (C, C2, 1, 1), jnp.float32) * 0.05
    b1 = jax.random.normal(ks[5], (C,), jnp.float32) * 0.05
    g2 = 1.0 + jax.random.normal(ks[6], (C,), jnp.float32) * 0.05
    be2 = jax.random.normal(ks[7], (C,), jnp.float32) * 0.05
    m2, v2 = jnp.zeros((C,), jnp.float32), jnp.ones((C,), jnp.float32)

    # quzaosheng.complex_weight : (dim, H, W//2+1, 2) * 0.02
    cw = jax.random.normal(ks[8], (C, H, Wf, 2), jnp.float32) * 0.02

    # edge_e.conv_1 (C->C, 1x1) / bn1
    we = jax.random.normal(ks[9], (C, C, 1, 1), jnp.float32) * 0.05
    beb = jax.random.normal(ks[10], (C,), jnp.float32) * 0.05
    ge = 1.0 + jax.random.normal(ks[11], (C,), jnp.float32) * 0.05
    bee = jax.random.normal(ks[12], (C,), jnp.float32) * 0.05
    me, ve = jnp.zeros((C,), jnp.float32), jnp.ones((C,), jnp.float32)

    # Fold inference-mode BN scale into the weights; keep only the shift.
    s1 = g1 / jnp.sqrt(v1 + eps); t1 = (b3 - m1) * s1 + be1
    s2 = g2 / jnp.sqrt(v2 + eps); t2 = (b1 - m2) * s2 + be2
    se = ge / jnp.sqrt(ve + eps); te = (beb - me) * se + bee

    w3_hwio = jnp.transpose(w3, (2, 3, 1, 0)) * s1      # (3,3,2C,2C), BN1-folded
    w1_mat = jnp.transpose(w1[:, :, 0, 0], (1, 0)) * s2  # (2C, C),     BN2-folded
    we_mat = jnp.transpose(we[:, :, 0, 0], (1, 0)) * se  # (C, C),      BNe-folded

    wf = (cw[..., 0] + 1j * cw[..., 1]).astype(jnp.complex64)
    wf = jnp.transpose(wf, (1, 2, 0))[None]              # (1, H, Wf, C)

    return dict(
        w3=w3_hwio.astype(jnp.bfloat16),
        w1=w1_mat.astype(jnp.bfloat16),
        we=we_mat.astype(jnp.bfloat16),
        t1=t1.reshape(1, C2).astype(jnp.float32),
        t2=t2.reshape(1, C).astype(jnp.float32),
        te=te.reshape(1, C).astype(jnp.float32),
        wf=wf,
    )


# ---------------------------------------------------------------------------
# Forward
# ---------------------------------------------------------------------------
def codem2_forward(params, x1, x2, *, row_tile=None, edge_row_tile=None):
    B, C, H, W = x1.shape
    C2 = 2 * C
    Wp2 = W + 2

    # NCHW -> NHWC, f_c = cat(x1,x2) on channels, 1px zero halo, bf16 HBM storage.
    # One fused XLA pass; bf16 halves the HBM read traffic of BOTH kernels.
    fcp = jnp.pad(
        jnp.concatenate([jnp.transpose(x1, (0, 2, 3, 1)),
                         jnp.transpose(x2, (0, 2, 3, 1))],
                        axis=-1).astype(jnp.bfloat16),
        ((0, 0), (1, 1), (1, 1), (0, 0)))

    budget, vmem_limit = _vmem_config()
    cparams = pltpu.CompilerParams(
        # Both grid axes are independent -> both parallel (megacore on v7x can
        # split over batch or row tiles, whichever is >= 2).
        dimension_semantics=("parallel", "parallel"),
        vmem_limit_bytes=vmem_limit)

    # Kernel A row tile (heavier per-row footprint: shifted windows + matmuls).
    TH_a = (_pick_row_tile(H, budget, 96 * W * C)
            if row_tile is None else int(row_tile))
    # Kernel C row tile, decoupled: no matmul accumulators -> larger tiles.
    TH_c = (_pick_row_tile(H, budget, 72 * W * C)
            if edge_row_tile is None else int(edge_row_tile))
    for th in (TH_a, TH_c):
        assert H % th == 0 and (th == H or th % 2 == 0), "bad row tile"

    # --- Kernel A: z1 = ReLU(BN2(Conv1(ReLU(BN1(Conv3(f_c)))))) ---------------
    halo_a = (H // TH_a) > 1
    win_specs_a, win_ops_a = _window_specs(fcp, TH_a, halo_a)
    z1 = pl.pallas_call(
        _make_conv_bn_kernel(TH_a, W, C, halo_a),
        out_shape=jax.ShapeDtypeStruct((B, H, W, C), jnp.float32),
        grid=(B, H // TH_a),
        in_specs=win_specs_a + [_full_spec(params['w3']), _full_spec(params['t1']),
                                _full_spec(params['w1']), _full_spec(params['t2'])],
        out_specs=pl.BlockSpec((1, TH_a, W, C), lambda b, i: (b, i, 0, 0)),
        compiler_params=cparams,
    )(*win_ops_a, params['w3'], params['t1'], params['w1'], params['t2'])

    # --- quzaosheng: spectral filtering ---------------------------------------
    # TODO(synk): rfft2/irfft2 have no Pallas/Mosaic primitive; they stay in XLA
    # and the elementwise complex multiply is left for XLA to fuse with the FFTs.
    zf = jnp.fft.rfft2(z1, axes=(1, 2), norm='ortho')
    z_c = jnp.fft.irfft2(zf * params['wf'], s=(H, W), axes=(1, 2),
                         norm='ortho').astype(jnp.float32)

    # --- Kernel C: out = edge_e(|x1 - x2|) + z_c ------------------------------
    halo_c = (H // TH_c) > 1
    win_specs_c, win_ops_c = _window_specs(fcp, TH_c, halo_c)
    tile_c = pl.BlockSpec((1, TH_c, W, C), lambda b, i: (b, i, 0, 0))
    out_nhwc = pl.pallas_call(
        _make_edge_add_kernel(TH_c, W, C, halo_c),
        out_shape=jax.ShapeDtypeStruct((B, H, W, C), jnp.float32),
        grid=(B, H // TH_c),
        in_specs=win_specs_c + [tile_c, _full_spec(params['we']),
                                _full_spec(params['te'])],
        out_specs=tile_c,
        compiler_params=cparams,
    )(*win_ops_c, z_c, params['we'], params['te'])

    return jnp.transpose(out_nhwc, (0, 3, 1, 2))       # back to NCHW


# ---------------------------------------------------------------------------
# Pure-JAX reference (same folded params, same bf16 rounding policy).
# ---------------------------------------------------------------------------
def _ref_forward(params, x1, x2):
    B, C, H, W = x1.shape
    f32 = jnp.float32
    x1n = jnp.transpose(x1, (0, 2, 3, 1)).astype(jnp.bfloat16).astype(f32)
    x2n = jnp.transpose(x2, (0, 2, 3, 1)).astype(jnp.bfloat16).astype(f32)
    f_d = jnp.abs(x1n - x2n)
    f_c = jnp.concatenate([x1n, x2n], axis=-1)

    w3 = params['w3'].astype(f32)                                   # (3,3,2C,2C) HWIO
    dn = ('NHWC', 'HWIO', 'NHWC')
    y = jax.lax.conv_general_dilated(f_c, w3, (1, 1), 'SAME', dimension_numbers=dn)
    y = jnp.maximum(y + params['t1'].reshape(1, 1, 1, -1), 0.0)
    z = jnp.einsum('bhwc,cd->bhwd', y.astype(jnp.bfloat16).astype(f32),
                   params['w1'].astype(f32))
    z = jnp.maximum(z + params['t2'].reshape(1, 1, 1, -1), 0.0)

    zf = jnp.fft.rfft2(z, axes=(1, 2), norm='ortho')
    z_c = jnp.fft.irfft2(zf * params['wf'], s=(H, W), axes=(1, 2),
                         norm='ortho').astype(f32)

    avg = jax.lax.reduce_window(f_d, 0.0, jax.lax.add,
                                (1, 3, 3, 1), (1, 1, 1, 1), 'SAME') / 9.0
    edge = f_d - avg
    t = (jnp.einsum('bhwc,cd->bhwd', edge.astype(jnp.bfloat16).astype(f32),
                    params['we'].astype(f32))
         + params['te'].reshape(1, 1, 1, -1))
    gate = jax.nn.sigmoid(t)
    out = gate * f_d + f_d + z_c
    return jnp.transpose(out, (0, 3, 1, 2))


if __name__ == "__main__":
    B, C, H, W = 2, 4, 16, 16
    key = jax.random.PRNGKey(0)
    kp, k1, k2 = jax.random.split(key, 3)
    params = init_params(kp, C, H, W)
    x1 = jax.random.normal(k1, (B, C, H, W), jnp.float32)
    x2 = jax.random.normal(k2, (B, C, H, W), jnp.float32)

    ref = jax.block_until_ready(_ref_forward(params, x1, x2))

    fwd = jax.jit(codem2_forward, static_argnames=("row_tile", "edge_row_tile"))
    # rt=8 exercises the multi-tile halo path; None takes the auto (single-tile) pick.
    for rt in (8, None):
        out = jax.block_until_ready(fwd(params, x1, x2,
                                        row_tile=rt, edge_row_tile=rt))
        assert out.shape == (B, C, H, W) and out.dtype == jnp.float32
        # bf16 MXU operands + approximate reciprocal => relaxed tolerance.
        np.testing.assert_allclose(np.asarray(out), np.asarray(ref),
                                   rtol=2e-2, atol=2e-2)

    print("KERNEL_OK")
</pallas_src>

<mosaic_0001>
module attributes {stable_mosaic.version = 11 : i64} {
  func.func @kernel(%arg0: i32, %arg1: i32, %arg2: memref<1x8x18x8xbf16, #tpu.memory_space<vmem>>, %arg3: memref<1x2x18x8xbf16, #tpu.memory_space<vmem>>, %arg4: memref<3x3x8x8xbf16, #tpu.memory_space<vmem>>, %arg5: memref<1x8xf32, #tpu.memory_space<vmem>>, %arg6: memref<8x4xbf16, #tpu.memory_space<vmem>>, %arg7: memref<1x4xf32, #tpu.memory_space<vmem>>, %arg8: memref<1x8x16x4xf32, #tpu.memory_space<vmem>>) attributes {dimension_semantics = [#tpu.dimension_semantics<parallel>, #tpu.dimension_semantics<parallel>], iteration_bounds = array<i64: 2, 2>, scalar_prefetch = 0 : i64, scratch_operands = 0 : i64, tpu.core_type = #tpu.core_type<tc>, window_params = [{transform_indices = @transform_0, window_bounds = array<i64: 1, 8, 18, 8>}, {transform_indices = @transform_1, window_bounds = array<i64: 1, 2, 18, 8>}, {pipeline_mode = #tpu.pipeline_mode<synchronous>, transform_indices = @transform_2, window_bounds = array<i64: 3, 3, 8, 8>}, {pipeline_mode = #tpu.pipeline_mode<synchronous>, transform_indices = @transform_3, window_bounds = array<i64: 1, 8>}, {pipeline_mode = #tpu.pipeline_mode<synchronous>, transform_indices = @transform_4, window_bounds = array<i64: 8, 4>}, {pipeline_mode = #tpu.pipeline_mode<synchronous>, transform_indices = @transform_5, window_bounds = array<i64: 1, 4>}, {transform_indices = @transform_6, window_bounds = array<i64: 1, 8, 16, 4>}]} {
    %c0 = arith.constant 0 : index
    %c0_0 = arith.constant 0 : index
    %c0_1 = arith.constant 0 : index
    %c0_2 = arith.constant 0 : index
    %0 = vector.load %arg2[%c0, %c0_0, %c0_1, %c0_2] : memref<1x8x18x8xbf16, #tpu.memory_space<vmem>>, vector<1x8x18x8xbf16>
    %1 = vector.shape_cast %0 : vector<1x8x18x8xbf16> to vector<8x18x8xbf16>
    %c0_3 = arith.constant 0 : index
    %c0_4 = arith.constant 0 : index
    %c0_5 = arith.constant 0 : index
    %c0_6 = arith.constant 0 : index
    %2 = vector.load %arg3[%c0_3, %c0_4, %c0_5, %c0_6] : memref<1x2x18x8xbf16, #tpu.memory_space<vmem>>, vector<1x2x18x8xbf16>
    %3 = vector.shape_cast %2 : vector<1x2x18x8xbf16> to vector<2x18x8xbf16>
    %4 = tpu.concatenate %1, %3 in 0 : vector<8x18x8xbf16>, vector<2x18x8xbf16> -> vector<10x18x8xbf16>
    %5 = arith.extf %4 : vector<10x18x8xbf16> to vector<10x18x8xf32>
    %6 = vector.extract_strided_slice %5 {offsets = [0, 0, 0], sizes = [10, 16, 8], strides = [1, 1, 1]} : vector<10x18x8xf32> to vector<10x16x8xf32>
    %7 = arith.truncf %6 : vector<10x16x8xf32> to vector<10x16x8xbf16>
    %8 = vector.shape_cast %7 : vector<10x16x8xbf16> to vector<160x8xbf16>
    %9 = vector.extract_strided_slice %5 {offsets = [0, 1, 0], sizes = [10, 16, 8], strides = [1, 1, 1]} : vector<10x18x8xf32> to vector<10x16x8xf32>
    %10 = arith.truncf %9 : vector<10x16x8xf32> to vector<10x16x8xbf16>
    %11 = vector.shape_cast %10 : vector<10x16x8xbf16> to vector<160x8xbf16>
    %12 = vector.extract_strided_slice %5 {offsets = [0, 2, 0], sizes = [10, 16, 8], strides = [1, 1, 1]} : vector<10x18x8xf32> to vector<10x16x8xf32>
    %13 = arith.truncf %12 : vector<10x16x8xf32> to vector<10x16x8xbf16>
    %14 = vector.shape_cast %13 : vector<10x16x8xbf16> to vector<160x8xbf16>
    %cst = arith.constant 0.000000e+00 : f32
    %15 = vector.broadcast %cst : f32 to vector<128x8xf32>
    %16 = vector.extract_strided_slice %8 {offsets = [0, 0], sizes = [128, 8], strides = [1, 1]} : vector<160x8xbf16> to vector<128x8xbf16>
    %c0_7 = arith.constant 0 : index
    %c0_8 = arith.constant 0 : index
    %c0_9 = arith.constant 0 : index
    %c0_10 = arith.constant 0 : index
    %17 = vector.load %arg4[%c0_7, %c0_8, %c0_9, %c0_10] : memref<3x3x8x8xbf16, #tpu.memory_space<vmem>>, vector<1x1x8x8xbf16>
    %18 = vector.shape_cast %17 : vector<1x1x8x8xbf16> to vector<8x8xbf16>
    %cst_11 = arith.constant dense<0.000000e+00> : vector<128x8xf32>
    %19 = tpu.matmul %16, %18, %cst_11 {dimension_numbers = #tpu.dot_dimension_numbers<[1], [0], [0], [1], [0, 0, 1, 1], [], []>} : vector<128x8xbf16>, vector<8x8xbf16>, vector<128x8xf32> -> vector<128x8xf32>
    %20 = arith.addf %15, %19 : vector<128x8xf32>
    %21 = vector.extract_strided_slice %11 {offsets = [0, 0], sizes = [128, 8], strides = [1, 1]} : vector<160x8xbf16> to vector<128x8xbf16>
    %c0_12 = arith.constant 0 : index
    %c1 = arith.constant 1 : index
    %c0_13 = arith.constant 0 : index
    %c0_14 = arith.constant 0 : index
    %22 = vector.load %arg4[%c0_12, %c1, %c0_13, %c0_14] : memref<3x3x8x8xbf16, #tpu.memory_space<vmem>>, vector<1x1x8x8xbf16>
    %23 = vector.shape_cast %22 : vector<1x1x8x8xbf16> to vector<8x8xbf16>
    %cst_15 = arith.constant dense<0.000000e+00> : vector<128x8xf32>
    %24 = tpu.matmul %21, %23, %cst_15 {dimension_numbers = #tpu.dot_dimension_numbers<[1], [0], [0], [1], [0, 0, 1, 1], [], []>} : vector<128x8xbf16>, vector<8x8xbf16>, vector<128x8xf32> -> vector<128x8xf32>
    %25 = arith.addf %20, %24 : vector<128x8xf32>
    %26 = vector.extract_strided_slice %14 {offsets = [0, 0], sizes = [128, 8], strides = [1, 1]} : vector<160x8xbf16> to vector<128x8xbf16>
    %c0_16 = arith.constant 0 : index
    %c2 = arith.constant 2 : index
    %c0_17 = arith.constant 0 : index
    %c0_18 = arith.constant 0 : index
    %27 = vector.load %arg4[%c0_16, %c2, %c0_17, %c0_18] : memref<3x3x8x8xbf16, #tpu.memory_space<vmem>>, vector<1x1x8x8xbf16>
    %28 = vector.shape_cast %27 : vector<1x1x8x8xbf16> to vector<8x8xbf16>
    %cst_19 = arith.constant dense<0.000000e+00> : vector<128x8xf32>
    %29 = tpu.matmul %26, %28, %cst_19 {dimension_numbers = #tpu.dot_dimension_numbers<[1], [0], [0], [1], [0, 0, 1, 1], [], []>} : vector<128x8xbf16>, vector<8x8xbf16>, vector<128x8xf32> -> vector<128x8xf32>
    %30 = arith.addf %25, %29 : vector<128x8xf32>
    %31 = vector.extract_strided_slice %8 {offsets = [16, 0], sizes = [128, 8], strides = [1, 1]} : vector<160x8xbf16> to vector<128x8xbf16>
    %c1_20 = arith.constant 1 : index
    %c0_21 = arith.constant 0 : index
    %c0_22 = arith.constant 0 : index
    %c0_23 = arith.constant 0 : index
    %32 = vector.load %arg4[%c1_20, %c0_21, %c0_22, %c0_23] : memref<3x3x8x8xbf16, #tpu.memory_space<vmem>>, vector<1x1x8x8xbf16>
    %33 = vector.shape_cast %32 : vector<1x1x8x8xbf16> to vector<8x8xbf16>
    %cst_24 = arith.constant dense<0.000000e+00> : vector<128x8xf32>
    %34 = tpu.matmul %31, %33, %cst_24 {dimension_numbers = #tpu.dot_dimension_numbers<[1], [0], [0], [1], [0, 0, 1, 1], [], []>} : vector<128x8xbf16>, vector<8x8xbf16>, vector<128x8xf32> -> vector<128x8xf32>
    %35 = arith.addf %30, %34 : vector<128x8xf32>
    %36 = vector.extract_strided_slice %11 {offsets = [16, 0], sizes = [128, 8], strides = [1, 1]} : vector<160x8xbf16> to vector<128x8xbf16>
    %c1_25 = arith.constant 1 : index
    %c1_26 = arith.constant 1 : index
    %c0_27 = arith.constant 0 : index
    %c0_28 = arith.constant 0 : index
    %37 = vector.load %arg4[%c1_25, %c1_26, %c0_27, %c0_28] : memref<3x3x8x8xbf16, #tpu.memory_space<vmem>>, vector<1x1x8x8xbf16>
    %38 = vector.shape_cast %37 : vector<1x1x8x8xbf16> to vector<8x8xbf16>
    %cst_29 = arith.constant dense<0.000000e+00> : vector<128x8xf32>
    %39 = tpu.matmul %36, %38, %cst_29 {dimension_numbers = #tpu.dot_dimension_numbers<[1], [0], [0], [1], [0, 0, 1, 1], [], []>} : vector<128x8xbf16>, vector<8x8xbf16>, vector<128x8xf32> -> vector<128x8xf32>
    %40 = arith.addf %35, %39 : vector<128x8xf32>
    %41 = vector.extract_strided_slice %14 {offsets = [16, 0], sizes = [128, 8], strides = [1, 1]} : vector<160x8xbf16> to vector<128x8xbf16>
    %c1_30 = arith.constant 1 : index
    %c2_31 = arith.constant 2 : index
    %c0_32 = arith.constant 0 : index
    %c0_33 = arith.constant 0 : index
    %42 = vector.load %arg4[%c1_30, %c2_31, %c0_32, %c0_33] : memref<3x3x8x8xbf16, #tpu.memory_space<vmem>>, vector<1x1x8x8xbf16>
    %43 = vector.shape_cast %42 : vector<1x1x8x8xbf16> to vector<8x8xbf16>
    %cst_34 = arith.constant dense<0.000000e+00> : vector<128x8xf32>
    %44 = tpu.matmul %41, %43, %cst_34 {dimension_numbers = #tpu.dot_dimension_numbers<[1], [0], [0], [1], [0, 0, 1, 1], [], []>} : vector<128x8xbf16>, vector<8x8xbf16>, vector<128x8xf32> -> vector<128x8xf32>
    %45 = arith.addf %40, %44 : vector<128x8xf32>
    %46 = vector.extract_strided_slice %8 {offsets = [32, 0], sizes = [128, 8], strides = [1, 1]} : vector<160x8xbf16> to vector<128x8xbf16>
    %c2_35 = arith.constant 2 : index
    %c0_36 = arith.constant 0 : index
    %c0_37 = arith.constant 0 : index
    %c0_38 = arith.constant 0 : index
    %47 = vector.load %arg4[%c2_35, %c0_36, %c0_37, %c0_38] : memref<3x3x8x8xbf16, #tpu.memory_space<vmem>>, vector<1x1x8x8xbf16>
    %48 = vector.shape_cast %47 : vector<1x1x8x8xbf16> to vector<8x8xbf16>
    %cst_39 = arith.constant dense<0.000000e+00> : vector<128x8xf32>
    %49 = tpu.matmul %46, %48, %cst_39 {dimension_numbers = #tpu.dot_dimension_numbers<[1], [0], [0], [1], [0, 0, 1, 1], [], []>} : vector<128x8xbf16>, vector<8x8xbf16>, vector<128x8xf32> -> vector<128x8xf32>
    %50 = arith.addf %45, %49 : vector<128x8xf32>
    %51 = vector.extract_strided_slice %11 {offsets = [32, 0], sizes = [128, 8], strides = [1, 1]} : vector<160x8xbf16> to vector<128x8xbf16>
    %c2_40 = arith.constant 2 : index
    %c1_41 = arith.constant 1 : index
    %c0_42 = arith.constant 0 : index
    %c0_43 = arith.constant 0 : index
    %52 = vector.load %arg4[%c2_40, %c1_41, %c0_42, %c0_43] : memref<3x3x8x8xbf16, #tpu.memory_space<vmem>>, vector<1x1x8x8xbf16>
    %53 = vector.shape_cast %52 : vector<1x1x8x8xbf16> to vector<8x8xbf16>
    %cst_44 = arith.constant dense<0.000000e+00> : vector<128x8xf32>
    %54 = tpu.matmul %51, %53, %cst_44 {dimension_numbers = #tpu.dot_dimension_numbers<[1], [0], [0], [1], [0, 0, 1, 1], [], []>} : vector<128x8xbf16>, vector<8x8xbf16>, vector<128x8xf32> -> vector<128x8xf32>
    %55 = arith.addf %50, %54 : vector<128x8xf32>
    %56 = vector.extract_strided_slice %14 {offsets = [32, 0], sizes = [128, 8], strides = [1, 1]} : vector<160x8xbf16> to vector<128x8xbf16>
    %c2_45 = arith.constant 2 : index
    %c2_46 = arith.constant 2 : index
    %c0_47 = arith.constant 0 : index
    %c0_48 = arith.constant 0 : index
    %57 = vector.load %arg4[%c2_45, %c2_46, %c0_47, %c0_48] : memref<3x3x8x8xbf16, #tpu.memory_space<vmem>>, vector<1x1x8x8xbf16>
    %58 = vector.shape_cast %57 : vector<1x1x8x8xbf16> to vector<8x8xbf16>
    %cst_49 = arith.constant dense<0.000000e+00> : vector<128x8xf32>
    %59 = tpu.matmul %56, %58, %cst_49 {dimension_numbers = #tpu.dot_dimension_numbers<[1], [0], [0], [1], [0, 0, 1, 1], [], []>} : vector<128x8xbf16>, vector<8x8xbf16>, vector<128x8xf32> -> vector<128x8xf32>
    %60 = arith.addf %55, %59 : vector<128x8xf32>
    %c0_50 = arith.constant 0 : index
    %c0_51 = arith.constant 0 : index
    %61 = vector.load %arg5[%c0_50, %c0_51] : memref<1x8xf32, #tpu.memory_space<vmem>>, vector<1x8xf32>
    %62 = vector.broadcast %61 : vector<1x8xf32> to vector<128x8xf32>
    %63 = arith.addf %60, %62 : vector<128x8xf32>
    %cst_52 = arith.constant 0.000000e+00 : f32
    %64 = vector.broadcast %cst_52 : f32 to vector<128x8xf32>
    %65 = arith.maximumf %63, %64 : vector<128x8xf32>
    %66 = arith.truncf %65 : vector<128x8xf32> to vector<128x8xbf16>
    %c0_53 = arith.constant 0 : index
    %c0_54 = arith.constant 0 : index
    %67 = vector.load %arg6[%c0_53, %c0_54] : memref<8x4xbf16, #tpu.memory_space<vmem>>, vector<8x4xbf16>
    %cst_55 = arith.constant dense<0.000000e+00> : vector<128x4xf32>
    %68 = tpu.matmul %66, %67, %cst_55 {dimension_numbers = #tpu.dot_dimension_numbers<[1], [0], [0], [1], [0, 0, 1, 1], [], []>} : vector<128x8xbf16>, vector<8x4xbf16>, vector<128x4xf32> -> vector<128x4xf32>
    %c0_56 = arith.constant 0 : index
    %c0_57 = arith.constant 0 : index
    %69 = vector.load %arg7[%c0_56, %c0_57] : memref<1x4xf32, #tpu.memory_space<vmem>>, vector<1x4xf32>
    %70 = vector.broadcast %69 : vector<1x4xf32> to vector<128x4xf32>
    %71 = arith.addf %68, %70 : vector<128x4xf32>
    %cst_58 = arith.constant 0.000000e+00 : f32
    %72 = vector.broadcast %cst_58 : f32 to vector<128x4xf32>
    %73 = arith.maximumf %71, %72 : vector<128x4xf32>
    %74 = vector.shape_cast %73 : vector<128x4xf32> to vector<8x16x4xf32>
    %c0_59 = arith.constant 0 : index
    %c0_60 = arith.constant 0 : index
    %c0_61 = arith.constant 0 : index
    %c0_62 = arith.constant 0 : index
    %75 = vector.load %arg8[%c0_59, %c0_60, %c0_61, %c0_62] : memref<1x8x16x4xf32, #tpu.memory_space<vmem>>, vector<1x8x16x4xf32>
    %76 = vector.shape_cast %75 : vector<1x8x16x4xf32> to vector<8x16x4xf32>
    %77 = vector.shape_cast %74 : vector<8x16x4xf32> to vector<1x8x16x4xf32>
    tpu.vector_store %arg8[%c0_59, %c0_60, %c0_61, %c0_62], %77 {strides = array<i32>} : memref<1x8x16x4xf32, #tpu.memory_space<vmem>>, vector<1x8x16x4xf32>,
    return
  }
  func.func @transform_0(%arg0: i32, %arg1: i32) -> (i32, i32, i32, i32) {
    %c0_i32 = arith.constant 0 : i32
    %c0_i32_0 = arith.constant 0 : i32
    %c0_i32_1 = arith.constant 0 : i32
    return %arg0, %arg1, %c0_i32, %c0_i32_0 : i32, i32, i32, i32
  }
  func.func @transform_1(%arg0: i32, %arg1: i32) -> (i32, i32, i32, i32) {
    %c1_i32 = arith.constant 1 : i32
    %0 = arith.addi %arg1, %c1_i32 : i32
    %c4_i32 = arith.constant 4 : i32
    %1 = arith.muli %0, %c4_i32 : i32
    %c0_i32 = arith.constant 0 : i32
    %c0_i32_0 = arith.constant 0 : i32
    %c0_i32_1 = arith.constant 0 : i32
    return %arg0, %1, %c0_i32, %c0_i32_0 : i32, i32, i32, i32
  }
  func.func @transform_2(%arg0: i32, %arg1: i32) -> (i32, i32, i32, i32) {
    %c0_i32 = arith.constant 0 : i32
    %c0_i32_0 = arith.constant 0 : i32
    %c0_i32_1 = arith.constant 0 : i32
    %c0_i32_2 = arith.constant 0 : i32
    %c0_i32_3 = arith.constant 0 : i32
    return %c0_i32, %c0_i32_0, %c0_i32_1, %c0_i32_2 : i32, i32, i32, i32
  }
  func.func @transform_3(%arg0: i32, %arg1: i32) -> (i32, i32) {
    %c0_i32 = arith.constant 0 : i32
    %c0_i32_0 = arith.constant 0 : i32
    %c0_i32_1 = arith.constant 0 : i32
    return %c0_i32, %c0_i32_0 : i32, i32
  }
  func.func @transform_4(%arg0: i32, %arg1: i32) -> (i32, i32) {
    %c0_i32 = arith.constant 0 : i32
    %c0_i32_0 = arith.constant 0 : i32
    %c0_i32_1 = arith.constant 0 : i32
    return %c0_i32, %c0_i32_0 : i32, i32
  }
  func.func @transform_5(%arg0: i32, %arg1: i32) -> (i32, i32) {
    %c0_i32 = arith.constant 0 : i32
    %c0_i32_0 = arith.constant 0 : i32
    %c0_i32_1 = arith.constant 0 : i32
    return %c0_i32, %c0_i32_0 : i32, i32
  }
  func.func @transform_6(%arg0: i32, %arg1: i32) -> (i32, i32, i32, i32) {
    %c0_i32 = arith.constant 0 : i32
    %c0_i32_0 = arith.constant 0 : i32
    %c0_i32_1 = arith.constant 0 : i32
    return %arg0, %arg1, %c0_i32, %c0_i32_0 : i32, i32, i32, i32
  }
}

module attributes {stable_mosaic.version = 11 : i64} {
  func.func @kernel(%arg0: i32, %arg1: i32, %arg2: memref<1x8x18x8xbf16, #tpu.memory_space<vmem>>, %arg3: memref<1x2x18x8xbf16, #tpu.memory_space<vmem>>, %arg4: memref<1x8x16x4xf32, #tpu.memory_space<vmem>>, %arg5: memref<4x4xbf16, #tpu.memory_space<vmem>>, %arg6: memref<1x4xf32, #tpu.memory_space<vmem>>, %arg7: memref<1x8x16x4xf32, #tpu.memory_space<vmem>>) attributes {dimension_semantics = [#tpu.dimension_semantics<parallel>, #tpu.dimension_semantics<parallel>], iteration_bounds = array<i64: 2, 2>, scalar_prefetch = 0 : i64, scratch_operands = 0 : i64, tpu.core_type = #tpu.core_type<tc>, window_params = [{transform_indices = @transform_0, window_bounds = array<i64: 1, 8, 18, 8>}, {transform_indices = @transform_1, window_bounds = array<i64: 1, 2, 18, 8>}, {transform_indices = @transform_2, window_bounds = array<i64: 1, 8, 16, 4>}, {pipeline_mode = #tpu.pipeline_mode<synchronous>, transform_indices = @transform_3, window_bounds = array<i64: 4, 4>}, {pipeline_mode = #tpu.pipeline_mode<synchronous>, transform_indices = @transform_4, window_bounds = array<i64: 1, 4>}, {transform_indices = @transform_5, window_bounds = array<i64: 1, 8, 16, 4>}]} {
    %c0 = arith.constant 0 : index
    %c0_0 = arith.constant 0 : index
    %c0_1 = arith.constant 0 : index
    %c0_2 = arith.constant 0 : index
    %0 = vector.load %arg2[%c0, %c0_0, %c0_1, %c0_2] : memref<1x8x18x8xbf16, #tpu.memory_space<vmem>>, vector<1x8x18x8xbf16>
    %1 = vector.shape_cast %0 : vector<1x8x18x8xbf16> to vector<8x18x8xbf16>
    %c0_3 = arith.constant 0 : index
    %c0_4 = arith.constant 0 : index
    %c0_5 = arith.constant 0 : index
    %c0_6 = arith.constant 0 : index
    %2 = vector.load %arg3[%c0_3, %c0_4, %c0_5, %c0_6] : memref<1x2x18x8xbf16, #tpu.memory_space<vmem>>, vector<1x2x18x8xbf16>
    %3 = vector.shape_cast %2 : vector<1x2x18x8xbf16> to vector<2x18x8xbf16>
    %4 = tpu.concatenate %1, %3 in 0 : vector<8x18x8xbf16>, vector<2x18x8xbf16> -> vector<10x18x8xbf16>
    %5 = arith.extf %4 : vector<10x18x8xbf16> to vector<10x18x8xf32>
    %6 = vector.extract_strided_slice %5 {offsets = [0, 0, 0], sizes = [10, 18, 4], strides = [1, 1, 1]} : vector<10x18x8xf32> to vector<10x18x4xf32>
    %7 = vector.extract_strided_slice %5 {offsets = [0, 0, 4], sizes = [10, 18, 4], strides = [1, 1, 1]} : vector<10x18x8xf32> to vector<10x18x4xf32>
    %8 = arith.subf %6, %7 : vector<10x18x4xf32>
    %9 = math.absf %8 : vector<10x18x4xf32>
    %10 = vector.extract_strided_slice %9 {offsets = [0, 0, 0], sizes = [10, 16, 4], strides = [1, 1, 1]} : vector<10x18x4xf32> to vector<10x16x4xf32>
    %11 = vector.extract_strided_slice %9 {offsets = [0, 1, 0], sizes = [10, 16, 4], strides = [1, 1, 1]} : vector<10x18x4xf32> to vector<10x16x4xf32>
    %12 = arith.addf %10, %11 : vector<10x16x4xf32>
    %13 = vector.extract_strided_slice %9 {offsets = [0, 2, 0], sizes = [10, 16, 4], strides = [1, 1, 1]} : vector<10x18x4xf32> to vector<10x16x4xf32>
    %14 = arith.addf %12, %13 : vector<10x16x4xf32>
    %15 = vector.extract_strided_slice %14 {offsets = [0, 0, 0], sizes = [8, 16, 4], strides = [1, 1, 1]} : vector<10x16x4xf32> to vector<8x16x4xf32>
    %16 = vector.extract_strided_slice %14 {offsets = [1, 0, 0], sizes = [8, 16, 4], strides = [1, 1, 1]} : vector<10x16x4xf32> to vector<8x16x4xf32>
    %17 = arith.addf %15, %16 : vector<8x16x4xf32>
    %18 = vector.extract_strided_slice %14 {offsets = [2, 0, 0], sizes = [8, 16, 4], strides = [1, 1, 1]} : vector<10x16x4xf32> to vector<8x16x4xf32>
    %19 = arith.addf %17, %18 : vector<8x16x4xf32>
    %20 = vector.extract_strided_slice %9 {offsets = [1, 1, 0], sizes = [8, 16, 4], strides = [1, 1, 1]} : vector<10x18x4xf32> to vector<8x16x4xf32>
    %cst = arith.constant 0.111111112 : f32
    %21 = vector.broadcast %cst : f32 to vector<8x16x4xf32>
    %22 = arith.mulf %19, %21 : vector<8x16x4xf32>
    %23 = arith.subf %20, %22 : vector<8x16x4xf32>
    %24 = vector.shape_cast %23 : vector<8x16x4xf32> to vector<128x4xf32>
    %25 = arith.truncf %24 : vector<128x4xf32> to vector<128x4xbf16>
    %c0_7 = arith.constant 0 : index
    %c0_8 = arith.constant 0 : index
    %26 = vector.load %arg5[%c0_7, %c0_8] : memref<4x4xbf16, #tpu.memory_space<vmem>>, vector<4x4xbf16>
    %cst_9 = arith.constant dense<0.000000e+00> : vector<128x4xf32>
    %27 = tpu.matmul %25, %26, %cst_9 {dimension_numbers = #tpu.dot_dimension_numbers<[1], [0], [0], [1], [0, 0, 1, 1], [], []>} : vector<128x4xbf16>, vector<4x4xbf16>, vector<128x4xf32> -> vector<128x4xf32>
    %c0_10 = arith.constant 0 : index
    %c0_11 = arith.constant 0 : index
    %28 = vector.load %arg6[%c0_10, %c0_11] : memref<1x4xf32, #tpu.memory_space<vmem>>, vector<1x4xf32>
    %29 = vector.broadcast %28 : vector<1x4xf32> to vector<128x4xf32>
    %30 = arith.addf %27, %29 : vector<128x4xf32>
    %cst_12 = arith.constant 0.000000e+00 : f32
    %31 = vector.broadcast %cst_12 : f32 to vector<128x4xf32>
    %32 = arith.subf %31, %30 : vector<128x4xf32>
    %33 = math.exp %32 : vector<128x4xf32>
    %cst_13 = arith.constant 1.000000e+00 : f32
    %34 = vector.broadcast %cst_13 : f32 to vector<128x4xf32>
    %35 = arith.addf %34, %33 : vector<128x4xf32>
    %36 = tpu.reciprocal %35 {approx = true} : vector<128x4xf32> -> vector<128x4xf32>
    %37 = vector.shape_cast %36 : vector<128x4xf32> to vector<8x16x4xf32>
    %38 = arith.mulf %37, %20 : vector<8x16x4xf32>
    %39 = arith.addf %38, %20 : vector<8x16x4xf32>
    %c0_14 = arith.constant 0 : index
    %c0_15 = arith.constant 0 : index
    %c0_16 = arith.constant 0 : index
    %c0_17 = arith.constant 0 : index
    %40 = vector.load %arg4[%c0_14, %c0_15, %c0_16, %c0_17] : memref<1x8x16x4xf32, #tpu.memory_space<vmem>>, vector<1x8x16x4xf32>
    %41 = vector.shape_cast %40 : vector<1x8x16x4xf32> to vector<8x16x4xf32>
    %42 = arith.addf %39, %41 : vector<8x16x4xf32>
    %c0_18 = arith.constant 0 : index
    %c0_19 = arith.constant 0 : index
    %c0_20 = arith.constant 0 : index
    %c0_21 = arith.constant 0 : index
    %43 = vector.load %arg7[%c0_18, %c0_19, %c0_20, %c0_21] : memref<1x8x16x4xf32, #tpu.memory_space<vmem>>, vector<1x8x16x4xf32>
    %44 = vector.shape_cast %43 : vector<1x8x16x4xf32> to vector<8x16x4xf32>
    %45 = vector.shape_cast %42 : vector<8x16x4xf32> to vector<1x8x16x4xf32>
    tpu.vector_store %arg7[%c0_18, %c0_19, %c0_20, %c0_21], %45 {strides = array<i32>} : memref<1x8x16x4xf32, #tpu.memory_space<vmem>>, vector<1x8x16x4xf32>,
    return
  }
  func.func @transform_0(%arg0: i32, %arg1: i32) -> (i32, i32, i32, i32) {
    %c0_i32 = arith.constant 0 : i32
    %c0_i32_0 = arith.constant 0 : i32
    %c0_i32_1 = arith.constant 0 : i32
    return %arg0, %arg1, %c0_i32, %c0_i32_0 : i32, i32, i32, i32
  }
  func.func @transform_1(%arg0: i32, %arg1: i32) -> (i32, i32, i32, i32) {
    %c1_i32 = arith.constant 1 : i32
    %0 = arith.addi %arg1, %c1_i32 : i32
    %c4_i32 = arith.constant 4 : i32
    %1 = arith.muli %0, %c4_i32 : i32
    %c0_i32 = arith.constant 0 : i32
    %c0_i32_0 = arith.constant 0 : i32
    %c0_i32_1 = arith.constant 0 : i32
    return %arg0, %1, %c0_i32, %c0_i32_0 : i32, i32, i32, i32
  }
  func.func @transform_2(%arg0: i32, %arg1: i32) -> (i32, i32, i32, i32) {
    %c0_i32 = arith.constant 0 : i32
    %c0_i32_0 = arith.constant 0 : i32
    %c0_i32_1 = arith.constant 0 : i32
    return %arg0, %arg1, %c0_i32, %c0_i32_0 : i32, i32, i32, i32
  }
  func.func @transform_3(%arg0: i32, %arg1: i32) -> (i32, i32) {
    %c0_i32 = arith.constant 0 : i32
    %c0_i32_0 = arith.constant 0 : i32
    %c0_i32_1 = arith.constant 0 : i32
    return %c0_i32, %c0_i32_0 : i32, i32
  }
  func.func @transform_4(%arg0: i32, %arg1: i32) -> (i32, i32) {
    %c0_i32 = arith.constant 0 : i32
    %c0_i32_0 = arith.constant 0 : i32
    %c0_i32_1 = arith.constant 0 : i32
    return %c0_i32, %c0_i32_0 : i32, i32
  }
  func.func @transform_5(%arg0: i32, %arg1: i32) -> (i32, i32, i32, i32) {
    %c0_i32 = arith.constant 0 : i32
    %c0_i32_0 = arith.constant 0 : i32
    %c0_i32_1 = arith.constant 0 : i32
    return %arg0, %arg1, %c0_i32, %c0_i32_0 : i32, i32, i32, i32
  }
}

</mosaic_0001>

<bundles_post_ra>
// kernel: custom-call
= control target key start
LH: loop header
LB: loop body
LE: loop exit
PB: predicated region body
PF: predicated region fallthrough
CT: control target
= control target key end

     0   :  { %2 = vsyncpa [#allocation0], 0  ;;  %s55_s0 = inlined_call_operand.hbm [shape: c64[1,16,9,4], index: 0, kind: input, shape index: {}]   ;;  %s56_s1 = inlined_call_operand.vmem [shape: f32[1,16,9,4], index: 1, kind: output, shape index: {}]  }
   0x1   :  { %s4_s8 = sshll.u32 %s55_s0, 4  ;;  %s6_s11 = sshll.u32 %s56_s1, 4  ;;  %s5_s8 = int_to_ptr.hbm [resolvable:$true] %s4_s8  ;;  %s7_s11 = int_to_ptr.vmem [resolvable:$true] %s6_s11 }
   0x2   :  { %9 = dma.hbm_to_vmem [thread:$0]  %s5_s8, 576, %s7_s11, [#allocation0] }
   0x3   :  { %37 = dma.done.wait [#allocation0], 576  }
   0x4   :  { %38 = vsyncadd [#allocation0], 4294966720 }
   0x5   :  { %12 = vsyncpa [#allocation0], 1 }

// kernel: custom-call.1
= control target key start
LH: loop header
LB: loop body
LE: loop exit
PB: predicated region body
PF: predicated region fallthrough
CT: control target
= control target key end

     0   :  { %s56_s0 = inlined_call_operand.hbm [shape: c64[1,16,9,4], index: 0, kind: input, shape index: {}]   ;;  %s57_s1 = inlined_call_operand.vmem [shape: f32[1,16,9,4], index: 1, kind: output, shape index: {}]  }
   0x1   :  { %s2_s8 = scalar_lea.hbm %s56_s0, 36 }
   0x2   :  { %3 = vsyncpa [#allocation0], 0  ;;  %s5_s9 = sshll.u32 %s2_s8, 4  ;;  %s7_s12 = sshll.u32 %s57_s1, 4  ;;  %s6_s9 = int_to_ptr.hbm [resolvable:$true] %s5_s9  ;;  %s8_s12 = int_to_ptr.vmem [resolvable:$true] %s7_s12 }
   0x3   :  { %10 = dma.hbm_to_vmem [thread:$0]  %s6_s9, 576, %s8_s12, [#allocation0] }
   0x4   :  { %38 = dma.done.wait [#allocation0], 576  }
   0x5   :  { %39 = vsyncadd [#allocation0], 4294966720 }
   0x6   :  { %13 = vsyncpa [#allocation0], 1 }

// kernel: codem2_forward.2
= control target key start
LH: loop header
LB: loop body
LE: loop exit
PB: predicated region body
PF: predicated region fallthrough
CT: control target
= control target key end

     0   :  { %s2138_s21 = smov 0   ;;  %s2140_s22 = smov 0   ;;  %s2873_s0 = inlined_call_operand.vmem [shape: bf16[2,18,18,8], index: 0, kind: input, shape index: {}, may-alias: {0,1}]   ;;  %s2874_s1 = inlined_call_operand.vmem [shape: bf16[2,18,18,8], index: 1, kind: input, shape index: {}, may-alias: {0,1}]   ;;  %s2875_s2 = inlined_call_operand.vmem [shape: bf16[3,3,8,8], index: 2, kind: input, shape index: {}]   ;;  %s2876_s3 = inlined_call_operand.vmem [shape: f32[1,8], index: 3, kind: input, shape index: {}]   ;;  %s2877_s4 = inlined_call_operand.vmem [shape: bf16[8,4], index: 4, kind: input, shape index: {}]   ;;  %s2878_s5 = inlined_call_operand.vmem [shape: f32[1,4], index: 5, kind: input, shape index: {}]   ;;  %s2879_s6 = inlined_call_operand.vmem [shape: f32[2,16,16,4], index: 6, kind: output, shape index: {}]  }
   0x1   :  { %s2142_s23 = smov 0   ;;  %s2144_s24 = smov 0  }
   0x2   :  { %s2146_s25 = smov 0  }
   0x3 LB: > { %s25_s26 = sadd.s32 1, %s2093_s23  ;;  %s28_s27 = sadd.s32 1, %s2097_s24  ;;  %s2101_s25 = sphi %s2146_s25, %s16_s25   ;;  %s2097_s24 = sphi %s2144_s24, %s2887_s24   ;;  %s2093_s23 = sphi %s2142_s23, %s2886_s23   ;;  %s2089_s22 = sphi %s2140_s22, %s2885_s22   ;;  %s2085_s21 = sphi %s2138_s21, %s2884_s21  }
   0x4   : > { %p26_p0 = scmp.ge.s32.totalorder %s25_s26, 2  ;;  %p1874_p1 = scmp.ge.s32.totalorder %s2101_s25, 1 }
   0x5   : > { %p270_p2 = scmp.lt.s32.totalorder %s2101_s25, 5 }
   0x6   : > { %s2889_s26 = smov (%p26_p0, %s25_s26), 0  ;;  %s2891_s27 = smov (!%p26_p0, %s28_s27), %s2097_s24 }
   0x7   : > { %p271_p3 = pnand %p1874_p1, %p270_p2  ;;  %p30_p4 = scmp.ge.s32.totalorder %s2891_s27, 2 }
   0x8   : > { %s2171_s30 = sshll.u32 (!%p271_p3), %s2085_s21, 3  ;;  %p333_p5 = scmp.lt.s32.totalorder (!%p271_p3), %s2089_s22, 1 }
   0x9   : > { %s2893_s27 = smov (%p30_p4, %s2891_s27), 0  ;;  %274 = sbr.rel (%p271_p3) target bundleno = 636 (0x27c), region = 44 }
   0xa   : > { %p335_p6 = scmp.lt.s32.totalorder (!%p271_p3), %s2171_s30, 17  ;;  %s2012_s14 = sadd.s32 (!%p271_p3), 8, %s2171_s30 }
   0xb   : > { %p353_p7 = scmp.lt.s32.totalorder (!%p271_p3), %s2012_s14, 17  ;;  %p366_p8 = scmp.lt.s32.totalorder (!%p271_p3), %s2171_s30, 15 }
   0xe   : > { %v811_v0 = vld [vmem:[%s2875_s2] sm:$0xf]  ;;  %vm863_vm0 = vcmask 1043456   ;;  %v1894_v2 = vld [vmem:[%s2875_s2 + $0x4] sm:$0xf]  ;;  %s2895_s22 = smov (!%p333_p5, %s2089_s22), 1 }
   0xf   : > { %v965_v1 = vsel %vm863_vm0, %v811_v0, 0  ;;  %v865_v3 = vsel %vm863_vm0, %v1894_v2, 0  ;;  %v1911_v4 = vld [vmem:[%s2875_s2 + $0x8] sm:$0xf]  ;;  %s336_s11 = scalar_select %p335_p6, %s2171_s30, 17  ;;  %vm838_vm1 = vcmask 64512  }
  0x10   : > { %2017 = vmatpush.bf16.msra.mxu3 %v965_v1  ;;  %974 = vmatpush.bf16.msra.mxu1 %v965_v1  ;;  %v1067_v5 = vsel %vm863_vm0, %v1911_v4, 0  ;;  %v1920_v6 = vld [vmem:[%s2875_s2 + $0xc] sm:$0xf]  ;;  %v1929_v7 = vld [vmem:[%s2875_s2 + $0x10] sm:$0xf]  ;;  %s2019_s16 = smul.u32 54, %s2895_s22 }
  0x11   : > { %2016 = vmatpush.bf16.msra.mxu2 %v865_v3  ;;  %874 = vmatpush.bf16.msra.mxu0 %v865_v3  ;;  %v1143_v8 = vsel %vm863_vm0, %v1920_v6, 0  ;;  %v1219_v9 = vsel %vm863_vm0, %v1929_v7, 0  ;;  %s2018_s17 = smul.u32 3, %s336_s11  ;;  %vm465_vm2 = vsmask.f32 3328  ;;  %vm738_vm5 = vcmask 1042432  }
  0x12   : > { %vm466_vm3 = vsmask.f32 7440  ;;  %vm739_vm6 = vcmask 1046532   ;;  %s2897_s14 = smov (!%p353_p7, %s2012_s14), 17  ;;  %s2899_s30 = smov (!%p366_p8, %s2171_s30), 15  ;;  %vm1731_vm8 = vcmask 31744  }
  0x13   : > { %s339_s18 = sadd.s32 %s2019_s16, %s2018_s17  ;;  %vm2240_vm4 = vmor %vm465_vm2, %vm466_vm3  ;;  %s2020_s15 = smul.u32 3, %s2897_s14 }
  0x14   : > { %1152 = vmatpush.bf16.msrb.mxu3 %v1143_v8  ;;  %s1876_s19 = sshll.u32 %s339_s18, 2  ;;  %vm2402_vm7 = vmor %vm738_vm5, %vm739_vm6  ;;  %s1881_s8 = sshll.u32 %s2899_s30, 1 }
  0x15   : > { %1076 = vmatpush.bf16.msrb.mxu2 %v1067_v5  ;;  %1228 = vmatpush.bf16.msrb.mxu0 %v1219_v9  ;;  %s2200_s28 = scalar_lea.vmem %s2873_s0, %s1876_s19  ;;  %s357_s17 = sadd.s32 %s2020_s15, %s2019_s16 }
  0x16   : > { %v2014_v10 = vld [vmem:[%s2200_s28 + $0x30] sm:$0xff]   ;;  %v389_v11 = vld [vmem:[%s2200_s28 + $0x38] sm:$0x1]  ;;  %v1992_v12 = vld [vmem:[%s2200_s28] sm:$0xff]   ;;  %s1879_s18 = sshll.u32 %s357_s17, 2  ;;  %s1882_s9 = sshll.u32 %s2895_s22, 5 }
  0x17   : > { %v2001_v13 = vunpack.c.l.bf16 %v2014_v10  ;;  %v2002_v14 = vunpack.c.h.bf16 %v2014_v10  ;;  %v419_v15 = vunpack.c.l.bf16 %v389_v11  ;;  %v1993_v16 = vunpack.c.l.bf16 %v1992_v12  ;;  %v377_v17 = vld [vmem:[%s2200_s28 + $0x8] sm:$0x1]  ;;  %v390_v18 = vld [vmem:[%s2200_s28 + $0x3c] sm:$0xff]   ;;  %v392_v60 = vld [vmem:[%s2200_s28 + $0x44] sm:$0x1]  ;;  %s2551_s16 = scalar_lea.vmem %s2874_s1, %s1879_s18  ;;  %s370_s10 = sadd.s32 %s1882_s9, %s1881_s8 }
  0x18   : > { %v1994_v19 = vunpack.c.h.bf16 %v1992_v12  ;;  %v407_v20 = vunpack.c.l.bf16 %v377_v17  ;;  %v420_v21 = vunpack.c.l.bf16 %v390_v18  ;;  %v421_v22 = vunpack.c.h.bf16 %v390_v18  ;;  %v380_v18 = vld [vmem:[%s2200_s28 + $0x14] sm:$0x1]  ;;  %s1883_s13 = sshll.u32 %s370_s10, 3 }
  0x19   : > { %v2207_v23 = vpack.c.bf16 %v2001_v13, %v2001_v13  ;;  %v2209_v24 = vpack.c.bf16 %v2002_v14, %v2002_v14  ;;  %v2211_v25 = vpack.c.bf16 %v419_v15, %v419_v15  ;;  %v2213_v26 = vpack.c.bf16 %v1993_v16, %v1993_v16  ;;  %v378_v13 = vld [vmem:[%s2200_s28 + $0xc] sm:$0xff]   ;;  %s2809_s17 = scalar_lea.vmem %s2879_s6, %s1883_s13 }
  0x1a   : > { %v2215_v27 = vpack.c.bf16 %v1994_v19, %v1994_v19  ;;  %v2217_v28 = vpack.c.bf16 %v407_v20, %v407_v20  ;;  %v2219_v29 = vpack.c.bf16 %v420_v21, %v420_v21  ;;  %v2221_v30 = vpack.c.bf16 %v421_v22, %v421_v22 }
  0x1b   : > { %v924_v31 = vunpack.c.l.b16 %v2207_v23  ;;  %v925_v32 = vunpack.c.l.b16 %v2209_v24  ;;  %v565_v33 = vshrl.u32 %v2207_v23, 16  ;;  %v568_v34 = vshll.u32 %v2207_v23, 16 }
  0x1c   : > { %v574_v35 = vshll.u32 %v2209_v24, 16  ;;  %v578_v36 = vshrl.u32 %v2209_v24, 16  ;;  %v584_v37 = vshll.u32 %v2211_v25, 16  ;;  %v469_v38 = vshrl.u32 %v2213_v26, 16 }
  0x1d   : > { %v2231_v39 = vpack.c.b16 %v925_v32, %v924_v31  ;;  %v567_v40 = vrot.slane %v565_v33, 4  ;;  %v570_v41 = vrot.slane %v568_v34, 5  ;;  %v472_v42 = vshll.u32 %v2213_v26, 16 }
  0x1e   : > { %v576_v43 = vrot.slane %v574_v35, 5  ;;  %v580_v44 = vrot.slane %v578_v36, 4  ;;  %v586_v45 = vrot.slane %v584_v37, 5  ;;  %v471_v46 = vrot.slane %v469_v38, 4  ;;  %v2015_v35 = vld [vmem:[%s2200_s28 + $0x48] sm:$0xff]  }
  0x1f   : > { %1907 = vmatmul.msk.bf16.vlgmr.msra.gmra.mxu3 %vm838_vm1, %v2231_v39  ;;  %v571_v47 = vor.u32 %v570_v41, %v567_v40  ;;  %v474_v48 = vrot.slane %v472_v42, 5  ;;  %v478_v49 = vshll.u32 %v2215_v27, 16  ;;  %v482_v50 = vshrl.u32 %v2215_v27, 16 }
  0x20   : > { %v581_v52 = vor.u32 %v580_v44, %v576_v43  ;;  %v488_v53 = vshll.u32 %v2217_v28, 16  ;;  %v916_v54 = vunpack.c.l.b16 %v2213_v26  ;;  %v917_v55 = vunpack.c.l.b16 %v2215_v27 }
  0x21   : > { %v572_v56 = vrot.slane %v571_v47, 4  ;;  %v475_v57 = vor.u32 %v474_v48, %v471_v46  ;;  %v480_v58 = vrot.slane %v478_v49, 5  ;;  %v484_v59 = vrot.slane %v482_v50, 4 }
  0x22   : > { %v582_v61 = vrot.slane %v581_v52, 4  ;;  %v490_v62 = vrot.slane %v488_v53, 5  ;;  %v932_v63 = vpack.c.b16 %v917_v55, %v916_v54  ;;  %v926_v0 = vunpack.c.l.b16 %v2219_v29 }
  0x23   : > { %v577_v1 = vsel %vm2240_vm4, %v572_v56, %v576_v43  ;;  %v476_v2 = vrot.slane %v475_v57, 4  ;;  %v485_v3 = vor.u32 %v484_v59, %v480_v58  ;;  %v927_v4 = vunpack.c.l.b16 %v2221_v30 }
  0x24   : > { %v587_v5 = vsel %vm2240_vm4, %v582_v61, %v586_v45  ;;  %v822_v6 = vunpack.c.l.b16 %v577_v1  ;;  %1903 = vmatmul.msk.bf16.vlgmr.msra.gmra.mxu1 %vm838_vm1, %v932_v63  ;;  %v422_v7 = vunpack.c.l.bf16 %v392_v60  ;;  %v589_v8 = vshrl.u32 %v2219_v29, 16 }
  0x25   : > { %v823_v9 = vunpack.c.l.b16 %v587_v5  ;;  %v481_v10 = vsel %vm2240_vm4, %v476_v2, %v480_v58  ;;  %v486_v11 = vrot.slane %v485_v3, 4  ;;  %v2258_v12 = vpack.c.b16 %v927_v4, %v926_v0  ;;  %v2013_v3 = vld [vmem:[%s2200_s28 + $0x18] sm:$0xff]  }
  0x26   : > { %v814_v14 = vunpack.c.l.b16 %v481_v10  ;;  %v2261_v15 = vpack.c.bf16 %v422_v7, %v422_v7  ;;  %v591_v16 = vrot.slane %v589_v8, 4  ;;  %v592_v17 = vshll.u32 %v2219_v29, 16 }
  0x27   : > { %v2265_v19 = vpack.c.b16 %v823_v9, %v822_v6  ;;  %v491_v20 = vsel %vm2240_vm4, %v486_v11, %v490_v62  ;;  %v598_v21 = vshll.u32 %v2221_v30, 16  ;;  %v602_v22 = vshrl.u32 %v2221_v30, 16  ;;  %v395_v62 = vld [vmem:[%s2200_s28 + $0x50] sm:$0x1] }
  0x28   : > { %v815_v31 = vunpack.c.l.b16 %v491_v20  ;;  %v594_v32 = vrot.slane %v592_v17, 5  ;;  %v608_v33 = vshll.u32 %v2261_v15, 16  ;;  %v408_v34 = vunpack.c.l.bf16 %v378_v13 }
  0x29   : > { %1899 = vmatmul.msk.bf16.vlgmr.msra.gmra.mxu2 %vm838_vm1, %v2265_v19  ;;  %v600_v36 = vrot.slane %v598_v21, 5  ;;  %v604_v37 = vrot.slane %v602_v22, 4  ;;  %v409_v38 = vunpack.c.h.bf16 %v378_v13  ;;  %v410_v40 = vunpack.c.l.bf16 %v380_v18  ;;  %v383_v13 = vld [vmem:[%s2200_s28 + $0x20] sm:$0x1] }
  0x2a   : > { %v830_v41 = vpack.c.b16 %v815_v31, %v814_v14  ;;  %v595_v42 = vor.u32 %v594_v32, %v591_v16  ;;  %v610_v43 = vrot.slane %v608_v33, 5  ;;  %v2275_v44 = vpack.c.bf16 %v408_v34, %v408_v34 }
  0x2b   : > { %v605_v45 = vor.u32 %v604_v37, %v600_v36  ;;  %v2277_v46 = vpack.c.bf16 %v409_v38, %v409_v38  ;;  %v2279_v47 = vpack.c.bf16 %v410_v40, %v410_v40  ;;  %v2005_v48 = vunpack.c.l.bf16 %v2015_v35 }
  0x2c   : > { %1895 = vmatmul.msk.bf16.vlgmr.msra.gmra.mxu0 %vm838_vm1, %v830_v41  ;;  %v596_v49 = vrot.slane %v595_v42, 4  ;;  %v493_v50 = vshrl.u32 %v2275_v44, 16  ;;  %v496_v52 = vshll.u32 %v2275_v44, 16  ;;  %v918_v53 = vunpack.c.l.b16 %v2275_v44 }
  0x2d   : > { %v606_v54 = vrot.slane %v605_v45, 4  ;;  %v502_v55 = vshll.u32 %v2277_v46, 16  ;;  %v506_v56 = vshrl.u32 %v2277_v46, 16  ;;  %v512_v57 = vshll.u32 %v2279_v47, 16 }
  0x2e   : > { %v601_v58 = vsel %vm2240_vm4, %v596_v49, %v600_v36  ;;  %v495_v59 = vrot.slane %v493_v50, 4  ;;  %v498_v60 = vrot.slane %v496_v52, 5  ;;  %v919_v61 = vunpack.c.l.b16 %v2277_v46 }
  0x2f   : > { %1908 = vmatmul.msk.bf16.gmra.mxu3 %vm838_vm1, %v2258_v12  ;;  %v611_v63 = vsel %vm2240_vm4, %v606_v54, %v610_v43  ;;  %v824_v0 = vunpack.c.l.b16 %v601_v58  ;;  %v504_v1 = vrot.slane %v502_v55, 5  ;;  %v508_v2 = vrot.slane %v506_v56, 4 }
  0x30   : > { %v825_v4 = vunpack.c.l.b16 %v611_v63  ;;  %v499_v5 = vor.u32 %v498_v60, %v495_v59  ;;  %v514_v6 = vrot.slane %v512_v57, 5  ;;  %v2297_v7 = vpack.c.b16 %v919_v61, %v918_v53 }
  0x31   : > { %v509_v8 = vor.u32 %v508_v2, %v504_v1  ;;  %v2006_v9 = vunpack.c.h.bf16 %v2015_v35  ;;  %v2299_v10 = vpack.c.bf16 %v2005_v48, %v2005_v48  ;;  %v425_v11 = vunpack.c.l.bf16 %v395_v62 }
  0x32   : > { %v2302_v14 = vpack.c.b16 %v825_v4, %v824_v0  ;;  %v500_v16 = vrot.slane %v499_v5, 4  ;;  %v1997_v17 = vunpack.c.l.bf16 %v2013_v3  ;;  %v1998_v18 = vunpack.c.h.bf16 %v2013_v3  ;;  %v396_v5 = vld [vmem:[%s2200_s28 + $0x54] sm:$0xff]  }
  0x33   : > { %v510_v20 = vrot.slane %v509_v8, 4  ;;  %v2304_v21 = vpack.c.bf16 %v2006_v9, %v2006_v9  ;;  %v928_v22 = vunpack.c.l.b16 %v2299_v10  ;;  %v2307_v31 = vpack.c.bf16 %v425_v11, %v425_v11 }
  0x34   : > { %v505_v32 = vsel %vm2240_vm4, %v500_v16, %v504_v1  ;;  %1904 = vmatmul.msk.bf16.gmra.mxu1 %vm838_vm1, %v2297_v7  ;;  %v613_v33 = vshrl.u32 %v2299_v10, 16  ;;  %v616_v34 = vshll.u32 %v2299_v10, 16  ;;  %v413_v35 = vunpack.c.l.bf16 %v383_v13  ;;  %v398_v13 = vld [vmem:[%s2200_s28 + $0x5c] sm:$0x1] }
  0x35   : > { %v515_v36 = vsel %vm2240_vm4, %v510_v20, %v514_v6  ;;  %v816_v37 = vunpack.c.l.b16 %v505_v32  ;;  %v929_v38 = vunpack.c.l.b16 %v2304_v21  ;;  %v622_v40 = vshll.u32 %v2304_v21, 16 }
  0x36   : > { %v817_v41 = vunpack.c.l.b16 %v515_v36  ;;  %v615_v42 = vrot.slane %v613_v33, 4  ;;  %v618_v43 = vrot.slane %v616_v34, 5  ;;  %v626_v45 = vshrl.u32 %v2304_v21, 16 }
  0x37   : > { %v2320_v48 = vpack.c.b16 %v929_v38, %v928_v22  ;;  %v624_v49 = vrot.slane %v622_v40, 5  ;;  %v632_v50 = vshll.u32 %v2307_v31, 16  ;;  %v2323_v52 = vpack.c.bf16 %v1997_v17, %v1997_v17 }
  0x38   : > { %v2325_v53 = vpack.c.b16 %v817_v41, %v816_v37  ;;  %v619_v54 = vor.u32 %v618_v43, %v615_v42  ;;  %v628_v55 = vrot.slane %v626_v45, 4  ;;  %v2327_v56 = vpack.c.bf16 %v1998_v18, %v1998_v18 }
  0x39   : > { %1900 = vmatmul.msk.bf16.gmra.mxu2 %vm838_vm1, %v2302_v14  ;;  %v634_v57 = vrot.slane %v632_v50, 5  ;;  %v2331_v58 = vpack.c.bf16 %v413_v35, %v413_v35  ;;  %v517_v59 = vshrl.u32 %v2323_v52, 16  ;;  %v520_v60 = vshll.u32 %v2323_v52, 16  ;;  %v384_v35 = vld [vmem:[%s2200_s28 + $0x24] sm:$0xff]   ;;  %v386_v50 = vld [vmem:[%s2200_s28 + $0x2c] sm:$0x1] }
  0x3a   : > { %v620_v61 = vrot.slane %v619_v54, 4  ;;  %v629_v62 = vor.u32 %v628_v55, %v624_v49  ;;  %v526_v63 = vshll.u32 %v2327_v56, 16  ;;  %v530_v0 = vshrl.u32 %v2327_v56, 16 }
  0x3b   : > { %v519_v1 = vrot.slane %v517_v59, 4  ;;  %v522_v2 = vrot.slane %v520_v60, 5  ;;  %v536_v3 = vshll.u32 %v2331_v58, 16  ;;  %v920_v4 = vunpack.c.l.b16 %v2323_v52 }
  0x3c   : > { %1896 = vmatmul.msk.bf16.gmra.mxu0 %vm838_vm1, %v2325_v53  ;;  %v625_v6 = vsel %vm2240_vm4, %v620_v61, %v624_v49  ;;  %v630_v8 = vrot.slane %v629_v62, 4  ;;  %v528_v9 = vrot.slane %v526_v63, 5  ;;  %v532_v11 = vrot.slane %v530_v0, 4 }
  0x3d   : > { %v826_v16 = vunpack.c.l.b16 %v625_v6  ;;  %v523_v17 = vor.u32 %v522_v2, %v519_v1  ;;  %v538_v18 = vrot.slane %v536_v3, 5  ;;  %v921_v20 = vunpack.c.l.b16 %v2327_v56 }
  0x3e   : > { %v635_v22 = vsel %vm2240_vm4, %v630_v8, %v634_v57  ;;  %v533_v32 = vor.u32 %v532_v11, %v528_v9  ;;  %v426_v33 = vunpack.c.l.bf16 %v396_v5  ;;  %v427_v34 = vunpack.c.h.bf16 %v396_v5 }
  0x3f   : > { %1909 = vmatmul.msk.bf16.gmra.mxu3 %vm838_vm1, %v2320_v48  ;;  %v827_v36 = vunpack.c.l.b16 %v635_v22  ;;  %v524_v37 = vrot.slane %v523_v17, 4  ;;  %v428_v38 = vunpack.c.l.bf16 %v398_v13  ;;  %v2351_v41 = vpack.c.b16 %v921_v20, %v920_v4 }
  0x40   : > { %v534_v40 = vrot.slane %v533_v32, 4  ;;  %v2353_v42 = vpack.c.bf16 %v426_v33, %v426_v33  ;;  %v2355_v43 = vpack.c.bf16 %v427_v34, %v427_v34  ;;  %v414_v54 = vunpack.c.l.bf16 %v384_v35 }
  0x41   : > { %v529_v45 = vsel %vm2240_vm4, %v524_v37, %v528_v9  ;;  %v2359_v49 = vpack.c.bf16 %v428_v38, %v428_v38  ;;  %v2362_v55 = vpack.c.b16 %v827_v36, %v826_v16  ;;  %v415_v60 = vunpack.c.h.bf16 %v384_v35 }
  0x42   : > { %v539_v57 = vsel %vm2240_vm4, %v534_v40, %v538_v18  ;;  %v818_v59 = vunpack.c.l.b16 %v529_v45  ;;  %v637_v62 = vshrl.u32 %v2353_v42, 16  ;;  %v640_v63 = vshll.u32 %v2353_v42, 16 }
  0x43   : > { %v819_v61 = vunpack.c.l.b16 %v539_v57  ;;  %v646_v0 = vshll.u32 %v2355_v43, 16  ;;  %v930_v1 = vunpack.c.l.b16 %v2353_v42  ;;  %v650_v2 = vshrl.u32 %v2355_v43, 16 }
  0x44   : > { %1905 = vmatmul.msk.bf16.gmra.mxu1 %vm838_vm1, %v2351_v41  ;;  %v656_v3 = vshll.u32 %v2359_v49, 16  ;;  %v416_v4 = vunpack.c.l.bf16 %v386_v50  ;;  %v931_v5 = vunpack.c.l.b16 %v2355_v43  ;;  %v639_v6 = vrot.slane %v637_v62, 4 }
  0x45   : > { %v642_v8 = vrot.slane %v640_v63, 5  ;;  %v648_v9 = vrot.slane %v646_v0, 5  ;;  %v2375_v11 = vpack.c.b16 %v819_v61, %v818_v59  ;;  %v652_v13 = vrot.slane %v650_v2, 4  ;;  %v1947_v61 = vld [vmem:[%s2875_s2 + $0x18] sm:$0xf] }
  0x46   : > { %v2377_v16 = vpack.c.bf16 %v414_v54, %v414_v54  ;;  %v2379_v17 = vpack.c.bf16 %v415_v60, %v415_v60  ;;  %v658_v20 = vrot.slane %v656_v3, 5  ;;  %v2381_v22 = vpack.c.bf16 %v416_v4, %v416_v4  ;;  %v1956_v3 = vld [vmem:[%s2875_s2 + $0x1c] sm:$0xf] }
  0x47   : > { %v643_v18 = vor.u32 %v642_v8, %v639_v6  ;;  %v653_v32 = vor.u32 %v652_v13, %v648_v9  ;;  %v2390_v57 = vpack.c.b16 %v931_v5, %v930_v1  ;;  %v1884_v2 = vrot.slane %v2213_v26, 9 }
  0x48   : > { %v541_v33 = vshrl.u32 %v2377_v16, 16  ;;  %v544_v34 = vshll.u32 %v2377_v16, 16  ;;  %v550_v35 = vshll.u32 %v2379_v17, 16  ;;  %v554_v37 = vshrl.u32 %v2379_v17, 16 }
  0x49   : > { %1901 = vmatmul.msk.bf16.gmra.mxu2 %vm838_vm1, %v2362_v55  ;;  %v644_v36 = vrot.slane %v643_v18, 4  ;;  %v560_v38 = vshll.u32 %v2381_v22, 16  ;;  %v654_v40 = vrot.slane %v653_v32, 4  ;;  %v922_v60 = vunpack.c.l.b16 %v2377_v16 }
  0x4a   : > { %v543_v45 = vrot.slane %v541_v33, 4  ;;  %v546_v50 = vrot.slane %v544_v34, 5  ;;  %v552_v54 = vrot.slane %v550_v35, 5  ;;  %v556_v59 = vrot.slane %v554_v37, 4  ;;  %v1965_v35 = vld [vmem:[%s2875_s2 + $0x20] sm:$0xf] }
  0x4b   : > { %v649_v62 = vsel %vm2240_vm4, %v644_v36, %v648_v9  ;;  %v923_v0 = vunpack.c.l.b16 %v2379_v17  ;;  %v659_v4 = vsel %vm2240_vm4, %v654_v40, %v658_v20  ;;  %v562_v6 = vrot.slane %v560_v38, 5  ;;  %v1938_v9 = vld [vmem:[%s2875_s2 + $0x14] sm:$0xf] }
  0x4c   : > { %1897 = vmatmul.msk.bf16.gmra.mxu0 %vm838_vm1, %v2375_v11  ;;  %v547_v63 = vor.u32 %v546_v50, %v543_v45  ;;  %v557_v5 = vor.u32 %v556_v59, %v552_v54  ;;  %v743_v8 = vrot.slane %v2215_v27, 5  ;;  %v746_v18 = vrot.slane %v2217_v28, 5 }
  0x4d   : > { %v1371_v26 = vsel %vm863_vm0, %v1947_v61, 0  ;;  %v1447_v32 = vsel %vm863_vm0, %v1956_v3, 0  ;;  %v828_v33 = vunpack.c.l.b16 %v649_v62  ;;  %v2426_v36 = vpack.c.b16 %v923_v0, %v922_v60 }
  0x4e   : > { %v548_v13 = vrot.slane %v547_v63, 4  ;;  %v558_v20 = vrot.slane %v557_v5, 4  ;;  %v744_v34 = vsel %vm2402_vm7, %v1884_v2, %v743_v8  ;;  %v745_v27 = vrot.slane %v743_v8, 4  ;;  %1380 = vmatpush.bf16.msra.mxu2 %v1371_v26  ;;  %1456 = vmatpush.bf16.msra.mxu3 %v1447_v32 }
  0x4f   : > { %1910 = vmatmul.msk.bf16.gmra.mxu3 %vm838_vm1, %v2390_v57  ;;  %v1018_v28 = vunpack.c.l.b16 %v744_v34  ;;  %v1295_v37 = vsel %vm863_vm0, %v1938_v9, 0  ;;  %v1523_v38 = vsel %vm863_vm0, %v1965_v35, 0  ;;  %v829_v40 = vunpack.c.l.b16 %v659_v4 }
  0x50   : > { %v553_v45 = vsel %vm2240_vm4, %v548_v13, %v552_v54  ;;  %v563_v50 = vsel %vm2240_vm4, %v558_v20, %v562_v6  ;;  %v747_v59 = vsel %vm2402_vm7, %v745_v27, %v746_v18  ;;  %1304 = vmatpush.bf16.msrb.mxu1 %v1295_v37  ;;  %1532 = vmatpush.bf16.msra.mxu0 %v1523_v38  ;;  %v750_v61 = vrot.slane %v2277_v46, 5 }
  0x51   : > { %v1019_v60 = vunpack.c.l.b16 %v747_v59  ;;  %v820_v62 = vunpack.c.l.b16 %v553_v45  ;;  %v821_v63 = vunpack.c.l.b16 %v563_v50  ;;  %v2439_v2 = vpack.c.b16 %v829_v40, %v828_v33 }
  0x52   : > { %v1885_v54 = vrot.slane %v2275_v44, 9  ;;  %v752_v3 = vrot.slane %v750_v61, 4  ;;  %v753_v4 = vrot.slane %v2279_v47, 5  ;;  %v757_v47 = vrot.slane %v2327_v56, 5 }
  0x53   : > { %v1034_v0 = vpack.c.b16 %v1019_v60, %v1018_v28  ;;  %v2443_v5 = vpack.c.b16 %v821_v63, %v820_v62  ;;  %v1886_v13 = vrot.slane %v2323_v52, 9  ;;  %v760_v26 = vrot.slane %v2331_v58, 5 }
  0x54   : > { %1906 = vmatmul.msk.bf16.gmra.mxu1 %vm838_vm1, %v2426_v36  ;;  %v751_v46 = vsel %vm2402_vm7, %v1885_v54, %v750_v61  ;;  %v754_v6 = vsel %vm2402_vm7, %v752_v3, %v753_v4  ;;  %v759_v18 = vrot.slane %v757_v47, 4  ;;  %v764_v58 = vrot.slane %v2379_v17, 5 }
  0x55   : > { %v1020_v8 = vunpack.c.l.b16 %v751_v46  ;;  %v1021_v9 = vunpack.c.l.b16 %v754_v6  ;;  %v758_v32 = vsel %vm2402_vm7, %v1886_v13, %v757_v47  ;;  %v1887_v20 = vrot.slane %v2377_v16, 9 }
  0x56   : > { %v761_v33 = vsel %vm2402_vm7, %v759_v18, %v760_v26  ;;  %v766_v34 = vrot.slane %v764_v58, 4  ;;  %v767_v27 = vrot.slane %v2381_v22, 5  ;;  %v771_v22 = vrot.slane %v2209_v24, 5 }
  0x57   : > { %v1035_v44 = vpack.c.b16 %v1021_v9, %v1020_v8  ;;  %v1023_v56 = vunpack.c.l.b16 %v761_v33  ;;  %v1888_v37 = vrot.slane %v2207_v23, 9  ;;  %v774_v40 = vrot.slane %v2211_v25, 5 }
  0x58   : > { %v768_v35 = vsel %vm2402_vm7, %v766_v34, %v767_v27  ;;  %v773_v38 = vrot.slane %v771_v22, 4  ;;  %v778_v25 = vrot.slane %v2221_v30, 5  ;;  %v1889_v60 = vrot.slane %v2219_v29, 9  ;;  %v2008_v27 = vld [vmem:[%s2551_s16] sm:$0xff]  }
  0x59   : > { %1902 = vmatmul.msk.bf16.gmra.mxu2 %vm838_vm1, %v2439_v2  ;;  %v1025_v28 = vunpack.c.l.b16 %v768_v35  ;;  %v772_v45 = vsel %vm2402_vm7, %v1888_v37, %v771_v22  ;;  %v781_v62 = vrot.slane %v2261_v15, 5  ;;  %v785_v3 = vrot.slane %v2304_v21, 5 }
  0x5a   : > { %v775_v50 = vsel %vm2402_vm7, %v773_v38, %v774_v40  ;;  %v1026_v24 = vunpack.c.l.b16 %v772_v45  ;;  %v780_v61 = vrot.slane %v778_v25, 4  ;;  %v779_v63 = vsel %vm2402_vm7, %v1889_v60, %v778_v25 }
  0x5b   : > { %v1027_v59 = vunpack.c.l.b16 %v775_v50  ;;  %v1028_v30 = vunpack.c.l.b16 %v779_v63  ;;  %v1890_v46 = vrot.slane %v2299_v10, 9  ;;  %v787_v6 = vrot.slane %v785_v3, 4 }
  0x5c   : > { %1898 = vmatmul.msk.bf16.gmra.mxu0 %vm838_vm1, %v2443_v5  ;;  %v788_v8 = vrot.slane %v2307_v31, 5  ;;  %v1891_v35 = vrot.slane %v2353_v42, 9  ;;  %v2009_v22 = vunpack.c.l.bf16 %v2008_v27  ;;  %v2010_v37 = vunpack.c.h.bf16 %v2008_v27 }
  0x5d   : > { %v2501_v23 = vpack.c.b16 %v1027_v59, %v1026_v24  ;;  %v786_v21 = vsel %vm2402_vm7, %v1890_v46, %v785_v3 }
  0x5e   : > { %v789_v47 = vsel %vm2402_vm7, %v787_v6, %v788_v8  ;;  %v1030_v31 = vunpack.c.l.b16 %v786_v21  ;;  %v451_v24 = vpack.c.bf16 %v2009_v22, %v2009_v22  ;;  %v452_v59 = vpack.c.bf16 %v2010_v37, %v2010_v37 }
  0x5f   : > { %1921 = vmatmul.msk.bf16.vlgmr.msrb.gmra.mxu3 %vm838_vm1, %v2297_v7  ;;  %v1022_v7 = vunpack.c.l.b16 %v758_v32  ;;  %v1031_v26 = vunpack.c.l.b16 %v789_v47 }
  0x60   : > { %v674_v3 = vshrl.u32 %v452_v59, 16  ;;  %v799_v46 = vrot.slane %v452_v59, 5  ;;  %v1137_v27 = vunpack.c.l.b16 %v452_v59 }
  0x61   : > { %v2468_v52 = vpack.c.b16 %v1023_v56, %v1022_v7  ;;  %v2544_v33 = vpack.c.b16 %v1031_v26, %v1030_v31 }
  0x64   : > { %1939 = vmatmul.msk.bf16.vlgmr.msrb.gmra.mxu1 %vm838_vm1, %v1035_v44 }
  0x69   : > { %1912 = vmatmul.msk.bf16.vlgmr.msrb.gmra.mxu2 %vm838_vm1, %v1034_v0  ;;  %v782_v0 = vsel %vm2402_vm7, %v780_v61, %v781_v62  ;;  %v401_v61 = vld [vmem:[%s2551_s16 + $0x8] sm:$0x1] }
  0x6a   : > { %v1029_v54 = vunpack.c.l.b16 %v782_v0  ;;  %v431_v63 = vunpack.c.l.bf16 %v401_v61  ;;  %v661_v0 = vshrl.u32 %v451_v24, 16 }
  0x6c   : > { %1930 = vmatmul.msk.bf16.vlgmr.msrb.gmra.mxu0 %vm838_vm1, %v2325_v53  ;;  %v765_v53 = vsel %vm2402_vm7, %v1887_v20, %v764_v58  ;;  %v2519_v29 = vpack.c.b16 %v1029_v54, %v1028_v30  ;;  %v792_v58 = vrot.slane %v2355_v43, 5  ;;  %v664_v54 = vshll.u32 %v451_v24, 16 }
  0x6d   : > { %v1024_v17 = vunpack.c.l.b16 %v765_v53  ;;  %v463_v8 = vpack.c.bf16 %v431_v63, %v431_v63  ;;  %v663_v21 = vrot.slane %v661_v0, 4 }
  0x6e   : > { %v793_v43 = vsel %vm2402_vm7, %v1891_v35, %v792_v58  ;;  %v666_v47 = vrot.slane %v664_v54, 5 }
  0x6f   : > { %1922 = vmatmul.msk.bf16.gmra.mxu3 %vm838_vm1, %v2351_v41  ;;  %v2484_v16 = vpack.c.b16 %v1025_v28, %v1024_v17  ;;  %v794_v17 = vrot.slane %v792_v58, 4  ;;  %v795_v28 = vrot.slane %v2359_v49, 5  ;;  %v1032_v25 = vunpack.c.l.b16 %v793_v43 }
  0x70   : > { %v801_v58 = vrot.slane %v799_v46, 4  ;;  %v680_v35 = vshll.u32 %v463_v8, 16 }
  0x71   : > { %v796_v40 = vsel %vm2402_vm7, %v794_v17, %v795_v28  ;;  %v667_v28 = vor.u32 %v666_v47, %v663_v21 }
  0x72   : > { %v1033_v60 = vunpack.c.l.b16 %v796_v40  ;;  %v682_v63 = vrot.slane %v680_v35, 5  ;;  %v1634_v35 = vld [vmem:[%s2877_s4] sm:$0xf] }
  0x74   : > { %1940 = vmatmul.msk.bf16.gmra.mxu1 %vm838_vm1, %v2468_v52  ;;  %v2578_v30 = vpack.c.b16 %v1033_v60, %v1032_v25  ;;  %v668_v60 = vrot.slane %v667_v28, 4  ;;  %v1664_v28 = vsel %vm863_vm0, %v1634_v35, 0 }
  0x75   : > { %1673 = vmatpush.bf16.msra.mxu1 %v1664_v28 }
  0x79   : > { %1913 = vmatmul.msk.bf16.gmra.mxu2 %vm838_vm1, %v1035_v44 }
  0x7c   : > { %1931 = vmatmul.msk.bf16.gmra.mxu0 %vm838_vm1, %v2375_v11 }
  0x7f   : > { %1923 = vmatmul.msk.bf16.gmra.mxu3 %vm838_vm1, %v2426_v36 }
  0x84   : > { %1941 = vmatmul.msk.bf16.gmra.mxu1 %vm838_vm1, %v2484_v16 }
  0x89   : > { %1914 = vmatmul.msk.bf16.gmra.mxu2 %vm838_vm1, %v2468_v52 }
  0x8c   : > { %1932 = vmatmul.msk.bf16.gmra.mxu0 %vm838_vm1, %v2443_v5 }
  0x8f   : > { %1924 = vmatmul.msk.bf16.gmra.mxu3 %vm838_vm1, %v2231_v39 }
  0x94   : > { %1942 = vmatmul.msk.bf16.gmra.mxu1 %vm838_vm1, %v2501_v23 }
  0x99   : > { %1915 = vmatmul.msk.bf16.gmra.mxu2 %vm838_vm1, %v2484_v16 }
  0x9c   : > { %1933 = vmatmul.msk.bf16.gmra.mxu0 %vm838_vm1, %v2265_v19 }
  0x9f   : > { %1925 = vmatmul.msk.bf16.gmra.mxu3 %vm838_vm1, %v2258_v12 }
  0xa1   : > { %v976_v15 = vpop.f32.mrf.mxu1 }
  0xa2   : > { %v996_v4 = vpop.f32.mrf.mxu3 }
  0xa4   : > { %1943 = vmatmul.msk.bf16.gmra.mxu1 %vm838_vm1, %v2519_v29 }
  0xa9   : > { %v876_v9 = vpop.f32.mrf.mxu0  ;;  %1916 = vmatmul.msk.bf16.gmra.mxu2 %vm838_vm1, %v2501_v23  ;;  %v2528_v44 = vpop.f32.mrf.mxu1 }
  0xaa   : > { %v2534_v13 = vadd.f32 %v976_v15, %v876_v9  ;;  %v998_v18 = vpop.f32.mrf.mxu3  ;;  %v670_v15 = vshll.u32 %v452_v59, 16 }
  0xac   : > { %1934 = vmatmul.msk.bf16.gmra.mxu0 %vm838_vm1, %v2302_v14  ;;  %v896_v10 = vpop.f32.mrf.mxu2 }
  0xad   : > { %v2540_v32 = vadd.f32 %v996_v4, %v896_v10  ;;  %v676_v10 = vrot.slane %v674_v3, 4 }
  0xaf   : > { %1926 = vmatmul.msk.bf16.gmra.mxu3 %vm838_vm1, %v2320_v48 }
  0xb1   : > { %v2546_v7 = vpop.f32.mrf.mxu0  ;;  %v981_v56 = vpop.f32.mrf.mxu1 }
  0xb2   : > { %v1001_v20 = vpop.f32.mrf.mxu3 }
  0xb4   : > { %v898_v34 = vpop.f32.mrf.mxu2  ;;  %1944 = vmatmul.msk.bf16.gmra.mxu1 %vm838_vm1, %v2544_v33 }
  0xb5   : > { %v2557_v53 = vadd.f32 %v998_v18, %v898_v34  ;;  %v672_v18 = vrot.slane %v670_v15, 5  ;;  %v1136_v34 = vunpack.c.l.b16 %v451_v24 }
  0xb7   : > { %v677_v22 = vor.u32 %v676_v10, %v672_v18  ;;  %v673_v3 = vsel %vm2240_vm4, %v668_v60, %v672_v18 }
  0xb9   : > { %v881_v38 = vpop.f32.mrf.mxu0  ;;  %1917 = vmatmul.msk.bf16.gmra.mxu2 %vm838_vm1, %v2519_v29  ;;  %v2569_v42 = vpop.f32.mrf.mxu1  ;;  %v678_v61 = vrot.slane %v677_v22, 4 }
  0xba   : > { %v2567_v45 = vadd.f32 %v981_v56, %v881_v38  ;;  %v1003_v50 = vpop.f32.mrf.mxu3  ;;  %v1892_v56 = vrot.slane %v451_v24, 9 }
  0xbc   : > { %1935 = vmatmul.msk.bf16.gmra.mxu0 %vm838_vm1, %v2362_v55  ;;  %v901_v49 = vpop.f32.mrf.mxu2  ;;  %v800_v37 = vsel %vm2402_vm7, %v1892_v56, %v799_v46  ;;  %v683_v46 = vsel %vm2240_vm4, %v678_v61, %v682_v63  ;;  %v979_v63 = vadd.f32 %v2528_v44, %v2546_v7 }
  0xbd   : > { %v2574_v62 = vadd.f32 %v1001_v20, %v901_v49  ;;  %v802_v20 = vrot.slane %v463_v8, 5  ;;  %v1288_v49 = vunpack.c.l.b16 %v800_v37  ;;  %v1213_v21 = vunpack.c.l.b16 %v683_v46 }
  0xbf   : > { %1927 = vmatmul.msk.bf16.gmra.mxu3 %vm838_vm1, %v2390_v57  ;;  %v803_v38 = vsel %vm2402_vm7, %v801_v58, %v802_v20 }
  0xc0   : > { %v1289_v59 = vunpack.c.l.b16 %v803_v38 }
  0xc1   : > { %v2580_v4 = vpop.f32.mrf.mxu0  ;;  %v986_v26 = vpop.f32.mrf.mxu1 }
  0xc2   : > { %v1006_v6 = vpop.f32.mrf.mxu3  ;;  %v2604_v54 = vpack.c.b16 %v1289_v59, %v1288_v49 }
  0xc4   : > { %v903_v9 = vpop.f32.mrf.mxu2  ;;  %1945 = vmatmul.msk.bf16.gmra.mxu1 %vm838_vm1, %v2578_v30 }
  0xc5   : > { %v2584_v31 = vadd.f32 %v1003_v50, %v903_v9  ;;  %v2594_v50 = vpack.c.b16 %v1137_v27, %v1136_v34  ;;  %v1212_v9 = vunpack.c.l.b16 %v673_v3 }
  0xc7   : > { %v2616_v10 = vpack.c.b16 %v1213_v21, %v1212_v9 }
  0xc9   : > { %v886_v17 = vpop.f32.mrf.mxu0  ;;  %1918 = vmatmul.msk.bf16.gmra.mxu2 %vm838_vm1, %v2544_v33  ;;  %v2600_v0 = vpop.f32.mrf.mxu1 }
  0xca   : > { %v2592_v43 = vadd.f32 %v986_v26, %v886_v17  ;;  %v1008_v40 = vpop.f32.mrf.mxu3 }
  0xcc   : > { %1936 = vmatmul.msk.bf16.gmra.mxu0 %vm838_vm1, %v2439_v2  ;;  %v906_v24 = vpop.f32.mrf.mxu2 }
  0xcd   : > { %v2598_v25 = vadd.f32 %v1006_v6, %v906_v24 }
  0xcf   : > { %1928 = vmatmul.msk.bf16.gmra.mxu3 %vm838_vm1, %v2594_v50 }
  0xd1   : > { %v2606_v15 = vpop.f32.mrf.mxu0  ;;  %v991_v56 = vpop.f32.mrf.mxu1 }
  0xd2   : > { %v1011_v6 = vpop.f32.mrf.mxu3 }
  0xd4   : > { %v908_v8 = vpop.f32.mrf.mxu2  ;;  %1946 = vmatmul.msk.bf16.gmra.mxu1 %vm838_vm1, %v2604_v54 }
  0xd5   : > { %v2614_v47 = vadd.f32 %v1008_v40, %v908_v8 }
  0xd9   : > { %v891_v26 = vpop.f32.mrf.mxu0  ;;  %1919 = vmatmul.msk.bf16.gmra.mxu2 %vm838_vm1, %v2578_v30 }
  0xda   : > { %v2620_v18 = vadd.f32 %v991_v56, %v891_v26  ;;  %v1013_v58 = vpop.f32.mrf.mxu3 }
  0xdc   : > { %1937 = vmatmul.msk.bf16.gmra.mxu0 %vm838_vm1, %v2616_v10  ;;  %v911_v20 = vpop.f32.mrf.mxu2 }
  0xdd   : > { %v2624_v34 = vadd.f32 %v1011_v6, %v911_v20 }
  0xdf   : > { %1957 = vmatmul.msk.bf16.vlgmr.msra.gmra.mxu3 %vm838_vm1, %v2375_v11 }
  0xe1   : > { %v2628_v27 = vpop.f32.mrf.mxu0 }
  0xe2   : > { %v1154_v17 = vpop.f32.mrf.mxu3 }
  0xe4   : > { %v913_v22 = vpop.f32.mrf.mxu2 }
  0xe5   : > { %v2634_v37 = vadd.f32 %v1013_v58, %v913_v22 }
  0xe9   : > { %v1230_v38 = vpop.f32.mrf.mxu0  ;;  %1948 = vmatmul.msk.bf16.vlgmr.msra.gmra.mxu2 %vm838_vm1, %v2351_v41 }
  0xea   : > { %v1156_v40 = vpop.f32.mrf.mxu3 }
  0xec   : > { %1966 = vmatmul.msk.bf16.vlgmr.msra.gmra.mxu0 %vm838_vm1, %v2468_v52  ;;  %v1078_v11 = vpop.f32.mrf.mxu2 }
  0xed   : > { %v1118_v24 = vadd.f32 %v1078_v11, %v2534_v13 }
  0xef   : > { %v1194_v49 = vadd.f32 %v1154_v17, %v1118_v24  ;;  %1958 = vmatmul.msk.bf16.gmra.mxu3 %vm838_vm1, %v2443_v5 }
  0xf1   : > { %v1232_v59 = vpop.f32.mrf.mxu0  ;;  %v2643_v60 = vadd.f32 %v1230_v38, %v1194_v49 }
  0xf2   : > { %v1159_v61 = vpop.f32.mrf.mxu3 }
  0xf4   : > { %v1080_v3 = vpop.f32.mrf.mxu2 }
  0xf5   : > { %v1119_v41 = vadd.f32 %v1080_v3, %v979_v63 }
  0xf7   : > { %v1195_v46 = vadd.f32 %v1156_v40, %v1119_v41 }
  0xf9   : > { %v1235_v6 = vpop.f32.mrf.mxu0  ;;  %1949 = vmatmul.msk.bf16.gmra.mxu2 %vm838_vm1, %v2426_v36  ;;  %v2649_v52 = vadd.f32 %v1232_v59, %v1195_v46  ;;  %v984_v36 = vadd.f32 %v2569_v42, %v2580_v4  ;;  %v402_v46 = vld [vmem:[%s2551_s16 + $0xc] sm:$0xff]  }
  0xfa   : > { %v1161_v13 = vpop.f32.mrf.mxu3 }
  0xfc   : > { %1967 = vmatmul.msk.bf16.gmra.mxu0 %vm838_vm1, %v2484_v16  ;;  %v1083_v5 = vpop.f32.mrf.mxu2 }
  0xfd   : > { %v1120_v8 = vadd.f32 %v1083_v5, %v2567_v45  ;;  %v433_v5 = vunpack.c.h.bf16 %v402_v46 }
  0xff   : > { %v1196_v9 = vadd.f32 %v1159_v61, %v1120_v8  ;;  %1959 = vmatmul.msk.bf16.gmra.mxu3 %vm838_vm1, %v2265_v19 }
 0x101   : > { %v1237_v44 = vpop.f32.mrf.mxu0  ;;  %v2656_v7 = vadd.f32 %v1235_v6, %v1196_v9  ;;  %v404_v9 = vld [vmem:[%s2551_s16 + $0x14] sm:$0x1] }
 0x102   : > { %v1164_v21 = vpop.f32.mrf.mxu3 }
 0x104   : > { %v1085_v26 = vpop.f32.mrf.mxu2 }
 0x105   : > { %v1121_v56 = vadd.f32 %v1085_v26, %v984_v36 }
 0x107   : > { %v1197_v58 = vadd.f32 %v1161_v13, %v1121_v56  ;;  %v432_v13 = vunpack.c.l.bf16 %v402_v46  ;;  %v434_v56 = vunpack.c.l.bf16 %v404_v9 }
 0x109   : > { %v1240_v20 = vpop.f32.mrf.mxu0  ;;  %1950 = vmatmul.msk.bf16.gmra.mxu2 %vm838_vm1, %v2231_v39  ;;  %v2662_v16 = vadd.f32 %v1237_v44, %v1197_v58  ;;  %v989_v39 = vadd.f32 %v2600_v0, %v2606_v15  ;;  %v993_v0 = vpop.f32.mrf.mxu1  ;;  %v2696_v44 = vpack.c.bf16 %v432_v13, %v432_v13 }
 0x10a   : > { %v1166_v45 = vpop.f32.mrf.mxu3 }
 0x10b   : > { %v685_v58 = vshrl.u32 %v2696_v44, 16  ;;  %v1893_v9 = vrot.slane %v2696_v44, 9 }
 0x10c   : > { %1968 = vmatmul.msk.bf16.gmra.mxu0 %vm838_vm1, %v2501_v23  ;;  %v1088_v19 = vpop.f32.mrf.mxu2 }
 0x10d   : > { %v1122_v35 = vadd.f32 %v1088_v19, %v2592_v43 }
 0x10f   : > { %v1198_v17 = vadd.f32 %v1164_v21, %v1122_v35  ;;  %1960 = vmatmul.msk.bf16.gmra.mxu3 %vm838_vm1, %v2302_v14  ;;  %v464_v35 = vpack.c.bf16 %v434_v56, %v434_v56 }
 0x111   : > { %v1242_v42 = vpop.f32.mrf.mxu0  ;;  %v2669_v4 = vadd.f32 %v1240_v20, %v1198_v17  ;;  %v688_v20 = vshll.u32 %v2696_v44, 16  ;;  %v687_v17 = vrot.slane %v685_v58, 4 }
 0x112   : > { %v1169_v28 = vpop.f32.mrf.mxu3 }
 0x114   : > { %v1090_v22 = vpop.f32.mrf.mxu2 }
 0x115   : > { %v1123_v38 = vadd.f32 %v1090_v22, %v989_v39 }
 0x117   : > { %v1199_v40 = vadd.f32 %v1166_v45, %v1123_v38 }
 0x119   : > { %v1245_v11 = vpop.f32.mrf.mxu0  ;;  %1951 = vmatmul.msk.bf16.gmra.mxu2 %vm838_vm1, %v2258_v12  ;;  %v2675_v23 = vadd.f32 %v1242_v42, %v1199_v40  ;;  %v994_v12 = vadd.f32 %v993_v0, %v2628_v27  ;;  %v690_v42 = vrot.slane %v688_v20, 5 }
 0x11a   : > { %v1171_v43 = vpop.f32.mrf.mxu3 }
 0x11c   : > { %1969 = vmatmul.msk.bf16.gmra.mxu0 %vm838_vm1, %v2519_v29  ;;  %v1093_v14 = vpop.f32.mrf.mxu2 }
 0x11d   : > { %v1124_v24 = vadd.f32 %v1093_v14, %v2620_v18 }
 0x11f   : > { %v1200_v49 = vadd.f32 %v1169_v28, %v1124_v24  ;;  %1961 = vmatmul.msk.bf16.gmra.mxu3 %vm838_vm1, %v2362_v55 }
 0x121   : > { %v1247_v15 = vpop.f32.mrf.mxu0  ;;  %v2682_v59 = vadd.f32 %v1245_v11, %v1200_v49 }
 0x122   : > { %v1174_v61 = vpop.f32.mrf.mxu3 }
 0x124   : > { %v1095_v63 = vpop.f32.mrf.mxu2 }
 0x125   : > { %v1125_v3 = vadd.f32 %v1095_v63, %v994_v12 }
 0x127   : > { %v1201_v41 = vadd.f32 %v1171_v43, %v1125_v3  ;;  %v691_v43 = vor.u32 %v690_v42, %v687_v17 }
 0x129   : > { %v1250_v29 = vpop.f32.mrf.mxu0  ;;  %1952 = vmatmul.msk.bf16.gmra.mxu2 %vm838_vm1, %v2320_v48  ;;  %v2687_v18 = vadd.f32 %v1247_v15, %v1201_v41  ;;  %v2698_v48 = vpack.c.bf16 %v433_v5, %v433_v5  ;;  %v692_v0 = vrot.slane %v691_v43, 4  ;;  %v1306_v5 = vpop.f32.mrf.mxu1 }
 0x12a   : > { %v1176_v6 = vpop.f32.mrf.mxu3 }
 0x12b   : > { %v698_v45 = vshrl.u32 %v2698_v48, 16  ;;  %v806_v13 = vrot.slane %v2698_v48, 5  ;;  %v1365_v20 = vunpack.c.l.b16 %v2698_v48 }
 0x12c   : > { %1970 = vmatmul.msk.bf16.gmra.mxu0 %vm838_vm1, %v2544_v33  ;;  %v1098_v55 = vpop.f32.mrf.mxu2 }
 0x12d   : > { %v1126_v27 = vadd.f32 %v1098_v55, %v2540_v32  ;;  %v694_v32 = vshll.u32 %v2698_v48, 16  ;;  %v700_v39 = vrot.slane %v698_v45, 4 }
 0x12f   : > { %v1202_v8 = vadd.f32 %v1174_v61, %v1126_v27  ;;  %1962 = vmatmul.msk.bf16.gmra.mxu3 %vm838_vm1, %v2439_v2  ;;  %v696_v28 = vrot.slane %v694_v32, 5 }
 0x131   : > { %v1252_v21 = vpop.f32.mrf.mxu0  ;;  %v2700_v36 = vadd.f32 %v1250_v29, %v1202_v8  ;;  %v701_v14 = vor.u32 %v700_v39, %v696_v28  ;;  %v1308_v45 = vpop.f32.mrf.mxu1 }
 0x132   : > { %v1179_v26 = vpop.f32.mrf.mxu3 }
 0x133   : > { %v702_v15 = vrot.slane %v701_v14, 4 }
 0x134   : > { %v1100_v33 = vpop.f32.mrf.mxu2 }
 0x135   : > { %v1127_v2 = vadd.f32 %v1100_v33, %v2557_v53  ;;  %v704_v53 = vshll.u32 %v464_v35, 16 }
 0x137   : > { %v1203_v19 = vadd.f32 %v1176_v6, %v1127_v2  ;;  %v706_v61 = vrot.slane %v704_v53, 5 }
 0x139   : > { %v1255_v22 = vpop.f32.mrf.mxu0  ;;  %1953 = vmatmul.msk.bf16.gmra.mxu2 %vm838_vm1, %v2390_v57  ;;  %v2709_v38 = vadd.f32 %v1252_v21, %v1203_v19  ;;  %v707_v41 = vsel %vm2240_vm4, %v702_v15, %v706_v61  ;;  %v808_v21 = vrot.slane %v806_v13, 4 }
 0x13a   : > { %v1181_v40 = vpop.f32.mrf.mxu3  ;;  %v1441_v6 = vunpack.c.l.b16 %v707_v41 }
 0x13c   : > { %1971 = vmatmul.msk.bf16.gmra.mxu0 %vm838_vm1, %v2578_v30  ;;  %v1103_v11 = vpop.f32.mrf.mxu2  ;;  %v697_v30 = vsel %vm2240_vm4, %v692_v0, %v696_v28 }
 0x13d   : > { %v1128_v24 = vadd.f32 %v1103_v11, %v2574_v62  ;;  %v1440_v46 = vunpack.c.l.b16 %v697_v30  ;;  %v1311_v11 = vpop.f32.mrf.mxu1 }
 0x13f   : > { %v1204_v49 = vadd.f32 %v1179_v26, %v1128_v24  ;;  %1963 = vmatmul.msk.bf16.gmra.mxu3 %vm838_vm1, %v2616_v10  ;;  %v1442_v8 = vpack.c.b16 %v1441_v6, %v1440_v46  ;;  %v809_v26 = vrot.slane %v464_v35, 5  ;;  %v1347_v6 = vadd.f32 %v1308_v45, %v2649_v52 }
 0x141   : > { %v1257_v57 = vpop.f32.mrf.mxu0  ;;  %v2716_v12 = vadd.f32 %v1255_v22, %v1204_v49 }
 0x142   : > { %v1184_v63 = vpop.f32.mrf.mxu3 }
 0x144   : > { %v1105_v3 = vpop.f32.mrf.mxu2 }
 0x145   : > { %v1129_v62 = vadd.f32 %v1105_v3, %v2584_v31  ;;  %v1313_v15 = vpop.f32.mrf.mxu1  ;;  %v1346_v3 = vadd.f32 %v1306_v5, %v2643_v60 }
 0x146   : > { %v1349_v45 = vadd.f32 %v1313_v15, %v2662_v16 }
 0x147   : > { %v1205_v29 = vadd.f32 %v1181_v40, %v1129_v62 }
 0x149   : > { %v1260_v10 = vpop.f32.mrf.mxu0  ;;  %1954 = vmatmul.msk.bf16.gmra.mxu2 %vm838_vm1, %v2594_v50  ;;  %v2725_v55 = vadd.f32 %v1257_v57, %v1205_v29  ;;  %v1364_v50 = vunpack.c.l.b16 %v2696_v44 }
 0x14a   : > { %v1186_v27 = vpop.f32.mrf.mxu3 }
 0x14b   : > { %v1366_v42 = vpack.c.b16 %v1365_v20, %v1364_v50 }
 0x14c   : > { %1972 = vmatmul.msk.bf16.gmra.mxu0 %vm838_vm1, %v2604_v54  ;;  %v1108_v51 = vpop.f32.mrf.mxu2  ;;  %v807_v54 = vsel %vm2402_vm7, %v1893_v9, %v806_v13  ;;  %v1348_v9 = vadd.f32 %v1311_v11, %v2656_v7 }
 0x14d   : > { %v1130_v31 = vadd.f32 %v1108_v51, %v2598_v25  ;;  %v810_v25 = vsel %vm2402_vm7, %v808_v21, %v809_v26  ;;  %v1516_v19 = vunpack.c.l.b16 %v807_v54  ;;  %v1316_v29 = vpop.f32.mrf.mxu1 }
 0x14e   : > { %v1517_v35 = vunpack.c.l.b16 %v810_v25 }
 0x14f   : > { %v1206_v56 = vadd.f32 %v1184_v63, %v1130_v31  ;;  %1964 = vmatmul.msk.bf16.gmra.mxu3 %vm838_vm1, %v1442_v8 }
 0x150   : > { %v1518_v28 = vpack.c.b16 %v1517_v35, %v1516_v19 }
 0x151   : > { %v1262_v33 = vpop.f32.mrf.mxu0  ;;  %v2734_v58 = vadd.f32 %v1260_v10, %v1206_v56 }
 0x152   : > { %v1189_v32 = vpop.f32.mrf.mxu3 }
 0x154   : > { %v1110_v2 = vpop.f32.mrf.mxu2 }
 0x155   : > { %v1131_v17 = vadd.f32 %v1110_v2, %v2614_v47  ;;  %v1318_v26 = vpop.f32.mrf.mxu1 }
 0x156   : > { %v1351_v15 = vadd.f32 %v1318_v26, %v2675_v23 }
 0x157   : > { %v1207_v44 = vadd.f32 %v1186_v27, %v1131_v17 }
 0x159   : > { %v1265_v39 = vpop.f32.mrf.mxu0  ;;  %1955 = vmatmul.msk.bf16.gmra.mxu2 %vm838_vm1, %v1366_v42  ;;  %v2743_v48 = vadd.f32 %v1262_v33, %v1207_v44 }
 0x15a   : > { %v1191_v22 = vpop.f32.mrf.mxu3 }
 0x15c   : > { %1973 = vmatmul.msk.bf16.gmra.mxu0 %vm838_vm1, %v1518_v28  ;;  %v1113_v1 = vpop.f32.mrf.mxu2 }
 0x15d   : > { %v1132_v40 = vadd.f32 %v1113_v1, %v2624_v34  ;;  %v1321_v17 = vpop.f32.mrf.mxu1 }
 0x15f   : > { %v1208_v43 = vadd.f32 %v1189_v32, %v1132_v40 }
 0x161   : > { %v1267_v14 = vpop.f32.mrf.mxu0  ;;  %v2747_v53 = vadd.f32 %v1265_v39, %v1208_v43 }
 0x162   : > { %v1458_v47 = vpop.f32.mrf.mxu3 }
 0x164   : > { %v1115_v24 = vpop.f32.mrf.mxu2 }
 0x165   : > { %v1133_v49 = vadd.f32 %v1115_v24, %v2634_v37  ;;  %v2757_v37 = vld [vmem:[%s2876_s3] ss:$0 sm:$0xff]  ;;  %v1323_v16 = vpop.f32.mrf.mxu1 }
 0x167   : > { %v1209_v0 = vadd.f32 %v1191_v22, %v1133_v49  ;;  %v1350_v22 = vadd.f32 %v1316_v29, %v2669_v4 }
 0x169   : > { %v1534_v61 = vpop.f32.mrf.mxu0  ;;  %v2750_v57 = vadd.f32 %v1267_v14, %v1209_v0 }
 0x16a   : > { %v1460_v63 = vpop.f32.mrf.mxu3 }
 0x16c   : > { %v1382_v30 = vpop.f32.mrf.mxu2 }
 0x16d   : > { %v1422_v41 = vadd.f32 %v1382_v30, %v1346_v3 }
 0x16f   : > { %v1498_v34 = vadd.f32 %v1458_v47, %v1422_v41 }
 0x171   : > { %v1536_v62 = vpop.f32.mrf.mxu0  ;;  %v1574_v13 = vadd.f32 %v1534_v61, %v1498_v34 }
 0x172   : > { %v1463_v46 = vpop.f32.mrf.mxu3 }
 0x173   : > { %v1594_v51 = vadd.f32 %v2757_v37, %v1574_v13 }
 0x174   : > { %v1384_v10 = vpop.f32.mrf.mxu2 }
 0x175   : > { %v1423_v27 = vadd.f32 %v1384_v10, %v1347_v6  ;;  %v1610_v56 = vmax.f32 %v1594_v51, 0.0 }
 0x177   : > { %v1499_v8 = vadd.f32 %v1460_v63, %v1423_v27 }
 0x179   : > { %v1575_v60 = vadd.f32 %v1536_v62, %v1499_v8  ;;  %v1539_v5 = vpop.f32.mrf.mxu0  ;;  %v1326_v62 = vpop.f32.mrf.mxu1 }
 0x17a   : > { %v1465_v31 = vpop.f32.mrf.mxu3 }
 0x17b   : > { %v1595_v21 = vadd.f32 %v2757_v37, %v1575_v60 }
 0x17c   : > { %v1387_v52 = vpop.f32.mrf.mxu2 }
 0x17d   : > { %v1611_v50 = vmax.f32 %v1595_v21, 0.0  ;;  %v1424_v33 = vadd.f32 %v1387_v52, %v1348_v9 }
 0x17f   : > { %v1626_v20 = vpack.c.bf16 %v1611_v50, %v1610_v56  ;;  %v1500_v54 = vadd.f32 %v1463_v46, %v1424_v33  ;;  %v1352_v46 = vadd.f32 %v1321_v17, %v2682_v59 }
 0x181   : > { %v1541_v25 = vpop.f32.mrf.mxu0  ;;  %1974 = vmatmul.msk.bf16.vlgmr.msra.gmra.mxu1 %vm838_vm1, %v1626_v20  ;;  %v1576_v19 = vadd.f32 %v1539_v5, %v1500_v54  ;;  %v1328_v9 = vpop.f32.mrf.mxu1  ;;  %v1354_v54 = vadd.f32 %v1326_v62, %v2700_v36 }
 0x182   : > { %v1468_v32 = vpop.f32.mrf.mxu3 }
 0x183   : > { %v1596_v42 = vadd.f32 %v2757_v37, %v1576_v19 }
 0x184   : > { %v1389_v2 = vpop.f32.mrf.mxu2 }
 0x185   : > { %v1425_v35 = vadd.f32 %v1389_v2, %v1349_v45  ;;  %v1612_v11 = vmax.f32 %v1596_v42, 0.0  ;;  %v1355_v42 = vadd.f32 %v1328_v9, %v2709_v38 }
 0x187   : > { %v1501_v7 = vadd.f32 %v1465_v31, %v1425_v35  ;;  %v1353_v31 = vadd.f32 %v1323_v16, %v2687_v18 }
 0x189   : > { %v1577_v44 = vadd.f32 %v1541_v25, %v1501_v7  ;;  %v1544_v28 = vpop.f32.mrf.mxu0  ;;  %v1331_v35 = vpop.f32.mrf.mxu1 }
 0x18a   : > { %v1470_v39 = vpop.f32.mrf.mxu3 }
 0x18b   : > { %v1597_v1 = vadd.f32 %v2757_v37, %v1577_v44 }
 0x18c   : > { %v1392_v40 = vpop.f32.mrf.mxu2 }
 0x18d   : > { %v1613_v43 = vmax.f32 %v1597_v1, 0.0  ;;  %v1426_v14 = vadd.f32 %v1392_v40, %v1350_v22 }
 0x18f   : > { %v1627_v47 = vpack.c.bf16 %v1613_v43, %v1612_v11  ;;  %v1502_v24 = vadd.f32 %v1468_v32, %v1426_v14  ;;  %v1356_v14 = vadd.f32 %v1331_v35, %v2716_v12 }
 0x191   : > { %v1546_v49 = vpop.f32.mrf.mxu0  ;;  %1975 = vmatmul.msk.bf16.gmra.mxu1 %vm838_vm1, %v1627_v47  ;;  %v1578_v63 = vadd.f32 %v1544_v28, %v1502_v24  ;;  %v1333_v36 = vpop.f32.mrf.mxu1 }
 0x192   : > { %v1473_v0 = vpop.f32.mrf.mxu3 }
 0x193   : > { %v1598_v4 = vadd.f32 %v2757_v37, %v1578_v63 }
 0x194   : > { %v1394_v61 = vpop.f32.mrf.mxu2 }
 0x195   : > { %v1427_v3 = vadd.f32 %v1394_v61, %v1351_v15  ;;  %v1614_v13 = vmax.f32 %v1598_v4, 0.0 }
 0x197   : > { %v1503_v30 = vadd.f32 %v1470_v39, %v1427_v3 }
 0x199   : > { %v1579_v41 = vadd.f32 %v1546_v49, %v1503_v30  ;;  %v1549_v34 = vpop.f32.mrf.mxu0  ;;  %v1336_v3 = vpop.f32.mrf.mxu1  ;;  %v1357_v30 = vadd.f32 %v1333_v36, %v2725_v55 }
 0x19a   : > { %v1475_v29 = vpop.f32.mrf.mxu3 }
 0x19b   : > { %v1599_v6 = vadd.f32 %v2757_v37, %v1579_v41 }
 0x19c   : > { %v1397_v10 = vpop.f32.mrf.mxu2 }
 0x19d   : > { %v1615_v27 = vmax.f32 %v1599_v6, 0.0  ;;  %v1428_v8 = vadd.f32 %v1397_v10, %v1352_v46  ;;  %v1358_v10 = vadd.f32 %v1336_v3, %v2734_v58 }
 0x19f   : > { %v1628_v51 = vpack.c.bf16 %v1615_v27, %v1614_v13  ;;  %v1504_v23 = vadd.f32 %v1473_v0, %v1428_v8 }
 0x1a1   : > { %v1551_v60 = vpop.f32.mrf.mxu0  ;;  %1976 = vmatmul.msk.bf16.gmra.mxu1 %vm838_vm1, %v1628_v51  ;;  %v1580_v26 = vadd.f32 %v1549_v34, %v1504_v23  ;;  %v1338_v27 = vpop.f32.mrf.mxu1 }
 0x1a2   : > { %v1478_v5 = vpop.f32.mrf.mxu3  ;;  %v1359_v9 = vadd.f32 %v1338_v27, %v2743_v48 }
 0x1a3   : > { %v1600_v59 = vadd.f32 %v2757_v37, %v1580_v26 }
 0x1a4   : > { %v1399_v21 = vpop.f32.mrf.mxu2 }
 0x1a5   : > { %v1429_v52 = vadd.f32 %v1399_v21, %v1353_v31  ;;  %v1616_v45 = vmax.f32 %v1600_v59, 0.0 }
 0x1a7   : > { %v1505_v56 = vadd.f32 %v1475_v29, %v1429_v52 }
 0x1a9   : > { %v1581_v50 = vadd.f32 %v1551_v60, %v1505_v56  ;;  %v1554_v33 = vpop.f32.mrf.mxu0  ;;  %v1341_v59 = vpop.f32.mrf.mxu1 }
 0x1aa   : > { %v1480_v20 = vpop.f32.mrf.mxu3 }
 0x1ab   : > { %v1601_v25 = vadd.f32 %v2757_v37, %v1581_v50 }
 0x1ac   : > { %v1402_v32 = vpop.f32.mrf.mxu2 }
 0x1ad   : > { %v1617_v2 = vmax.f32 %v1601_v25, 0.0  ;;  %v1430_v19 = vadd.f32 %v1402_v32, %v1354_v54 }
 0x1af   : > { %v1629_v18 = vpack.c.bf16 %v1617_v2, %v1616_v45  ;;  %v1506_v17 = vadd.f32 %v1478_v5, %v1430_v19 }
 0x1b1   : > { %v1556_v7 = vpop.f32.mrf.mxu0  ;;  %1977 = vmatmul.msk.bf16.gmra.mxu1 %vm838_vm1, %v1629_v18  ;;  %v1582_v39 = vadd.f32 %v1554_v33, %v1506_v17  ;;  %v1343_v18 = vpop.f32.mrf.mxu1 }
 0x1b2   : > { %v1483_v28 = vpop.f32.mrf.mxu3 }
 0x1b3   : > { %v1602_v40 = vadd.f32 %v2757_v37, %v1582_v39 }
 0x1b4   : > { %v1404_v44 = vpop.f32.mrf.mxu2 }
 0x1b5   : > { %v1431_v22 = vadd.f32 %v1404_v44, %v1355_v42  ;;  %v1618_v24 = vmax.f32 %v1602_v40, 0.0 }
 0x1b7   : > { %v1507_v1 = vadd.f32 %v1480_v20, %v1431_v22  ;;  %v1360_v20 = vadd.f32 %v1341_v59, %v2747_v53 }
 0x1b9   : > { %v1583_v11 = vadd.f32 %v1556_v7, %v1507_v1  ;;  %v1559_v43 = vpop.f32.mrf.mxu0  ;;  %v1361_v7 = vadd.f32 %v1343_v18, %v2750_v57  ;;  %v2803_v57 = vld [vmem:[%s2878_s5] ss:$0 sm:$0xff] }
 0x1ba   : > { %v1485_v15 = vpop.f32.mrf.mxu3 }
 0x1bb   : > { %v1603_v47 = vadd.f32 %v2757_v37, %v1583_v11 }
 0x1bc   : > { %v1407_v16 = vpop.f32.mrf.mxu2 }
 0x1bd   : > { %v1619_v49 = vmax.f32 %v1603_v47, 0.0  ;;  %v1432_v0 = vadd.f32 %v1407_v16, %v1356_v14 }
 0x1bf   : > { %v1630_v38 = vpack.c.bf16 %v1619_v49, %v1618_v24  ;;  %v1508_v61 = vadd.f32 %v1483_v28, %v1432_v0 }
 0x1c1   : > { %v1561_v63 = vpop.f32.mrf.mxu0  ;;  %1978 = vmatmul.msk.bf16.gmra.mxu1 %vm838_vm1, %v1630_v38  ;;  %v1584_v41 = vadd.f32 %v1559_v43, %v1508_v61 }
 0x1c2   : > { %v1488_v12 = vpop.f32.mrf.mxu3 }
 0x1c3   : > { %v1604_v29 = vadd.f32 %v2757_v37, %v1584_v41 }
 0x1c4   : > { %v1409_v4 = vpop.f32.mrf.mxu2 }
 0x1c5   : > { %v1433_v34 = vadd.f32 %v1409_v4, %v1357_v30  ;;  %v1620_v51 = vmax.f32 %v1604_v29, 0.0 }
 0x1c7   : > { %v1509_v62 = vadd.f32 %v1485_v15, %v1433_v34 }
 0x1c9   : > { %v1585_v46 = vadd.f32 %v1561_v63, %v1509_v62  ;;  %v1564_v6 = vpop.f32.mrf.mxu0 }
 0x1ca   : > { %v1490_v31 = vpop.f32.mrf.mxu3 }
 0x1cb   : > { %v1605_v13 = vadd.f32 %v2757_v37, %v1585_v46 }
 0x1cc   : > { %v1412_v8 = vpop.f32.mrf.mxu2 }
 0x1cd   : > { %v1621_v23 = vmax.f32 %v1605_v13, 0.0  ;;  %v1434_v60 = vadd.f32 %v1412_v8, %v1358_v10 }
 0x1cf   : > { %v1631_v5 = vpack.c.bf16 %v1621_v23, %v1620_v51  ;;  %v1510_v55 = vadd.f32 %v1488_v12, %v1434_v60 }
 0x1d1   : > { %1979 = vmatmul.msk.bf16.gmra.mxu1 %vm838_vm1, %v1631_v5  ;;  %v1566_v21 = vpop.f32.mrf.mxu0  ;;  %v1586_v52 = vadd.f32 %v1564_v6, %v1510_v55 }
 0x1d2   : > { %v1493_v25 = vpop.f32.mrf.mxu3 }
 0x1d3   : > { %v1606_v50 = vadd.f32 %v2757_v37, %v1586_v52 }
 0x1d4   : > { %v1414_v26 = vpop.f32.mrf.mxu2 }
 0x1d5   : > { %v1435_v56 = vadd.f32 %v1414_v26, %v1359_v9  ;;  %v1622_v45 = vmax.f32 %v1606_v50, 0.0 }
 0x1d7   : > { %v1511_v58 = vadd.f32 %v1490_v31, %v1435_v56 }
 0x1d9   : > { %v1587_v33 = vadd.f32 %v1566_v21, %v1511_v58  ;;  %v1569_v35 = vpop.f32.mrf.mxu0 }
 0x1da   : > { %v1495_v28 = vpop.f32.mrf.mxu3 }
 0x1db   : > { %v1607_v54 = vadd.f32 %v2757_v37, %v1587_v33 }
 0x1dc   : > { %v1417_v32 = vpop.f32.mrf.mxu2 }
 0x1dd   : > { %v1623_v2 = vmax.f32 %v1607_v54, 0.0  ;;  %v1436_v19 = vadd.f32 %v1417_v32, %v1360_v20 }
 0x1df   : > { %v1632_v48 = vpack.c.bf16 %v1623_v2, %v1622_v45  ;;  %v1512_v17 = vadd.f32 %v1493_v25, %v1436_v19 }
 0x1e1   : > { %1980 = vmatmul.msk.bf16.gmra.mxu1 %vm838_vm1, %v1632_v48  ;;  %v1588_v53 = vadd.f32 %v1569_v35, %v1512_v17  ;;  %v1571_v22 = vpop.f32.mrf.mxu0 }
 0x1e3   : > { %v1608_v1 = vadd.f32 %v2757_v37, %v1588_v53 }
 0x1e4   : > { %v1419_v42 = vpop.f32.mrf.mxu2 }
 0x1e5   : > { %v1437_v44 = vadd.f32 %v1419_v42, %v1361_v7  ;;  %v1624_v11 = vmax.f32 %v1608_v1, 0.0 }
 0x1e7   : > { %v1513_v39 = vadd.f32 %v1495_v28, %v1437_v44 }
 0x1e9   : > { %v1589_v36 = vadd.f32 %v1571_v22, %v1513_v39 }
 0x1eb   : > { %v1609_v40 = vadd.f32 %v2757_v37, %v1589_v36 }
 0x1ed   : > { %v1625_v43 = vmax.f32 %v1609_v40, 0.0 }
 0x1ef   : > { %v1633_v14 = vpack.c.bf16 %v1625_v43, %v1624_v11 }
 0x1f1   : > { %1981 = vmatmul.msk.bf16.gmra.mxu1 %vm838_vm1, %v1633_v14 }
 0x1fe   : > { %v1675_v47 = vpop.f32.mrf.mxu1 }
 0x1ff   : > { %v1676_v16 = vadd.f32 %v2803_v57, %v1675_v47 }
 0x201   : > { %v1715_v37 = vmax.f32 %v1676_v16, 0.0 }
 0x203   : > { %1732 = vst.msk [vmem:[%s2809_s17] sm:$0xff] %vm1731_vm8, %v1715_v37 }
 0x206   : > { %v1677_v24 = vpop.f32.mrf.mxu1 }
 0x207   : > { %v1678_v49 = vadd.f32 %v2803_v57, %v1677_v24 }
 0x209   : > { %v1716_v0 = vmax.f32 %v1678_v49, 0.0 }
 0x20b   : > { %1733 = vst.msk [vmem:[%s2809_s17 + $0x8] sm:$0xff] %vm1731_vm8, %v1716_v0 }
 0x20e   : > { %v1680_v15 = vpop.f32.mrf.mxu1 }
 0x20f   : > { %v1681_v38 = vadd.f32 %v2803_v57, %v1680_v15 }
 0x211   : > { %v1717_v61 = vmax.f32 %v1681_v38, 0.0 }
 0x213   : > { %1734 = vst.msk [vmem:[%s2809_s17 + $0x10] sm:$0xff] %vm1731_vm8, %v1717_v61 }
 0x216   : > { %v1682_v63 = vpop.f32.mrf.mxu1 }
 0x217   : > { %v1683_v3 = vadd.f32 %v2803_v57, %v1682_v63 }
 0x219   : > { %v1718_v30 = vmax.f32 %v1683_v3, 0.0 }
 0x21b   : > { %1735 = vst.msk [vmem:[%s2809_s17 + $0x18] sm:$0xff] %vm1731_vm8, %v1718_v30 }
 0x21e   : > { %v1685_v4 = vpop.f32.mrf.mxu1 }
 0x21f   : > { %v1686_v41 = vadd.f32 %v2803_v57, %v1685_v4 }
 0x221   : > { %v1719_v34 = vmax.f32 %v1686_v41, 0.0 }
 0x223   : > { %1736 = vst.msk [vmem:[%s2809_s17 + $0x20] sm:$0xff] %vm1731_vm8, %v1719_v34 }
 0x226   : > { %v1687_v62 = vpop.f32.mrf.mxu1 }
 0x227   : > { %v1688_v12 = vadd.f32 %v2803_v57, %v1687_v62 }
 0x229   : > { %v1720_v29 = vmax.f32 %v1688_v12, 0.0 }
 0x22b   : > { %1737 = vst.msk [vmem:[%s2809_s17 + $0x28] sm:$0xff] %vm1731_vm8, %v1720_v29 }
 0x22e   : > { %v1690_v46 = vpop.f32.mrf.mxu1 }
 0x22f   : > { %v1691_v6 = vadd.f32 %v2803_v57, %v1690_v46 }
 0x231   : > { %v1721_v10 = vmax.f32 %v1691_v6, 0.0 }
 0x233   : > { %1738 = vst.msk [vmem:[%s2809_s17 + $0x30] sm:$0xff] %vm1731_vm8, %v1721_v10 }
 0x236   : > { %v1692_v13 = vpop.f32.mrf.mxu1 }
 0x237   : > { %v1693_v27 = vadd.f32 %v2803_v57, %v1692_v13 }
 0x239   : > { %v1722_v8 = vmax.f32 %v1693_v27, 0.0 }
 0x23b   : > { %1739 = vst.msk [vmem:[%s2809_s17 + $0x38] sm:$0xff] %vm1731_vm8, %v1722_v8 }
 0x23e   : > { %v1695_v51 = vpop.f32.mrf.mxu1 }
 0x23f   : > { %v1696_v23 = vadd.f32 %v2803_v57, %v1695_v51 }
 0x241   : > { %v1723_v60 = vmax.f32 %v1696_v23, 0.0 }
 0x243   : > { %1740 = vst.msk [vmem:[%s2809_s17 + $0x40] sm:$0xff] %vm1731_vm8, %v1723_v60 }
 0x246   : > { %v1697_v5 = vpop.f32.mrf.mxu1 }
 0x247   : > { %v1698_v55 = vadd.f32 %v2803_v57, %v1697_v5 }
 0x249   : > { %v1724_v31 = vmax.f32 %v1698_v55, 0.0 }
 0x24b   : > { %1741 = vst.msk [vmem:[%s2809_s17 + $0x48] sm:$0xff] %vm1731_vm8, %v1724_v31 }
 0x24e   : > { %v1700_v9 = vpop.f32.mrf.mxu1 }
 0x24f   : > { %v1701_v21 = vadd.f32 %v2803_v57, %v1700_v9 }
 0x251   : > { %v1725_v26 = vmax.f32 %v1701_v21, 0.0 }
 0x253   : > { %1742 = vst.msk [vmem:[%s2809_s17 + $0x50] sm:$0xff] %vm1731_vm8, %v1725_v26 }
 0x256   : > { %v1702_v52 = vpop.f32.mrf.mxu1 }
 0x257   : > { %v1703_v56 = vadd.f32 %v2803_v57, %v1702_v52 }
 0x259   : > { %v1726_v59 = vmax.f32 %v1703_v56, 0.0 }
 0x25b   : > { %1743 = vst.msk [vmem:[%s2809_s17 + $0x58] sm:$0xff] %vm1731_vm8, %v1726_v59 }
 0x25e   : > { %v1705_v58 = vpop.f32.mrf.mxu1 }
 0x25f   : > { %v1706_v50 = vadd.f32 %v2803_v57, %v1705_v58 }
 0x261   : > { %v1727_v33 = vmax.f32 %v1706_v50, 0.0 }
 0x263   : > { %1744 = vst.msk [vmem:[%s2809_s17 + $0x60] sm:$0xff] %vm1731_vm8, %v1727_v33 }
 0x266   : > { %v1707_v20 = vpop.f32.mrf.mxu1 }
 0x267   : > { %v1708_v54 = vadd.f32 %v2803_v57, %v1707_v20 }
 0x269   : > { %v1728_v25 = vmax.f32 %v1708_v54, 0.0 }
 0x26b   : > { %1745 = vst.msk [vmem:[%s2809_s17 + $0x68] sm:$0xff] %vm1731_vm8, %v1728_v25 }
 0x26e   : > { %v1710_v32 = vpop.f32.mrf.mxu1 }
 0x26f   : > { %v1711_v45 = vadd.f32 %v2803_v57, %v1710_v32 }
 0x271   : > { %v1729_v2 = vmax.f32 %v1711_v45, 0.0 }
 0x273   : > { %1746 = vst.msk [vmem:[%s2809_s17 + $0x70] sm:$0xff] %vm1731_vm8, %v1729_v2 }
 0x276   : > { %v1712_v19 = vpop.f32.mrf.mxu1 }
 0x277   : > { %v1713_v35 = vadd.f32 %v2803_v57, %v1712_v19 }
 0x279   : > { %v1730_v48 = vmax.f32 %v1713_v35, 0.0 }
 0x27b   : > { %1747 = vst.msk [vmem:[%s2809_s17 + $0x78] sm:$0xff] %vm1731_vm8, %v1730_v48 }
 0x27c PF: > { %s16_s25 = sadd.s32 1, %s2101_s25   ;;  %s2884_s21 = smov %s2093_s23 }
 0x27d   : > { %p13_p9 = scmp.ge.s32.totalorder %s16_s25, 6   ;;  %s2885_s22 = smov %s2097_s24 }
 0x27e   : > { %s2886_s23 = smov %s2889_s26  ;;  %s2887_s24 = smov %s2893_s27 }
 0x27f   :  { %15 = sbr.rel (!%p13_p9) target bundleno = 3 (0x3), region = 85 }

// kernel: reverse.1
= control target key start
LH: loop header
LB: loop body
LE: loop exit
PB: predicated region body
PF: predicated region fallthrough
CT: control target
= control target key end

     0   :  { %v72_v3 = vlaneseq  ;;  %v65_v6 = vld [vmem:[#allocation0 + $0x7] ss:$-1 sm:$0xff]  ;;  %v79_v8 = vld [vmem:[#allocation0 + $0x17] ss:$-1 sm:$0xff]  ;;  %s331_s0 = inlined_call_operand.vmem [shape: f32[2,4,16,7], index: 0, kind: input, shape index: {}]   ;;  %s332_s1 = inlined_call_operand.vmem [shape: f32[2,4,16,7], index: 1, kind: output, shape index: {}]  }
   0x1   :  { %v45_v0 = vld [vmem:[%s331_s0] sm:$0xff]  ;;  %v47_v1 = vld [vmem:[%s331_s0 + $0x8] sm:$0xff]  ;;  %v49_v2 = vld [vmem:[%s331_s0 + $0x10] sm:$0xff]  ;;  %v66_v12 = vrot.slane %v65_v6, 1  ;;  %v80_v13 = vrot.slane %v79_v8, 1 }
   0x2   :  { %46 = vst [vmem:[#allocation0 + $0x8] sm:$0xff] %v45_v0  ;;  %v51_v4 = vld [vmem:[%s331_s0 + $0x18] sm:$0xff]  ;;  %v53_v5 = vld [vmem:[%s331_s0 + $0x20] sm:$0xff]  ;;  %v55_v7 = vld [vmem:[%s331_s0 + $0x28] sm:$0xff]  ;;  %v73_v10 = vshrl.u32 %v72_v3, 7 }
   0x3   :  { %48 = vst [vmem:[#allocation0 + $0x18] sm:$0xff] %v47_v1  ;;  %v57_v9 = vld [vmem:[%s331_s0 + $0x30] sm:$0xff]  ;;  %v59_v11 = vld [vmem:[%s331_s0 + $0x38] sm:$0xff]  ;;  %v93_v14 = vld [vmem:[#allocation0 + $0x27] ss:$-1 sm:$0xff] }
   0x4   :  { %50 = vst [vmem:[#allocation0 + $0x28] sm:$0xff] %v49_v2  ;;  %vm74_vm0 = vcmp.lt.s32.totalorder %v73_v10, 7  ;;  %v107_v16 = vld [vmem:[#allocation0 + $0x37] ss:$-1 sm:$0xff]  ;;  %v94_v19 = vrot.slane %v93_v14, 1 }
   0x5   :  { %52 = vst [vmem:[#allocation0 + $0x38] sm:$0xff] %v51_v4  ;;  %v121_v22 = vld [vmem:[#allocation0 + $0x47] ss:$-1 sm:$0xff]  ;;  %v108_v24 = vrot.slane %v107_v16, 1  ;;  %v135_v28 = vld [vmem:[#allocation0 + $0x57] ss:$-1 sm:$0xff] }
   0x6   :  { %54 = vst [vmem:[#allocation0 + $0x48] sm:$0xff] %v53_v5  ;;  %v122_v29 = vrot.slane %v121_v22, 1  ;;  %v149_v32 = vld [vmem:[#allocation0 + $0x67] ss:$-1 sm:$0xff]  ;;  %v136_v33 = vrot.slane %v135_v28, 1 }
   0x7   :  { %56 = vst [vmem:[#allocation0 + $0x58] sm:$0xff] %v55_v7  ;;  %v163_v36 = vld [vmem:[#allocation0 + $0x77] ss:$-1 sm:$0xff]  ;;  %v150_v37 = vrot.slane %v149_v32, 1 }
   0x8   :  { %58 = vst [vmem:[#allocation0 + $0x68] sm:$0xff] %v57_v9  ;;  %v164_v40 = vrot.slane %v163_v36, 1 }
   0x9   :  { %60 = vst [vmem:[#allocation0 + $0x78] sm:$0xff] %v59_v11  ;;  %v70_v15 = vld [vmem:[#allocation0 + $0xf] ss:$-1 sm:$0xff] }
   0xa   :  { %67 = vst [vmem:[#allocation1] sm:$0xff] %v66_v12  ;;  %v71_v17 = vrot.slane %v70_v15, 1  ;;  %v84_v18 = vld [vmem:[#allocation0 + $0x1f] ss:$-1 sm:$0xff] }
   0xb   :  { %81 = vst [vmem:[#allocation1 + $0x8] sm:$0xff] %v80_v13  ;;  %v85_v20 = vrot.slane %v84_v18, 1  ;;  %v98_v21 = vld [vmem:[#allocation0 + $0x2f] ss:$-1 sm:$0xff] }
   0xc   :  { %75 = vst.msk [vmem:[#allocation1] sm:$0xff] %vm74_vm0, %v71_v17  ;;  %v99_v23 = vrot.slane %v98_v21, 1  ;;  %v112_v25 = vld [vmem:[#allocation0 + $0x3f] ss:$-1 sm:$0xff] }
   0xd   :  { %89 = vst.msk [vmem:[#allocation1 + $0x8] sm:$0xff] %vm74_vm0, %v85_v20  ;;  %v113_v26 = vrot.slane %v112_v25, 1  ;;  %v126_v27 = vld [vmem:[#allocation0 + $0x4f] ss:$-1 sm:$0xff] }
   0xe   :  { %95 = vst [vmem:[#allocation1 + $0x10] sm:$0xff] %v94_v19  ;;  %v140_v30 = vld [vmem:[#allocation0 + $0x5f] ss:$-1 sm:$0xff]  ;;  %v127_v31 = vrot.slane %v126_v27, 1 }
   0xf   :  { %103 = vst.msk [vmem:[#allocation1 + $0x10] sm:$0xff] %vm74_vm0, %v99_v23  ;;  %v154_v34 = vld [vmem:[#allocation0 + $0x6f] ss:$-1 sm:$0xff]  ;;  %v141_v35 = vrot.slane %v140_v30, 1 }
  0x10   :  { %109 = vst [vmem:[#allocation1 + $0x18] sm:$0xff] %v108_v24  ;;  %v168_v38 = vld [vmem:[#allocation0 + $0x7f] ss:$-1 sm:$0xff]  ;;  %v155_v39 = vrot.slane %v154_v34, 1 }
  0x11   :  { %117 = vst.msk [vmem:[#allocation1 + $0x18] sm:$0xff] %vm74_vm0, %v113_v26  ;;  %v169_v41 = vrot.slane %v168_v38, 1 }
  0x12   :  { %123 = vst [vmem:[#allocation1 + $0x20] sm:$0xff] %v122_v29 }
  0x13   :  { %131 = vst.msk [vmem:[#allocation1 + $0x20] sm:$0xff] %vm74_vm0, %v127_v31  ;;  %v216_v42 = vld [vmem:[#allocation1] sm:$0xff] }
  0x14   :  { %137 = vst [vmem:[#allocation1 + $0x28] sm:$0xff] %v136_v33  ;;  %v218_v43 = vld [vmem:[#allocation1 + $0x8] sm:$0xff] }
  0x15   :  { %145 = vst.msk [vmem:[#allocation1 + $0x28] sm:$0xff] %vm74_vm0, %v141_v35 }
  0x16   :  { %151 = vst [vmem:[#allocation1 + $0x30] sm:$0xff] %v150_v37  ;;  %v220_v44 = vld [vmem:[#allocation1 + $0x10] sm:$0xff] }
  0x17   :  { %159 = vst.msk [vmem:[#allocation1 + $0x30] sm:$0xff] %vm74_vm0, %v155_v39 }
  0x18   :  { %165 = vst [vmem:[#allocation1 + $0x38] sm:$0xff] %v164_v40  ;;  %v222_v45 = vld [vmem:[#allocation1 + $0x18] sm:$0xff] }
  0x19   :  { %173 = vst.msk [vmem:[#allocation1 + $0x38] sm:$0xff] %vm74_vm0, %v169_v41 }
  0x1a   :  { %217 = vst [vmem:[%s332_s1] sm:$0xff] %v216_v42  ;;  %v224_v46 = vld [vmem:[#allocation1 + $0x20] sm:$0xff] }
  0x1b   :  { %219 = vst [vmem:[%s332_s1 + $0x8] sm:$0xff] %v218_v43 }
  0x1c   :  { %221 = vst [vmem:[%s332_s1 + $0x10] sm:$0xff] %v220_v44  ;;  %v226_v47 = vld [vmem:[#allocation1 + $0x28] sm:$0xff] }
  0x1d   :  { %223 = vst [vmem:[%s332_s1 + $0x18] sm:$0xff] %v222_v45 }
  0x1e   :  { %225 = vst [vmem:[%s332_s1 + $0x20] sm:$0xff] %v224_v46  ;;  %v228_v48 = vld [vmem:[#allocation1 + $0x30] sm:$0xff] }
  0x1f   :  { %227 = vst [vmem:[%s332_s1 + $0x28] sm:$0xff] %v226_v47 }
  0x20   :  { %229 = vst [vmem:[%s332_s1 + $0x30] sm:$0xff] %v228_v48  ;;  %v230_v49 = vld [vmem:[#allocation1 + $0x38] sm:$0xff] }
  0x21   :  { %231 = vst [vmem:[%s332_s1 + $0x38] sm:$0xff] %v230_v49 }

// kernel: codem2_forward.3
= control target key start
LH: loop header
LB: loop body
LE: loop exit
PB: predicated region body
PF: predicated region fallthrough
CT: control target
= control target key end

     0   :  { %s1763_s18 = smov 0   ;;  %s1765_s19 = smov 0   ;;  %s2565_s0 = inlined_call_operand.vmem [shape: bf16[2,18,18,8], index: 0, kind: input, shape index: {}, may-alias: {0,1}]   ;;  %s2566_s1 = inlined_call_operand.vmem [shape: bf16[2,18,18,8], index: 1, kind: input, shape index: {}, may-alias: {0,1}]   ;;  %s2567_s2 = inlined_call_operand.vmem [shape: f32[2,16,16,4], index: 2, kind: input, shape index: {}]   ;;  %s2568_s3 = inlined_call_operand.vmem [shape: bf16[4,4], index: 3, kind: input, shape index: {}]   ;;  %s2569_s4 = inlined_call_operand.vmem [shape: f32[1,4], index: 4, kind: input, shape index: {}]   ;;  %s2570_s5 = inlined_call_operand.vmem [shape: f32[2,16,16,4], index: 5, kind: output, shape index: {}]  }
   0x1   :  { %s1767_s20 = smov 0   ;;  %s1769_s21 = smov 0  }
   0x2   :  { %s1771_s22 = smov 0  }
   0x3 LB: > { %s24_s23 = sadd.s32 1, %s1722_s20  ;;  %s27_s24 = sadd.s32 1, %s1726_s21  ;;  %s1730_s22 = sphi %s1771_s22, %s15_s22   ;;  %s1726_s21 = sphi %s1769_s21, %s2668_s21   ;;  %s1722_s20 = sphi %s1767_s20, %s2667_s20   ;;  %s1718_s19 = sphi %s1765_s19, %s2666_s19   ;;  %s1714_s18 = sphi %s1763_s18, %s2665_s18  }
   0x4   : > { %p25_p0 = scmp.ge.s32.totalorder %s24_s23, 2  ;;  %p1454_p1 = scmp.ge.s32.totalorder %s1730_s22, 1 }
   0x5   : > { %p263_p2 = scmp.lt.s32.totalorder %s1730_s22, 5 }
   0x6   : > { %s2670_s23 = smov (%p25_p0, %s24_s23), 0  ;;  %s2672_s24 = smov (!%p25_p0, %s27_s24), %s1726_s21 }
   0x7   : > { %p264_p3 = pnand %p1454_p1, %p263_p2  ;;  %p29_p4 = scmp.ge.s32.totalorder %s2672_s24, 2 }
   0x9   : > { %s2674_s24 = smov (%p29_p4, %s2672_s24), 0  ;;  %267 = sbr.rel (%p264_p3) target bundleno = 412 (0x19c), region = 40 }
   0xe   : > { %s1793_s25 = sshll.u32 %s1714_s18, 3  ;;  %p334_p5 = scmp.lt.s32.totalorder %s1718_s19, 1  ;;  %vm657_vm0 = vcmask 1046528   ;;  %vm748_vm1 = vcmask 1045504   ;;  %vm1094_vm2 = vcmask 1041408   ;;  %vm903_vm3 = vcmask 1040384  }
   0xf   : > { %p336_p6 = scmp.lt.s32.totalorder %s1793_s25, 17  ;;  %s1506_s28 = sadd.s32 8, %s1793_s25  ;;  %vm1069_vm4 = vcmask 31744  }
  0x10   : > { %s2676_s19 = smov (!%p334_p5, %s1718_s19), 1  ;;  %p354_p7 = scmp.lt.s32.totalorder %s1506_s28, 17 }
  0x11   : > { %s337_s26 = scalar_select %p336_p6, %s1793_s25, 17 }
  0x12   : > { %s1514_s27 = smul.u32 54, %s2676_s19  ;;  %s2678_s28 = smov (!%p354_p7, %s1506_s28), 17 }
  0x13   : > { %s1513_s29 = smul.u32 3, %s337_s26  ;;  %s1732_s12 = smov 124  }
  0x14   : > { %s1515_s10 = smul.u32 3, %s2678_s28  ;;  %p367_p8 = scmp.lt.s32.totalorder %s1793_s25, 15 }
  0x15   : > { %s340_s30 = sadd.s32 %s1514_s27, %s1513_s29  ;;  %s1462_s29 = sshll.u32 %s2676_s19, 5 }
  0x16   : > { %s1456_s6 = sshll.u32 %s340_s30, 2  ;;  %s358_s11 = sadd.s32 %s1515_s10, %s1514_s27 }
  0x17   : > { %s1804_s9 = scalar_lea.vmem %s2565_s0, %s1456_s6  ;;  %s1459_s13 = sshll.u32 %s358_s11, 2 }
  0x18   : > { %v1807_v0 = vld [vmem:[%s1804_s9 + $0x3c] sm:$0xff]   ;;  %v1810_v1 = vld [vmem:[%s1804_s9 + $0x44] sm:$0x1]  ;;  %v1813_v2 = vld [vmem:[%s1804_s9 + $0x30] sm:$0xff]   ;;  %s1858_s16 = scalar_lea.vmem %s2566_s1, %s1459_s13  ;;  %s2680_s25 = smov (!%p367_p8, %s1793_s25), 15 }
  0x19   : > { %v433_v3 = vunpack.c.h.bf16 %v1807_v0  ;;  %v434_v4 = vunpack.c.l.bf16 %v1810_v1  ;;  %v1495_v5 = vunpack.c.l.bf16 %v1813_v2  ;;  %v1496_v6 = vunpack.c.h.bf16 %v1813_v2  ;;  %v1820_v7 = vld [vmem:[%s1804_s9 + $0x48] sm:$0xff]   ;;  %v1823_v8 = vld [vmem:[%s1804_s9 + $0x50] sm:$0x1]  ;;  %v1826_v9 = vld [vmem:[%s1804_s9 + $0x38] sm:$0x1]  ;;  %s1461_s28 = sshll.u32 %s2680_s25, 1 }
  0x1a   : > { %v1829_v10 = vld [vmem:[%s1804_s9 + $0x54] sm:$0xff]   ;;  %v437_v13 = vunpack.c.l.bf16 %v1823_v8  ;;  %v1499_v15 = vunpack.c.l.bf16 %v1820_v7  ;;  %v1843_v16 = vld [vmem:[%s1804_s9 + $0x5c] sm:$0x1]  ;;  %v1500_v17 = vunpack.c.h.bf16 %v1820_v7  ;;  %v431_v18 = vunpack.c.l.bf16 %v1826_v9  ;;  %v1871_v25 = vld [vmem:[%s1858_s16] sm:$0xff]   ;;  %s2443_s30 = sadd.s32 %s1462_s29, %s1461_s28 }
  0x1b   : > { %v1567_v11 = vpack.i.bf16 %v434_v4, %v433_v3  ;;  %v1557_v12 = vpack.i.bf16 %v1496_v6, %v1495_v5  ;;  %v438_v14 = vunpack.c.l.bf16 %v1829_v10  ;;  %v432_v19 = vunpack.c.l.bf16 %v1807_v0  ;;  %v1874_v26 = vld [vmem:[%s1804_s9] sm:$0xff]   ;;  %v1877_v27 = vld [vmem:[%s1858_s16 + $0x8] sm:$0x1]  ;;  %v1904_v38 = vld [vmem:[%s1804_s9 + $0xc] sm:$0xff]   ;;  %s1463_s19 = sshll.u32 %s2443_s30, 3 }
  0x1c   : > { %v439_v21 = vunpack.c.h.bf16 %v1829_v10  ;;  %v440_v22 = vunpack.c.l.bf16 %v1843_v16  ;;  %v1572_v23 = vpack.i.bf16 %v1500_v17, %v1499_v15  ;;  %v1884_v29 = vld [vmem:[%s1804_s9 + $0x8] sm:$0x1]  ;;  %v2586_v30 = vunpack.c.l.bf16 %v1871_v25  ;;  %v1907_v39 = vld [vmem:[%s1804_s9 + $0x14] sm:$0x1]  ;;  %v1910_v40 = vld [vmem:[%s1804_s9 + $0x18] sm:$0xff]   ;;  %s2453_s7 = scalar_lea.vmem %s2567_s2, %s1463_s19  ;;  %s2466_s10 = scalar_lea.vmem %s2570_s5, %s1463_s19 }
  0x1d   : > { %1568 = vrot.lane.b32.xlu1 %v1567_v11, %s1732_s12  ;;  %1558 = vrot.lane.b32.xlu0 %v1557_v12, %s1732_s12  ;;  %v1577_v20 = vpack.i.bf16 %v438_v14, %v437_v13  ;;  %v1562_v24 = vpack.i.bf16 %v432_v19, %v431_v18  ;;  %v1504_v31 = vunpack.c.h.bf16 %v1871_v25  ;;  %v2585_v32 = vunpack.c.l.bf16 %v1874_v26  ;;  %v1917_v42 = vld [vmem:[%s1804_s9 + $0x20] sm:$0x1]  ;;  %v1937_v51 = vld [vmem:[%s1804_s9 + $0x24] sm:$0xff]  }
  0x1e   : > { %v1582_v28 = vpack.i.bf16 %v440_v22, %v439_v21  ;;  %v2583_v33 = vunpack.c.l.bf16 %v1877_v27  ;;  %v1488_v34 = vunpack.c.h.bf16 %v1874_v26  ;;  %v419_v35 = vunpack.c.l.bf16 %v1884_v29  ;;  %v1944_v53 = vld [vmem:[%s1858_s16 + $0xc] sm:$0xff]   ;;  %v1970_v62 = vld [vmem:[%s1858_s16 + $0x14] sm:$0x1] }
  0x1f   : > { %1578 = vrot.lane.b32.xlu2 %v1577_v20, %s1732_s12  ;;  %v1587_v36 = vpack.i.bf16 %v1504_v31, %v2586_v30  ;;  %v2577_v43 = vunpack.c.l.bf16 %v1904_v38  ;;  %v2578_v44 = vunpack.c.h.bf16 %v1904_v38  ;;  %v2576_v45 = vunpack.c.l.bf16 %v1910_v40  ;;  %v1951_v56 = vld [vmem:[%s1804_s9 + $0x2c] sm:$0x1] }
  0x20   : > { %v1592_v37 = vpack.i.bf16 %v2585_v32, %v2583_v33  ;;  %v1597_v41 = vpack.i.bf16 %v419_v35, %v1488_v34  ;;  %v2575_v46 = vunpack.c.l.bf16 %v1907_v39  ;;  %v1492_v47 = vunpack.c.h.bf16 %v1910_v40 }
  0x21   : > { %v425_v48 = vunpack.c.l.bf16 %v1917_v42  ;;  %v1602_v49 = vpack.i.bf16 %v2578_v44, %v2577_v43  ;;  %v2573_v54 = vunpack.c.l.bf16 %v1937_v51  ;;  %v2574_v55 = vunpack.c.h.bf16 %v1937_v51 }
  0x22   : > { %v1607_v50 = vpack.i.bf16 %v2576_v45, %v2575_v46  ;;  %v2581_v57 = vunpack.c.l.bf16 %v1944_v53  ;;  %v2582_v58 = vunpack.c.h.bf16 %v1944_v53  ;;  %v2572_v60 = vunpack.c.l.bf16 %v1951_v56 }
  0x23   : > { %v1612_v52 = vpack.i.bf16 %v425_v48, %v1492_v47  ;;  %v1617_v59 = vpack.i.bf16 %v2574_v55, %v2573_v54  ;;  %v2571_v63 = vunpack.c.l.bf16 %v1970_v62 }
  0x24   : > { %v1622_v61 = vpack.i.bf16 %v2582_v58, %v2581_v57 }
  0x25   : > { %1573 = vrot.lane.b32.xlu1 %v1572_v23, %s1732_s12  ;;  %1563 = vrot.lane.b32.xlu0 %v1562_v24, %s1732_s12 }
  0x27   : > { %1583 = vrot.lane.b32.xlu2 %v1582_v28, %s1732_s12 }
  0x2d   : > { %1588 = vrot.lane.b32.xlu0 %v1587_v36, %s1732_s12  ;;  %1593 = vrot.lane.b32.xlu1 %v1592_v37, %s1732_s12 }
  0x2f   : > { %1598 = vrot.lane.b32.xlu2 %v1597_v41, %s1732_s12 }
  0x35   : > { %1603 = vrot.lane.b32.xlu0 %v1602_v49, %s1732_s12  ;;  %1608 = vrot.lane.b32.xlu1 %v1607_v50, %s1732_s12 }
  0x37   : > { %1613 = vrot.lane.b32.xlu2 %v1612_v52, %s1732_s12 }
  0x3d   : > { %1618 = vrot.lane.b32.xlu0 %v1617_v59, %s1732_s12  ;;  %499 = vrot.lane.b32.xlu1 %v2572_v60, %s1732_s12 }
  0x3f   : > { %1623 = vrot.lane.b32.xlu2 %v1622_v61, %s1732_s12 }
  0x45   : > { %535 = vrot.lane.b32.xlu0 %v2571_v63, %s1732_s12 }
  0x79   : > { %v1579_v11 = vpop.permute.xlu2 %1578 }
  0x7a   : > { %v1581_v12 = vunpack.i.h.bf16 %v1579_v11  ;;  %v1580_v24 = vunpack.i.l.bf16 %v1579_v11 }
  0x7c   : > { %v588_v20 = vsub.f32 %v438_v14, %v1581_v12  ;;  %v587_v50 = vsub.f32 %v437_v13, %v1580_v24 }
  0x7e   : > { %v1979_v37 = vand.u32 2147483647, %v588_v20  ;;  %v1993_v12 = vand.u32 2147483647, %v587_v50 }
  0x80   : > { %v693_v14 = vrot.slane %v1979_v37, 1 }
  0x81   : > { %v1584_v23 = vpop.permute.xlu2 %1583 }
  0x82   : > { %v1586_v28 = vunpack.i.h.bf16 %v1584_v23  ;;  %v1585_v36 = vunpack.i.l.bf16 %v1584_v23 }
  0x84   : > { %v590_v41 = vsub.f32 %v440_v22, %v1586_v28  ;;  %v589_v49 = vsub.f32 %v439_v21, %v1585_v36  ;;  %v784_v21 = vrot.slane %v1979_v37, 2  ;;  %v691_v28 = vrot.slane %v1993_v12, 1 }
  0x86   : > { %v1987_v52 = vand.u32 2147483647, %v590_v41  ;;  %v1989_v59 = vand.u32 2147483647, %v589_v49  ;;  %v782_v41 = vrot.slane %v1993_v12, 2 }
  0x88   : > { %v694_v61 = vrot.slane %v1989_v59, 1  ;;  %v696_v16 = vrot.slane %v1987_v52, 1  ;;  %v787_v13 = vrot.slane %v1987_v52, 2  ;;  %v785_v20 = vrot.slane %v1989_v59, 2 }
  0x89   : > { %v1599_v11 = vpop.permute.xlu2 %1598 }
  0x8a   : > { %v1601_v22 = vunpack.i.h.bf16 %v1599_v11  ;;  %v1600_v10 = vunpack.i.l.bf16 %v1599_v11  ;;  %v1998_v8 = vsel %vm657_vm0, %v693_v14, %v694_v61  ;;  %v2008_v36 = vsel %vm657_vm0, %v694_v61, %v696_v16 }
  0x8b   : > { %2616 = vst [vmem:[#allocation2_spill] sm:$0xff] %v1998_v8  ;;  %v742_v49 = vadd.f32 %v1998_v8, %v1979_v37  ;;  %v786_v61 = vsel %vm748_vm1, %v784_v21, %v785_v20  ;;  %v788_v16 = vsel %vm748_vm1, %v785_v20, %v787_v13 }
  0x8c   : > { %v569_v23 = vsub.f32 %v419_v35, %v1601_v22  ;;  %v568_v24 = vsub.f32 %v1488_v34, %v1600_v10  ;;  %2617 = vst [vmem:[#allocation3_spill] sm:$0xff] %v2008_v36  ;;  %v743_v10 = vadd.f32 %v2008_v36, %v1989_v59 }
  0x8d   : > { %v2028_v13 = vadd.f32 %v786_v61, %v742_v49 }
  0x8e   : > { %v599_v11 = vand.u32 2147483647, %v569_v23  ;;  %v2013_v63 = vand.u32 2147483647, %v568_v24 }
  0x8f   : > { %v1569_v50 = vpop.permute.xlu1 %1568  ;;  %v1559_v14 = vpop.permute.xlu0 %1558 }
  0x90   : > { %v1571_v29 = vunpack.i.h.bf16 %v1569_v50  ;;  %v1570_v35 = vunpack.i.l.bf16 %v1569_v50  ;;  %v1561_v22 = vunpack.i.h.bf16 %v1559_v14  ;;  %v1560_v34 = vunpack.i.l.bf16 %v1559_v14 }
  0x91   : > { %v661_v60 = vrot.slane %v599_v11, 1  ;;  %v1614_v14 = vpop.permute.xlu2 %1613  ;;  %v752_v55 = vrot.slane %v599_v11, 2  ;;  %v2580_v46 = vrot.slane %v2013_v63, 1 }
  0x92   : > { %v584_v54 = vsub.f32 %v434_v4, %v1571_v29  ;;  %v583_v23 = vsub.f32 %v433_v3, %v1570_v35  ;;  %v580_v24 = vsub.f32 %v1496_v6, %v1561_v22  ;;  %v579_v50 = vsub.f32 %v1495_v5, %v1560_v34 }
  0x93   : > { %v1616_v21 = vunpack.i.h.bf16 %v1614_v14  ;;  %v1615_v45 = vunpack.i.l.bf16 %v1614_v14  ;;  %v2036_v3 = vadd.f32 %v788_v16, %v743_v10  ;;  %v662_v2 = vsel %vm657_vm0, %v2580_v46, %v661_v60 }
  0x94   : > { %v2030_v20 = vand.u32 2147483647, %v584_v54  ;;  %v2032_v1 = vand.u32 2147483647, %v583_v23  ;;  %v2034_v4 = vand.u32 2147483647, %v580_v24  ;;  %v729_v23 = vadd.f32 %v662_v2, %v2013_v63 }
  0x95   : > { %v2038_v6 = vand.u32 2147483647, %v579_v50  ;;  %v2579_v5 = vrot.slane %v2013_v63, 2  ;;  %v575_v61 = vsub.f32 %v425_v48, %v1616_v21  ;;  %v574_v60 = vsub.f32 %v1492_v47, %v1615_v45 }
  0x96   : > { %v686_v11 = vrot.slane %v2030_v20, 1  ;;  %v777_v49 = vrot.slane %v2030_v20, 2  ;;  %v684_v54 = vrot.slane %v2032_v1, 1  ;;  %v775_v29 = vrot.slane %v2032_v1, 2 }
  0x97   : > { %v679_v35 = vrot.slane %v2034_v4, 1  ;;  %v678_v22 = vrot.slane %v2038_v6, 1  ;;  %v1574_v34 = vpop.permute.xlu1 %1573  ;;  %v1564_v10 = vpop.permute.xlu0 %1563  ;;  %v753_v24 = vsel %vm748_vm1, %v2579_v5, %v752_v55  ;;  %v770_v14 = vrot.slane %v2034_v4, 2 }
  0x98   : > { %v2055_v16 = vsel %vm657_vm0, %v684_v54, %v686_v11  ;;  %v1576_v50 = vunpack.i.h.bf16 %v1574_v34  ;;  %v769_v42 = vrot.slane %v2038_v6, 2  ;;  %v1575_v48 = vunpack.i.l.bf16 %v1574_v34 }
  0x99   : > { %2618 = vst [vmem:[#allocation4_spill] sm:$0xff] %v2055_v16  ;;  %v2063_v43 = vsel %vm657_vm0, %v678_v22, %v679_v35  ;;  %v778_v45 = vsel %vm748_vm1, %v775_v29, %v777_v49  ;;  %v1566_v21 = vunpack.i.h.bf16 %v1564_v10  ;;  %v1565_v2 = vunpack.i.l.bf16 %v1564_v10 }
  0x9a   : > { %2619 = vst [vmem:[#allocation5_spill] sm:$0xff] %v2063_v43  ;;  %v586_v47 = vsub.f32 %v1500_v17, %v1576_v50  ;;  %v739_v11 = vadd.f32 %v2055_v16, %v2032_v1  ;;  %v585_v55 = vsub.f32 %v1499_v15, %v1575_v48  ;;  %v2073_v44 = vand.u32 2147483647, %v575_v61 }
  0x9b   : > { %v2075_v22 = vand.u32 2147483647, %v574_v60  ;;  %v736_v34 = vadd.f32 %v2063_v43, %v2038_v6  ;;  %v582_v17 = vsub.f32 %v432_v19, %v1566_v21  ;;  %v581_v49 = vsub.f32 %v431_v18, %v1565_v2 }
  0x9c   : > { %v2079_v5 = vand.u32 2147483647, %v586_v47  ;;  %v771_v10 = vsel %vm748_vm1, %v769_v42, %v770_v14  ;;  %v2086_v50 = vadd.f32 %v753_v24, %v729_v23  ;;  %v2088_v7 = vand.u32 2147483647, %v585_v55 }
  0x9d   : > { %v671_v15 = vrot.slane %v2073_v44, 1  ;;  %v2092_v60 = vand.u32 2147483647, %v582_v17  ;;  %v2094_v48 = vand.u32 2147483647, %v581_v49  ;;  %v2584_v0 = vrot.slane %v2075_v22, 1 }
  0x9e   : > { %v689_v61 = vrot.slane %v2079_v5, 1  ;;  %v2097_v19 = vadd.f32 %v778_v45, %v739_v11  ;;  %v780_v9 = vrot.slane %v2079_v5, 2  ;;  %v688_v18 = vrot.slane %v2088_v7, 1 }
  0x9f   : > { %v779_v23 = vrot.slane %v2088_v7, 2  ;;  %v1589_v24 = vpop.permute.xlu0 %1588  ;;  %v2102_v42 = vadd.f32 %v771_v10, %v736_v34  ;;  %v683_v21 = vrot.slane %v2092_v60, 1  ;;  %v774_v2 = vrot.slane %v2092_v60, 2  ;;  %v1594_v46 = vpop.permute.xlu1 %1593 }
  0xa0   : > { %v2107_v47 = vsel %vm657_vm0, %v689_v61, %v691_v28  ;;  %v2114_v11 = vsel %vm657_vm0, %v688_v18, %v689_v61  ;;  %v681_v55 = vrot.slane %v2094_v48, 1  ;;  %v762_v34 = vrot.slane %v2073_v44, 2 }
  0xa1   : > { %2620 = vst [vmem:[#allocation6_spill] sm:$0xff] %v2107_v47  ;;  %v741_v45 = vadd.f32 %v2107_v47, %v2079_v5  ;;  %v740_v17 = vadd.f32 %v2114_v11, %v2088_v7  ;;  %v781_v28 = vsel %vm748_vm1, %v779_v23, %v780_v9  ;;  %v2122_v49 = vsel %vm657_vm0, %v683_v21, %v684_v54  ;;  %v1624_v23 = vpop.permute.xlu2 %1623 }
  0xa2   : > { %2621 = vst [vmem:[#allocation7_spill] sm:$0xff] %v2114_v11  ;;  %v2127_v10 = vsel %vm657_vm0, %v2584_v0, %v671_v15  ;;  %v783_v61 = vsel %vm748_vm1, %v780_v9, %v782_v41  ;;  %v776_v18 = vsel %vm748_vm1, %v774_v2, %v775_v29  ;;  %v772_v57 = vrot.slane %v2094_v48, 2 }
  0xa3   : > { %2622 = vst [vmem:[#allocation8_spill] sm:$0xff] %v2127_v10  ;;  %v2593_v58 = vrot.slane %v2075_v22, 2  ;;  %v2135_v33 = vadd.f32 %v783_v61, %v741_v45  ;;  %v738_v54 = vadd.f32 %v2122_v49, %v2092_v60  ;;  %v2140_v15 = vsel %vm657_vm0, %v679_v35, %v681_v55 }
  0xa4   : > { %2623 = vst [vmem:[#allocation9_spill] sm:$0xff] %v2140_v15  ;;  %v1591_v21 = vunpack.i.h.bf16 %v1589_v24  ;;  %v2142_v0 = vadd.f32 %v781_v28, %v740_v17  ;;  %v733_v41 = vadd.f32 %v2127_v10, %v2075_v22  ;;  %v1590_v29 = vunpack.i.l.bf16 %v1589_v24 }
  0xa5   : > { %v1596_v9 = vunpack.i.h.bf16 %v1594_v46  ;;  %v1595_v32 = vunpack.i.l.bf16 %v1594_v46  ;;  %v1626_v45 = vunpack.i.h.bf16 %v1624_v23  ;;  %v1625_v61 = vunpack.i.l.bf16 %v1624_v23 }
  0xa6   : > { %v592_v2 = vsub.f32 %v1504_v31, %v1591_v21  ;;  %v2149_v30 = vsel %vm748_vm1, %v770_v14, %v772_v57  ;;  %v763_v35 = vsel %vm748_vm1, %v2593_v58, %v762_v34  ;;  %v2624_v55 = vunpack.c.l.bf16 %v1871_v25 }
  0xa7   : > { %v2625_v28 = vunpack.c.l.bf16 %v1874_v26  ;;  %v1604_v43 = vpop.permute.xlu0 %1603  ;;  %v2626_v31 = vunpack.c.l.bf16 %v1877_v27  ;;  %v2627_v23 = vunpack.c.h.bf16 %v1944_v53  ;;  %v2628_v14 = vunpack.c.l.bf16 %v1944_v53 }
  0xa8   : > { %v591_v17 = vsub.f32 %v2624_v55, %v1590_v29  ;;  %v2158_v10 = vand.u32 2147483647, %v592_v2  ;;  %v1606_v25 = vunpack.i.h.bf16 %v1604_v43  ;;  %v1605_v29 = vunpack.i.l.bf16 %v1604_v43 }
  0xa9   : > { %v567_v24 = vsub.f32 %v2625_v28, %v1596_v9  ;;  %v593_v46 = vsub.f32 %v2626_v31, %v1595_v32  ;;  %v595_v57 = vsub.f32 %v2627_v23, %v1626_v45  ;;  %v594_v21 = vsub.f32 %v2628_v14, %v1625_v61 }
  0xaa   : > { %v2166_v47 = vand.u32 2147483647, %v591_v17  ;;  %v699_v26 = vrot.slane %v2158_v10, 1  ;;  %v790_v9 = vrot.slane %v2158_v10, 2  ;;  %v2176_v61 = vadd.f32 %v776_v18, %v738_v54  ;;  %v1609_v18 = vpop.permute.xlu1 %1608 }
  0xab   : > { %v597_v34 = vand.u32 2147483647, %v567_v24  ;;  %v2170_v2 = vand.u32 2147483647, %v593_v46  ;;  %v2172_v55 = vand.u32 2147483647, %v595_v57  ;;  %v2178_v17 = vadd.f32 %v763_v35, %v733_v41 }
  0xac   : > { %v698_v27 = vrot.slane %v2166_v47, 1  ;;  %v789_v32 = vrot.slane %v2166_v47, 2  ;;  %v737_v28 = vadd.f32 %v2140_v15, %v2034_v4  ;;  %v2630_v31 = vrot.slane %v2013_v63, 1 }
  0xad   : > { %v658_v45 = vrot.slane %v597_v34, 1  ;;  %v749_v53 = vrot.slane %v597_v34, 2  ;;  %v701_v43 = vrot.slane %v2170_v2, 1  ;;  %v792_v23 = vrot.slane %v2170_v2, 2 }
  0xae   : > { %v2184_v24 = vsel %vm657_vm0, %v698_v27, %v699_v26  ;;  %v791_v41 = vsel %vm748_vm1, %v789_v32, %v790_v9  ;;  %v2631_v35 = vrot.slane %v2013_v63, 2  ;;  %v2634_v57 = vunpack.c.l.bf16 %v1904_v38 }
  0xaf   : > { %2629 = vst [vmem:[#allocation10_spill] sm:$0xff] %v2184_v24  ;;  %v660_v46 = vsel %vm657_vm0, %v658_v45, %v2630_v31  ;;  %v744_v54 = vadd.f32 %v2184_v24, %v2166_v47  ;;  %v2199_v58 = vsel %vm657_vm0, %v699_v26, %v701_v43  ;;  %v624_v45 = vand.u32 2147483647, %v594_v21  ;;  %v1619_v43 = vpop.permute.xlu0 %1618 }
  0xb0   : > { %v751_v14 = vsel %vm748_vm1, %v749_v53, %v2631_v35  ;;  %2632 = vst [vmem:[#allocation11_spill] sm:$0xff] %v2199_v58  ;;  %v2633_v31 = vunpack.c.h.bf16 %v1904_v38  ;;  %v570_v36 = vsub.f32 %v2634_v57, %v1605_v29  ;;  %v728_v24 = vadd.f32 %v660_v46, %v597_v34 }
  0xb1   : > { %v2205_v11 = vadd.f32 %v791_v41, %v744_v54  ;;  %v1611_v32 = vunpack.i.h.bf16 %v1609_v18  ;;  %v1610_v8 = vunpack.i.l.bf16 %v1609_v18  ;;  %v793_v63 = vsel %vm748_vm1, %v790_v9, %v792_v23 }
  0xb2   : > { %v571_v15 = vsub.f32 %v2633_v31, %v1606_v25  ;;  %v703_v53 = vrot.slane %v624_v45, 1  ;;  %v794_v35 = vrot.slane %v624_v45, 2  ;;  %v745_v21 = vadd.f32 %v2199_v58, %v2158_v10 }
  0xb3   : > { %v2212_v26 = vand.u32 2147483647, %v570_v36  ;;  %v2635_v38 = vunpack.c.l.bf16 %v1910_v40  ;;  %v2636_v29 = vunpack.c.l.bf16 %v1907_v39  ;;  %v853_v46 = vadd.f32 %v2205_v11, %v2028_v13 }
  0xb4   : > { %v2208_v27 = vand.u32 2147483647, %v571_v15  ;;  %v2637_v9 = vrot.slane %v2172_v55, 1  ;;  %v2638_v23 = vrot.slane %v2172_v55, 2  ;;  %v1621_v31 = vunpack.i.h.bf16 %v1619_v43 }
  0xb5   : > { %v573_v25 = vsub.f32 %v2635_v38, %v1611_v32  ;;  %v572_v34 = vsub.f32 %v2636_v29, %v1610_v8  ;;  %v663_v39 = vrot.slane %v2212_v26, 1  ;;  %v754_v54 = vrot.slane %v2212_v26, 2 }
  0xb6   : > { %v705_v15 = vsel %vm657_vm0, %v703_v53, %v2637_v9  ;;  %v796_v57 = vsel %vm748_vm1, %v794_v35, %v2638_v23  ;;  %v664_v36 = vrot.slane %v2208_v27, 1  ;;  %v755_v40 = vrot.slane %v2208_v27, 2 }
  0xb7   : > { %v746_v18 = vadd.f32 %v705_v15, %v624_v45  ;;  %v2229_v8 = vand.u32 2147483647, %v573_v25  ;;  %v2232_v41 = vand.u32 2147483647, %v572_v34  ;;  %v1620_v32 = vunpack.i.l.bf16 %v1619_v43 }
  0xb8   : > { %v2234_v53 = vadd.f32 %v751_v14, %v728_v24  ;;  %v2237_v35 = vsel %vm657_vm0, %v663_v39, %v664_v36  ;;  %v2240_v29 = vadd.f32 %v793_v63, %v745_v21  ;;  %v2640_v34 = vrot.slane %v2075_v22, 1  ;;  %v500_v21 = vpop.permute.xlu1 %499 }
  0xb9   : > { %v837_v38 = vadd.f32 %v796_v57, %v746_v18  ;;  %2639 = vst [vmem:[#allocation12_spill] sm:$0xff] %v2237_v35  ;;  %v668_v45 = vrot.slane %v2229_v8, 1  ;;  %v759_v9 = vrot.slane %v2229_v8, 2  ;;  %v666_v25 = vrot.slane %v2232_v41, 1  ;;  %v1064_v18 = vld [vmem:[%s2568_s3] sm:$0x3] }
  0xba   : > { %v757_v15 = vrot.slane %v2232_v41, 2  ;;  %v2642_v24 = vunpack.c.h.bf16 %v1937_v51  ;;  %v2643_v23 = vunpack.c.l.bf16 %v1937_v51  ;;  %v2255_v63 = vadd.f32 %v2149_v30, %v737_v28 }
  0xbb   : > { %v2248_v43 = vsel %vm657_vm0, %v668_v45, %v2640_v34  ;;  %v2260_v39 = vadd.f32 %v853_v46, %v837_v38  ;;  %v730_v45 = vadd.f32 %v2237_v35, %v2212_v26  ;;  %v756_v34 = vsel %vm748_vm1, %v754_v54, %v755_v40 }
  0xbc   : > { %2641 = vst [vmem:[#allocation13_spill] sm:$0xff] %v2248_v43  ;;  %v577_v14 = vsub.f32 %v2642_v24, %v1621_v31  ;;  %v576_v57 = vsub.f32 %v2643_v23, %v1620_v32  ;;  %v2266_v31 = vsel %vm657_vm0, %v664_v36, %v666_v25  ;;  %v732_v51 = vadd.f32 %v2248_v43, %v2229_v8 }
  0xbd   : > { %2644 = vst [vmem:[#allocation14_spill] sm:$0xff] %v2266_v31  ;;  %v2645_v30 = vrot.slane %v2075_v22, 2  ;;  %v731_v32 = vadd.f32 %v2266_v31, %v2208_v27  ;;  %v758_v38 = vsel %vm748_vm1, %v755_v40, %v757_v15  ;;  %v2646_v54 = vunpack.c.l.bf16 %v1951_v56 }
  0xbe   : > { %v2275_v46 = vand.u32 2147483647, %v577_v14  ;;  %v2278_v24 = vand.u32 2147483647, %v576_v57  ;;  %v1096_v25 = vsel %vm1094_vm2, %v1064_v18, 0  ;;  %v847_v14 = vadd.f32 %v2176_v61, %v2102_v42 }
  0xbf   : > { %v761_v28 = vsel %vm748_vm1, %v759_v9, %v2645_v30  ;;  %v578_v36 = vsub.f32 %v2646_v54, %v500_v21  ;;  %v2283_v23 = vadd.f32 %v758_v38, %v731_v32  ;;  %1511 = vmatpush.bf16.msra.mxu2 %v1096_v25  ;;  %1512 = vmatpush.bf16.msra.mxu3 %v1096_v25  ;;  %v536_v38 = vpop.permute.xlu0 %535 }
  0xc0   : > { %v674_v58 = vrot.slane %v2275_v46, 1  ;;  %v765_v9 = vrot.slane %v2275_v46, 2  ;;  %v673_v40 = vrot.slane %v2278_v24, 1  ;;  %v764_v15 = vrot.slane %v2278_v24, 2  ;;  %1105 = vmatpush.bf16.msra.mxu0 %v1096_v25  ;;  %1510 = vmatpush.bf16.msra.mxu1 %v1096_v25 }
  0xc1   : > { %v2291_v57 = vand.u32 2147483647, %v578_v36  ;;  %v848_v56 = vadd.f32 %v2097_v19, %v2255_v63  ;;  %v2295_v21 = vadd.f32 %v756_v34, %v730_v45  ;;  %v2297_v18 = vadd.f32 %v761_v28, %v732_v51 }
  0xc2   : > { %v840_v30 = vadd.f32 %v2283_v23, %v2086_v50  ;;  %v863_v32 = vadd.f32 %v847_v14, %v2142_v0  ;;  %v2303_v54 = vsel %vm657_vm0, %v673_v40, %v674_v58  ;;  %v766_v50 = vsel %vm748_vm1, %v764_v15, %v765_v9 }
  0xc3   : > { %v676_v36 = vrot.slane %v2291_v57, 1  ;;  %v767_v43 = vrot.slane %v2291_v57, 2  ;;  %v734_v45 = vadd.f32 %v2303_v54, %v2278_v24  ;;  %v864_v34 = vadd.f32 %v848_v56, %v2135_v33 }
  0xc4   : > { %v856_v25 = vadd.f32 %v840_v30, %v2178_v17  ;;  %v879_v51 = vmul.f32 0.11111111, %v863_v32  ;;  %v2648_v40 = vunpack.c.l.bf16 %v1970_v62  ;;  %v854_v56 = vadd.f32 %v2240_v29, %v2036_v3 }
  0xc5   : > { %v2313_v28 = vsel %vm657_vm0, %v674_v58, %v676_v36  ;;  %v768_v14 = vsel %vm748_vm1, %v765_v9, %v767_v43  ;;  %v880_v35 = vmul.f32 0.11111111, %v864_v34  ;;  %v2324_v32 = vadd.f32 %v766_v50, %v734_v45 }
  0xc6   : > { %2647 = vst [vmem:[#allocation15_spill] sm:$0xff] %v2313_v28  ;;  %v596_v31 = vsub.f32 %v2648_v40, %v536_v38  ;;  %v2318_v16 = vmul.f32 0.11111111, %v856_v25  ;;  %v735_v30 = vadd.f32 %v2313_v28, %v2275_v46  ;;  %v916_v15 = vrot.slane %v879_v51, 7 }
  0xc7   : > { %v851_v43 = vadd.f32 %v2028_v13, %v2142_v0  ;;  %v917_v38 = vrot.slane %v880_v35, 7  ;;  %v839_v36 = vadd.f32 %v2295_v21, %v2234_v53  ;;  %v2649_v53 = vrot.slane %v2172_v55, 1 }
  0xc8   : > { %v626_v58 = vand.u32 2147483647, %v596_v31  ;;  %v905_v62 = vrot.slane %v2318_v16, 7  ;;  %v2329_v9 = vadd.f32 %v768_v14, %v735_v30  ;;  %v964_v25 = vsub.f32 %v2092_v60, %v916_v15 }
  0xc9   : > { %v867_v45 = vadd.f32 %v851_v43, %v2205_v11  ;;  %v918_v51 = vsel %vm903_vm3, %v916_v15, %v917_v38  ;;  %v966_v50 = vsub.f32 %v2030_v20, %v917_v38  ;;  %v852_v16 = vadd.f32 %v2036_v3, %v2135_v33 }
  0xca   : > { %v706_v34 = vrot.slane %v626_v58, 1  ;;  %v797_v40 = vrot.slane %v626_v58, 2  ;;  %v844_v31 = vadd.f32 %v2329_v9, %v2178_v17  ;;  %v965_v35 = vsub.f32 %v2032_v1, %v918_v51 }
  0xcb   : > { %v1020_v14 = vrot.slane %v964_v25, 1  ;;  %v2650_v30 = vrot.slane %v2172_v55, 2  ;;  %v954_v58 = vsub.f32 %v2232_v41, %v905_v62  ;;  %v1023_v43 = vrot.slane %v966_v50, 1 }
  0xcc   : > { %v707_v60 = vsel %vm657_vm0, %v2649_v53, %v706_v34  ;;  %v860_v15 = vadd.f32 %v844_v31, %v2255_v63  ;;  %v1021_v38 = vrot.slane %v965_v35, 1  ;;  %v868_v28 = vadd.f32 %v852_v16, %v2240_v29 }
  0xcd   : > { %v798_v11 = vsel %vm748_vm1, %v2650_v30, %v797_v40  ;;  %v747_v20 = vadd.f32 %v707_v60, %v2172_v55  ;;  %v883_v1 = vmul.f32 0.11111111, %v867_v45  ;;  %v855_v25 = vadd.f32 %v839_v36, %v2297_v18 }
  0xce   : > { %v2353_v51 = vmul.f32 0.11111111, %v860_v15  ;;  %v849_v53 = vadd.f32 %v2142_v0, %v2176_v61  ;;  %v850_v41 = vadd.f32 %v2135_v33, %v2097_v19  ;;  %v1022_v40 = vsel %vm657_vm0, %v1020_v14, %v1021_v38 }
  0xcf   : > { %v838_v34 = vadd.f32 %v798_v11, %v747_v20  ;;  %v1024_v31 = vsel %vm657_vm0, %v1021_v38, %v1023_v43  ;;  %v884_v55 = vmul.f32 0.11111111, %v868_v28  ;;  %v922_v50 = vrot.slane %v883_v1, 7 }
  0xd0   : > { %v911_v29 = vrot.slane %v2353_v51, 7  ;;  %v1060_v45 = vpack.c.bf16 %v1024_v31, %v1022_v40  ;;  %v871_v36 = vmul.f32 0.11111111, %v855_v25  ;;  %v865_v30 = vadd.f32 %v849_v53, %v2028_v13 }
  0xd1   : > { %v870_v16 = vadd.f32 %v854_v56, %v838_v34  ;;  %v923_v35 = vrot.slane %v884_v55, 7  ;;  %v970_v60 = vsub.f32 %v1979_v37, %v922_v50  ;;  %v866_v0 = vadd.f32 %v850_v41, %v2036_v3 }
  0xd2   : > { %v885_v33 = vmul.f32 0.11111111, %v2260_v39  ;;  %1472 = vmatmul.msk.bf16.vlgmr.msra.gmra.mxu2 %vm1069_vm4, %v1060_v45  ;;  %v904_v11 = vrot.slane %v871_v36, 7  ;;  %v843_v28 = vadd.f32 %v2324_v32, %v2297_v18  ;;  %v1003_v15 = vrot.slane %v954_v58, 1 }
  0xd3   : > { %v886_v14 = vmul.f32 0.11111111, %v870_v16  ;;  %v924_v56 = vsel %vm903_vm3, %v922_v50, %v923_v35  ;;  %v972_v43 = vsub.f32 %v1987_v52, %v923_v35  ;;  %v881_v20 = vmul.f32 0.11111111, %v865_v30 }
  0xd4   : > { %v960_v37 = vsub.f32 %v2291_v57, %v911_v29  ;;  %v971_v13 = vsub.f32 %v1989_v59, %v924_v56  ;;  %v1030_v3 = vrot.slane %v970_v60, 1  ;;  %v906_v39 = vsel %vm903_vm3, %v904_v11, %v905_v62 }
  0xd5   : > { %v1033_v38 = vrot.slane %v972_v43, 1  ;;  %v952_v1 = vsub.f32 %v2212_v26, %v904_v11  ;;  %v953_v25 = vsub.f32 %v2208_v27, %v906_v39  ;;  %v882_v51 = vmul.f32 0.11111111, %v866_v0 }
  0xd6   : > { %v926_v34 = vrot.slane %v886_v14, 7  ;;  %v1031_v58 = vrot.slane %v971_v13, 1  ;;  %v919_v53 = vrot.slane %v881_v20, 7  ;;  %v859_v41 = vadd.f32 %v843_v28, %v2102_v42 }
  0xd7   : > { %v1000_v52 = vrot.slane %v952_v1, 1  ;;  %v1001_v40 = vrot.slane %v953_v25, 1  ;;  %v920_v31 = vrot.slane %v882_v51, 7  ;;  %v925_v57 = vrot.slane %v885_v33, 7 }
  0xd8   : > { %v1032_v59 = vsel %vm657_vm0, %v1030_v3, %v1031_v58  ;;  %v1034_v55 = vsel %vm657_vm0, %v1031_v58, %v1033_v38  ;;  %v967_v62 = vsub.f32 %v2088_v7, %v919_v53  ;;  %v875_v50 = vmul.f32 0.11111111, %v859_v41 }
  0xd9   : > { %v1062_v26 = vpack.c.bf16 %v1034_v55, %v1032_v59  ;;  %v1002_v27 = vsel %vm657_vm0, %v1000_v52, %v1001_v40  ;;  %v1004_v45 = vsel %vm657_vm0, %v1001_v40, %v1003_v15  ;;  %v921_v16 = vsel %vm903_vm3, %v919_v53, %v920_v31 }
  0xda   : > { %v1056_v36 = vpack.c.bf16 %v1004_v45, %v1002_v27  ;;  %v968_v35 = vsub.f32 %v2079_v5, %v921_v16  ;;  %v969_v60 = vsub.f32 %v1993_v12, %v920_v31  ;;  %v1025_v30 = vrot.slane %v967_v62, 1 }
  0xdb   : > { %1474 = vmatmul.msk.bf16.vlgmr.msra.gmra.mxu3 %vm1069_vm4, %v1062_v26  ;;  %v910_v0 = vrot.slane %v875_v50, 7  ;;  %v927_v33 = vsel %vm903_vm3, %v925_v57, %v926_v34  ;;  %v975_v7 = vsub.f32 %v2170_v2, %v926_v34  ;;  %v1013_v14 = vrot.slane %v960_v37, 1 }
  0xdc   : > { %1468 = vmatmul.msk.bf16.vlgmr.msra.gmra.mxu0 %vm1069_vm4, %v1056_v36  ;;  %v1026_v11 = vrot.slane %v968_v35, 1  ;;  %v1028_v28 = vrot.slane %v969_v60, 1  ;;  %v974_v15 = vsub.f32 %v2158_v10, %v927_v33  ;;  %v841_v12 = vadd.f32 %v2297_v18, %v2295_v21 }
  0xdd   : > { %v912_v56 = vsel %vm903_vm3, %v910_v0, %v911_v29  ;;  %v958_v5 = vsub.f32 %v2278_v24, %v910_v0  ;;  %v842_v43 = vadd.f32 %v2178_v17, %v2283_v23  ;;  %v973_v13 = vsub.f32 %v2166_v47, %v925_v57 }
  0xde   : > { %v1027_v20 = vsel %vm657_vm0, %v1025_v30, %v1026_v11  ;;  %v1029_v2 = vsel %vm657_vm0, %v1026_v11, %v1028_v28  ;;  %v959_v37 = vsub.f32 %v2275_v46, %v912_v56  ;;  %v1038_v10 = vrot.slane %v975_v7, 1 }
  0xdf   : > { %v1010_v3 = vrot.slane %v958_v5, 1  ;;  %v857_v29 = vadd.f32 %v841_v12, %v2324_v32  ;;  %v858_v24 = vadd.f32 %v842_v43, %v2329_v9  ;;  %v1061_v39 = vpack.c.bf16 %v1029_v2, %v1027_v20 }
  0xe0   : > { %v1011_v38 = vrot.slane %v959_v37, 1  ;;  %v1036_v21 = vrot.slane %v974_v15, 1  ;;  %v845_v17 = vadd.f32 %v2102_v42, %v2324_v32  ;;  %v846_v1 = vadd.f32 %v2255_v63, %v2329_v9 }
  0xe1   : > { %v873_v23 = vmul.f32 0.11111111, %v857_v29  ;;  %v874_v18 = vmul.f32 0.11111111, %v858_v24  ;;  %v1035_v25 = vrot.slane %v973_v13, 1 }
  0xe2   : > { %1473 = vmatmul.msk.bf16.gmra.mxu2 %vm1069_vm4, %v1061_v39  ;;  %v1012_v47 = vsel %vm657_vm0, %v1010_v3, %v1011_v38  ;;  %v1014_v46 = vsel %vm657_vm0, %v1011_v38, %v1013_v14  ;;  %v861_v51 = vadd.f32 %v845_v17, %v2176_v61  ;;  %v862_v41 = vadd.f32 %v846_v1, %v2097_v19 }
  0xe3   : > { %v1058_v34 = vpack.c.bf16 %v1014_v46, %v1012_v47  ;;  %v907_v58 = vrot.slane %v873_v23, 7  ;;  %v908_v53 = vrot.slane %v874_v18, 7  ;;  %v1037_v42 = vsel %vm657_vm0, %v1035_v25, %v1036_v21 }
  0xe4   : > { %v1039_v32 = vsel %vm657_vm0, %v1036_v21, %v1038_v10  ;;  %v877_v52 = vmul.f32 0.11111111, %v861_v51  ;;  %v878_v31 = vmul.f32 0.11111111, %v862_v41 }
  0xe5   : > { %1470 = vmatmul.msk.bf16.vlgmr.msra.gmra.mxu1 %vm1069_vm4, %v1058_v34  ;;  %v909_v63 = vsel %vm903_vm3, %v907_v58, %v908_v53  ;;  %v955_v9 = vsub.f32 %v2229_v8, %v907_v58  ;;  %v957_v40 = vsub.f32 %v2073_v44, %v908_v53  ;;  %v1063_v59 = vpack.c.bf16 %v1039_v32, %v1037_v42 }
  0xe6   : > { %v956_v61 = vsub.f32 %v2075_v22, %v909_v63  ;;  %v913_v57 = vrot.slane %v877_v52, 7  ;;  %v914_v62 = vrot.slane %v878_v31, 7 }
  0xe7   : > { %v1005_v55 = vrot.slane %v955_v9, 1  ;;  %v1008_v19 = vrot.slane %v957_v40, 1 }
  0xe8   : > { %v1006_v50 = vrot.slane %v956_v61, 1  ;;  %v961_v26 = vsub.f32 %v2038_v6, %v913_v57  ;;  %v915_v27 = vsel %vm903_vm3, %v913_v57, %v914_v62  ;;  %v963_v45 = vsub.f32 %v2094_v48, %v914_v62 }
  0xe9   : > { %v962_v44 = vsub.f32 %v2034_v4, %v915_v27  ;;  %v2432_v4 = vld [vmem:[%s2569_s4] ss:$0 sm:$0xff] }
  0xea   : > { %v1007_v16 = vsel %vm657_vm0, %v1005_v55, %v1006_v50  ;;  %v1009_v8 = vsel %vm657_vm0, %v1006_v50, %v1008_v19  ;;  %v1015_v36 = vrot.slane %v961_v26, 1  ;;  %v1018_v60 = vrot.slane %v963_v45, 1  ;;  %v1267_v19 = vld [vmem:[%s2453_s7 + $0x40] sm:$0xff] }
  0xeb   : > { %1475 = vmatmul.msk.bf16.gmra.mxu3 %vm1069_vm4, %v1063_v59  ;;  %v1057_v22 = vpack.c.bf16 %v1009_v8, %v1007_v16  ;;  %v1016_v35 = vrot.slane %v962_v44, 1 }
  0xed   : > { %1469 = vmatmul.msk.bf16.gmra.mxu0 %vm1069_vm4, %v1057_v22  ;;  %v1017_v6 = vsel %vm657_vm0, %v1015_v36, %v1016_v35  ;;  %v1019_v48 = vsel %vm657_vm0, %v1016_v35, %v1018_v60 }
  0xee   : > { %v1059_v30 = vpack.c.bf16 %v1019_v48, %v1017_v6  ;;  %v2651_v48 = vld [vmem:[#allocation12_spill] sm:$0xff] }
  0xf5   : > { %1471 = vmatmul.msk.bf16.gmra.mxu1 %vm1069_vm4, %v1059_v30 }
 0x155   : > { %v1127_v0 = vpop.f32.mrf.mxu2 }
 0x156   : > { %v1128_v33 = vadd.f32 %v2432_v4, %v1127_v0 }
 0x158   : > { %v1155_v7 = vsub.f32 0.0, %v1128_v33  ;;  %v1259_v33 = vld [vmem:[%s2453_s7] sm:$0xff] }
 0x159   : > { %v1107_v14 = vpop.f32.mrf.mxu0 }
 0x15a   : > { %v1179_v11 = vmul.f32 1.442695, %v1155_v7  ;;  %v1108_v28 = vadd.f32 %v2432_v4, %v1107_v14 }
 0x15c   : > { %1628 = vpow2.f32 %v1179_v11  ;;  %v1147_v15 = vsub.f32 0.0, %v1108_v28 }
 0x15d   : > { %v1129_v56 = vpop.f32.mrf.mxu2 }
 0x15e   : > { %v1137_v5 = vpop.f32.mrf.mxu3  ;;  %v1130_v12 = vadd.f32 %v2432_v4, %v1129_v56  ;;  %v1163_v43 = vmul.f32 1.442695, %v1147_v15 }
 0x15f   : > { %v1138_v20 = vadd.f32 %v2432_v4, %v1137_v5 }
 0x160   : > { %v1156_v2 = vsub.f32 0.0, %v1130_v12  ;;  %1630 = vpow2.f32 %v1163_v43 }
 0x161   : > { %v1159_v37 = vsub.f32 0.0, %v1138_v20  ;;  %v1109_v13 = vpop.f32.mrf.mxu0 }
 0x162   : > { %v1629_v3 = vpop.eup %1628  ;;  %v1181_v10 = vmul.f32 1.442695, %v1156_v2  ;;  %v1110_v29 = vadd.f32 %v2432_v4, %v1109_v13  ;;  %v1117_v24 = vpop.f32.mrf.mxu1 }
 0x163   : > { %v1203_v39 = vadd.f32 1.0, %v1629_v3  ;;  %v1187_v38 = vmul.f32 1.442695, %v1159_v37  ;;  %v1118_v21 = vadd.f32 %v2432_v4, %v1117_v24  ;;  %v2652_v3 = vld [vmem:[#allocation4_spill] sm:$0xff] }
 0x164   : > { %1632 = vpow2.f32 %v1181_v10  ;;  %v1148_v17 = vsub.f32 0.0, %v1110_v29 }
 0x165   : > { %1634 = vrcp.f32 %v1203_v39  ;;  %v1132_v23 = vpop.f32.mrf.mxu2  ;;  %v1151_v18 = vsub.f32 0.0, %v1118_v21 }
 0x166   : > { %v1631_v1 = vpop.eup %1630  ;;  %1636 = vpow2.f32 %v1187_v38  ;;  %v1139_v47 = vpop.f32.mrf.mxu3  ;;  %v1133_v46 = vadd.f32 %v2432_v4, %v1132_v23  ;;  %v1165_v25 = vmul.f32 1.442695, %v1148_v17  ;;  %v1268_v38 = vld [vmem:[%s2453_s7 + $0x48] sm:$0xff] }
 0x167   : > { %v1195_v51 = vadd.f32 1.0, %v1631_v1  ;;  %v1140_v34 = vadd.f32 %v2432_v4, %v1139_v47  ;;  %v1171_v58 = vmul.f32 1.442695, %v1151_v18  ;;  %v2653_v18 = vld [vmem:[#allocation2_spill] sm:$0xff] }
 0x168   : > { %v1157_v53 = vsub.f32 0.0, %v1133_v46  ;;  %1638 = vpow2.f32 %v1165_v25 }
 0x169   : > { %1640 = vrcp.f32 %v1195_v51  ;;  %v1160_v41 = vsub.f32 0.0, %v1140_v34  ;;  %v1271_v51 = vld [vmem:[%s2453_s7 + $0x60] sm:$0xff] }
 0x16a   : > { %v1633_v42 = vpop.eup %1632  ;;  %v1183_v32 = vmul.f32 1.442695, %v1157_v53  ;;  %1642 = vpow2.f32 %v1171_v58  ;;  %v1112_v52 = vpop.f32.mrf.mxu0 }
 0x16b   : > { %v1119_v63 = vpop.f32.mrf.mxu1  ;;  %v1635_v9 = vpop.eup %1634  ;;  %v1204_v40 = vadd.f32 1.0, %v1633_v42  ;;  %v1189_v31 = vmul.f32 1.442695, %v1160_v41  ;;  %v1113_v61 = vadd.f32 %v2432_v4, %v1112_v52  ;;  %v2654_v52 = vld [vmem:[#allocation14_spill] sm:$0xff] }
 0x16c   : > { %v1120_v57 = vadd.f32 %v2432_v4, %v1119_v63  ;;  %v1637_v59 = vpop.eup %1636  ;;  %v1235_v55 = vmul.f32 %v1635_v9, %v2122_v49  ;;  %1644 = vpow2.f32 %v1183_v32 }
 0x16d   : > { %v1207_v62 = vadd.f32 1.0, %v1637_v59  ;;  %1646 = vrcp.f32 %v1204_v40  ;;  %v1134_v50 = vpop.f32.mrf.mxu2  ;;  %v1149_v26 = vsub.f32 0.0, %v1113_v61  ;;  %v1260_v40 = vld [vmem:[%s2453_s7 + $0x8] sm:$0xff] }
 0x16e   : > { %v1152_v27 = vsub.f32 0.0, %v1120_v57  ;;  %v1639_v45 = vpop.eup %1638  ;;  %v1251_v16 = vadd.f32 %v1235_v55, %v2122_v49  ;;  %1648 = vpow2.f32 %v1189_v31  ;;  %v1135_v8 = vadd.f32 %v2432_v4, %v1134_v50  ;;  %v1142_v44 = vpop.f32.mrf.mxu3 }
 0x16f   : > { %v1641_v22 = vpop.eup %1640  ;;  %1650 = vrcp.f32 %v1207_v62  ;;  %v1196_v36 = vadd.f32 1.0, %v1639_v45  ;;  %v1167_v35 = vmul.f32 1.442695, %v1149_v26  ;;  %v1143_v0 = vadd.f32 %v2432_v4, %v1142_v44  ;;  %v1263_v26 = vld [vmem:[%s2453_s7 + $0x20] sm:$0xff]  ;;  %v2655_v44 = vld [vmem:[#allocation7_spill] sm:$0xff] }
 0x170   : > { %v1643_v60 = vpop.eup %1642  ;;  %v1283_v6 = vadd.f32 %v1267_v19, %v1251_v16  ;;  %v1227_v30 = vmul.f32 %v1641_v22, %v2651_v48  ;;  %v1158_v49 = vsub.f32 0.0, %v1135_v8  ;;  %v1173_v14 = vmul.f32 1.442695, %v1152_v27 }
 0x171   : > { %1652 = vrcp.f32 %v1196_v36  ;;  %v1199_v7 = vadd.f32 1.0, %v1643_v60  ;;  %v1161_v56 = vsub.f32 0.0, %v1143_v0  ;;  %v2656_v0 = vld [vmem:[#allocation3_spill] sm:$0xff] }
 0x172   : > { %v1645_v11 = vpop.eup %1644  ;;  %1299 = vst.msk [vmem:[%s2466_s10 + $0x40] sm:$0xff] %vm1069_vm4, %v1283_v6  ;;  %v1243_v28 = vadd.f32 %v1227_v30, %v2651_v48  ;;  %v1185_v15 = vmul.f32 1.442695, %v1158_v49  ;;  %1654 = vpow2.f32 %v1167_v35  ;;  %v1114_v5 = vpop.f32.mrf.mxu0  ;;  %v1269_v6 = vld [vmem:[%s2453_s7 + $0x50] sm:$0xff] }
 0x173   : > { %v1122_v12 = vpop.f32.mrf.mxu1  ;;  %v1647_v43 = vpop.eup %1646  ;;  %v1205_v20 = vadd.f32 1.0, %v1645_v11  ;;  %1656 = vrcp.f32 %v1199_v7  ;;  %v1115_v2 = vadd.f32 %v2432_v4, %v1114_v5  ;;  %v1191_v24 = vmul.f32 1.442695, %v1161_v56  ;;  %v1272_v11 = vld [vmem:[%s2453_s7 + $0x68] sm:$0xff] }
 0x174   : > { %v1123_v37 = vadd.f32 %v2432_v4, %v1122_v12  ;;  %v1649_v13 = vpop.eup %1648  ;;  %v1236_v10 = vmul.f32 %v1647_v43, %v2652_v3  ;;  %v1275_v29 = vadd.f32 %v1259_v33, %v1243_v28  ;;  %1658 = vpow2.f32 %v1185_v15 }
 0x175   : > { %v1651_v39 = vpop.eup %1650  ;;  %v1208_v21 = vadd.f32 1.0, %v1649_v13  ;;  %1660 = vrcp.f32 %v1205_v20  ;;  %v1150_v17 = vsub.f32 0.0, %v1115_v2 }
 0x176   : > { %v1153_v23 = vsub.f32 0.0, %v1123_v37  ;;  %v1239_v1 = vmul.f32 %v1651_v39, %v2653_v18  ;;  %v1252_v47 = vadd.f32 %v1236_v10, %v2652_v3  ;;  %1291 = vst.msk [vmem:[%s2466_s10] sm:$0xff] %vm1069_vm4, %v1275_v29  ;;  %1662 = vpow2.f32 %v1173_v14  ;;  %v1144_v46 = vpop.f32.mrf.mxu3  ;;  %v2657_v37 = vld [vmem:[#allocation13_spill] sm:$0xff]  ;;  %v1261_v10 = vld [vmem:[%s2453_s7 + $0x10] sm:$0xff] }
 0x177   : > { %v1653_v25 = vpop.eup %1652  ;;  %1664 = vrcp.f32 %v1208_v21  ;;  %v1169_v34 = vmul.f32 1.442695, %v1150_v17  ;;  %v1145_v53 = vadd.f32 %v2432_v4, %v1144_v46  ;;  %v1270_v17 = vld [vmem:[%s2453_s7 + $0x58] sm:$0xff] }
 0x178   : > { %v1175_v58 = vmul.f32 1.442695, %v1153_v23  ;;  %v1655_v41 = vpop.eup %1654  ;;  %v1255_v42 = vadd.f32 %v1239_v1, %v2653_v18  ;;  %v1284_v32 = vadd.f32 %v1268_v38, %v1252_v47  ;;  %v1228_v63 = vmul.f32 %v1653_v25, %v2654_v52  ;;  %v2659_v47 = vld [vmem:[#allocation15_spill] sm:$0xff] }
 0x179   : > { %1666 = vpow2.f32 %v1191_v24  ;;  %v1657_v9 = vpop.eup %1656  ;;  %v1197_v31 = vadd.f32 1.0, %v1655_v41  ;;  %v1162_v61 = vsub.f32 0.0, %v1145_v53  ;;  %v2658_v24 = vld [vmem:[#allocation6_spill] sm:$0xff] }
 0x17a   : > { %1668 = vpow2.f32 %v1169_v34  ;;  %v1659_v57 = vpop.eup %1658  ;;  %v1287_v59 = vadd.f32 %v1271_v51, %v1255_v42  ;;  %1300 = vst.msk [vmem:[%s2466_s10 + $0x48] sm:$0xff] %vm1069_vm4, %v1284_v32  ;;  %v1244_v55 = vadd.f32 %v1228_v63, %v2654_v52  ;;  %v1231_v19 = vmul.f32 %v1657_v9, %v2303_v54  ;;  %v1264_v51 = vld [vmem:[%s2453_s7 + $0x28] sm:$0xff]  ;;  %v2660_v41 = vld [vmem:[#allocation10_spill] sm:$0xff]  ;;  %v1273_v52 = vld [vmem:[%s2453_s7 + $0x70] sm:$0xff] }
 0x17b   : > { %1670 = vpow2.f32 %v1175_v58  ;;  %v1124_v62 = vpop.f32.mrf.mxu1  ;;  %v1661_v50 = vpop.eup %1660  ;;  %v1206_v27 = vadd.f32 1.0, %v1659_v57  ;;  %v1193_v45 = vmul.f32 1.442695, %v1162_v61  ;;  %v2661_v63 = vld [vmem:[#allocation8_spill] sm:$0xff]  ;;  %v1262_v57 = vld [vmem:[%s2453_s7 + $0x18] sm:$0xff] }
 0x17c   : > { %1672 = vrcp.f32 %v1197_v31  ;;  %v1125_v16 = vadd.f32 %v2432_v4, %v1124_v62  ;;  %v1663_v8 = vpop.eup %1662  ;;  %1303 = vst.msk [vmem:[%s2466_s10 + $0x60] sm:$0xff] %vm1069_vm4, %v1287_v59  ;;  %v1237_v22 = vmul.f32 %v1661_v50, %v2655_v44  ;;  %v1276_v36 = vadd.f32 %v1260_v40, %v1244_v55  ;;  %v2662_v59 = vld [vmem:[#allocation5_spill] sm:$0xff]  ;;  %v1265_v62 = vld [vmem:[%s2453_s7 + $0x30] sm:$0xff] }
 0x17d   : > { %v1247_v35 = vadd.f32 %v1231_v19, %v2303_v54  ;;  %v1665_v60 = vpop.eup %1664  ;;  %1674 = vrcp.f32 %v1206_v27  ;;  %v1200_v48 = vadd.f32 1.0, %v1663_v8 }
 0x17e   : > { %v1154_v30 = vsub.f32 0.0, %v1125_v16  ;;  %v1240_v33 = vmul.f32 %v1665_v60, %v2656_v0  ;;  %v1253_v4 = vadd.f32 %v1237_v22, %v2655_v44  ;;  %1292 = vst.msk [vmem:[%s2466_s10 + $0x8] sm:$0xff] %vm1069_vm4, %v1276_v36  ;;  %1676 = vpow2.f32 %v1193_v45  ;;  %v2663_v44 = vld [vmem:[#allocation11_spill] sm:$0xff]  ;;  %v1274_v36 = vld [vmem:[%s2453_s7 + $0x78] sm:$0xff] }
 0x17f   : > { %v1667_v49 = vpop.eup %1666  ;;  %v1279_v7 = vadd.f32 %v1263_v26, %v1247_v35  ;;  %1678 = vrcp.f32 %v1200_v48  ;;  %v2664_v48 = vld [vmem:[#allocation9_spill] sm:$0xff] }
 0x180   : > { %v1669_v14 = vpop.eup %1668  ;;  %v1209_v54 = vadd.f32 1.0, %v1667_v49  ;;  %v1256_v15 = vadd.f32 %v1240_v33, %v2656_v0  ;;  %v1285_v56 = vadd.f32 %v1269_v6, %v1253_v4  ;;  %v1177_v12 = vmul.f32 1.442695, %v1154_v30  ;;  %v1266_v49 = vld [vmem:[%s2453_s7 + $0x38] sm:$0xff] }
 0x181   : > { %v1671_v28 = vpop.eup %1670  ;;  %1295 = vst.msk [vmem:[%s2466_s10 + $0x20] sm:$0xff] %vm1069_vm4, %v1279_v7  ;;  %v1198_v5 = vadd.f32 1.0, %v1669_v14 }
 0x182   : > { %v1673_v43 = vpop.eup %1672  ;;  %1680 = vrcp.f32 %v1209_v54  ;;  %v1201_v20 = vadd.f32 1.0, %v1671_v28  ;;  %v1288_v2 = vadd.f32 %v1272_v11, %v1256_v15  ;;  %1301 = vst.msk [vmem:[%s2466_s10 + $0x50] sm:$0xff] %vm1069_vm4, %v1285_v56 }
 0x183   : > { %v1229_v13 = vmul.f32 %v1673_v43, %v2657_v37  ;;  %1682 = vrcp.f32 %v1198_v5  ;;  %v1675_v3 = vpop.eup %1674 }
 0x184   : > { %1684 = vrcp.f32 %v1201_v20  ;;  %v1677_v29 = vpop.eup %1676  ;;  %1304 = vst.msk [vmem:[%s2466_s10 + $0x68] sm:$0xff] %vm1069_vm4, %v1288_v2  ;;  %v1238_v39 = vmul.f32 %v1675_v3, %v2658_v24 }
 0x185   : > { %v1245_v38 = vadd.f32 %v1229_v13, %v2657_v37  ;;  %1686 = vpow2.f32 %v1177_v12  ;;  %v1679_v21 = vpop.eup %1678  ;;  %v1210_v23 = vadd.f32 1.0, %v1677_v29 }
 0x186   : > { %v1254_v18 = vadd.f32 %v1238_v39, %v2658_v24  ;;  %v1232_v46 = vmul.f32 %v1679_v21, %v2659_v47 }
 0x187   : > { %v1277_v1 = vadd.f32 %v1261_v10, %v1245_v38  ;;  %1688 = vrcp.f32 %v1210_v23 }
 0x188   : > { %v1681_v25 = vpop.eup %1680  ;;  %v1286_v58 = vadd.f32 %v1270_v17, %v1254_v18  ;;  %v1248_v53 = vadd.f32 %v1232_v46, %v2659_v47 }
 0x189   : > { %v1683_v34 = vpop.eup %1682  ;;  %1293 = vst.msk [vmem:[%s2466_s10 + $0x10] sm:$0xff] %vm1069_vm4, %v1277_v1  ;;  %v1241_v42 = vmul.f32 %v1681_v25, %v2660_v41 }
 0x18a   : > { %v1685_v32 = vpop.eup %1684  ;;  %v1230_v9 = vmul.f32 %v1683_v34, %v2661_v63  ;;  %1302 = vst.msk [vmem:[%s2466_s10 + $0x58] sm:$0xff] %vm1069_vm4, %v1286_v58  ;;  %v1280_v31 = vadd.f32 %v1264_v51, %v1248_v53 }
 0x18b   : > { %v1687_v40 = vpop.eup %1686  ;;  %v1257_v61 = vadd.f32 %v1241_v42, %v2660_v41  ;;  %v1233_v55 = vmul.f32 %v1685_v32, %v2662_v59 }
 0x18c   : > { %v1246_v19 = vadd.f32 %v1230_v9, %v2661_v63  ;;  %v1202_v50 = vadd.f32 1.0, %v1687_v40  ;;  %1296 = vst.msk [vmem:[%s2466_s10 + $0x28] sm:$0xff] %vm1069_vm4, %v1280_v31 }
 0x18d   : > { %v1289_v26 = vadd.f32 %v1273_v52, %v1257_v61  ;;  %v1249_v27 = vadd.f32 %v1233_v55, %v2662_v59  ;;  %v1689_v45 = vpop.eup %1688 }
 0x18e   : > { %v1278_v16 = vadd.f32 %v1262_v57, %v1246_v19  ;;  %1690 = vrcp.f32 %v1202_v50  ;;  %v1242_v22 = vmul.f32 %v1689_v45, %v2663_v44 }
 0x18f   : > { %1305 = vst.msk [vmem:[%s2466_s10 + $0x70] sm:$0xff] %vm1069_vm4, %v1289_v26  ;;  %v1281_v8 = vadd.f32 %v1265_v62, %v1249_v27 }
 0x190   : > { %1294 = vst.msk [vmem:[%s2466_s10 + $0x18] sm:$0xff] %vm1069_vm4, %v1278_v16  ;;  %v1258_v35 = vadd.f32 %v1242_v22, %v2663_v44 }
 0x191   : > { %1297 = vst.msk [vmem:[%s2466_s10 + $0x30] sm:$0xff] %vm1069_vm4, %v1281_v8 }
 0x192   : > { %v1290_v60 = vadd.f32 %v1274_v36, %v1258_v35 }
 0x194   : > { %v1691_v6 = vpop.eup %1690  ;;  %1306 = vst.msk [vmem:[%s2466_s10 + $0x78] sm:$0xff] %vm1069_vm4, %v1290_v60 }
 0x195   : > { %v1234_v30 = vmul.f32 %v1691_v6, %v2664_v48 }
 0x197   : > { %v1250_v0 = vadd.f32 %v1234_v30, %v2664_v48 }
 0x199   : > { %v1282_v33 = vadd.f32 %v1266_v49, %v1250_v0 }
 0x19b   : > { %1298 = vst.msk [vmem:[%s2466_s10 + $0x38] sm:$0xff] %vm1069_vm4, %v1282_v33 }
 0x19c PF: > { %s15_s22 = sadd.s32 1, %s1730_s22   ;;  %s2665_s18 = smov %s1722_s20 }
 0x19d   : > { %p12_p9 = scmp.ge.s32.totalorder %s15_s22, 6   ;;  %s2666_s19 = smov %s1726_s21 }
 0x19e   : > { %s2667_s20 = smov %s2670_s23  ;;  %s2668_s21 = smov %s2674_s24 }
 0x19f   :  { %14 = sbr.rel (!%p12_p9) target bundleno = 3 (0x3), region = 76 }

</bundles_post_ra>
